<compile_context>
chip_gen: v7x
topology: tpu7x:2x2x1
jax: 0.10.0
libtpu: 0.0.40
codegen_flags: <defaults>
</compile_context>

<pallas_src>
import functools

import numpy as np
import jax
import jax.numpy as jnp
from jax import lax
from jax.experimental import pallas as pl
from jax.experimental.pallas import tpu as pltpu

_NEG = -1e30  # plain Python float (NOT a jnp array -> no captured constant)


def _matrix_loss_kernel(counts_ref, lhs_ref, rhs_ref, out_ref, *,
                        dims, margin, obj_coef, pred_coef):
    a0, a1, a2, a3, b0, b1, b2, b3 = dims
    c = counts_ref.shape[0]                       # samples per chunk
    f32 = jnp.float32

    cnt = counts_ref[...]                         # (C, 1, 8) int32
    cnt_f = cnt.astype(f32)
    inv = 1.0 / jnp.maximum(cnt_f, 1.0)           # (C, 1, 8) reciprocal-or-1

    def n(k):                                     # count  -> (C,1,1) int32
        return cnt[:, :, k:k + 1]

    def r(k):                                     # 1/count -> (C,1,1) f32
        return inv[:, :, k:k + 1]

    # Validity masks: built once per operand per chunk and shared across every
    # pairing that uses that operand (rows = image side, cols = caption side).
    def row_mask(m, k):
        return lax.broadcasted_iota(jnp.int32, (1, m, 1), 1) < n(k)   # (C,m,1)

    def col_mask(m, k):
        return lax.broadcasted_iota(jnp.int32, (1, 1, m), 2) < n(k)   # (C,1,m)

    rm_ipo, rm_ino = row_mask(a0, 0), row_mask(a1, 1)
    rm_ipp, rm_inp = row_mask(a2, 2), row_mask(a3, 3)
    cm_cps, cm_cns = col_mask(b0, 4), col_mask(b1, 5)
    cm_cpr, cm_cnr = col_mask(b2, 6), col_mask(b3, 7)

    # Image-side operands (ref slices are free views; the value slices below
    # are 8-aligned sublane slices).
    obj_all = lhs_ref[:, 0:a0 + a1, :]                       # ip_obj | in_obj
    prd_all = lhs_ref[:, a0 + a1:a0 + a1 + a2 + a3, :]       # ip_pred | in_pred
    ip_obj = obj_all[:, 0:a0, :]
    ip_prd = prd_all[:, 0:a2, :]
    # Caption-side operands.
    cp_sent = rhs_ref[:, 0:b0, :]
    cn_sent = rhs_ref[:, b0:b0 + b1, :]
    cp_rels = rhs_ref[:, b0 + b1:b0 + b1 + b2, :]
    cn_rels = rhs_ref[:, b0 + b1 + b2:b0 + b1 + b2 + b3, :]

    def dots(a, b):
        # Batched over the chunk; contracts the feature dim of both operands
        # (A.B^T form, same pattern as the reference flash-attention kernel).
        return jnp.einsum('cmd,cnd->cmn', a, b, preferred_element_type=f32)

    s_obj_cp = dots(obj_all, cp_sent)     # (C, a0+a1, b0)
    s_obj_cn = dots(ip_obj, cn_sent)      # (C, a0,    b1)
    s_prd_cp = dots(prd_all, cp_rels)     # (C, a2+a3, b2)
    s_prd_cn = dots(ip_prd, cn_rels)      # (C, a2,    b3)

    def pair(s, rm, cm, inv_a, inv_b, na, nb):
        """Bidirectional ragged matching scores for one (image, caption) pair.

        Padded rows/cols of the operands are zero vectors, so they contribute
        exactly 0 to the sums; masks are only needed to exclude them from the
        maxima.  Both directions are 0 when either count is 0.
        """
        row_max = jnp.max(jnp.where(cm, s, _NEG), axis=2, keepdims=True)  # (C,Ma,1)
        s_ab = jnp.sum(row_max, axis=1, keepdims=True)                    # (C,1,1)
        col_max = jnp.max(jnp.where(rm, s, _NEG), axis=1, keepdims=True)  # (C,1,Mb)
        s_ba = jnp.sum(col_max, axis=2, keepdims=True)                    # (C,1,1)
        valid = jnp.logical_and(na > 0, nb > 0)
        s_ab = jnp.where(valid, s_ab * inv_a, 0.0)
        s_ba = jnp.where(valid, s_ba * inv_b, 0.0)
        return s_ab, s_ba

    n_ip_cp, n_cp_ip = pair(s_obj_cp[:, 0:a0, :], rm_ipo, cm_cps, r(0), r(4), n(0), n(4))
    n_in_cp, n_cp_in = pair(s_obj_cp[:, a0:a0 + a1, :], rm_ino, cm_cps, r(1), r(4), n(1), n(4))
    n_ip_cn, n_cn_ip = pair(s_obj_cn, rm_ipo, cm_cns, r(0), r(5), n(0), n(5))
    e_ip_cp, e_cp_ip = pair(s_prd_cp[:, 0:a2, :], rm_ipp, cm_cpr, r(2), r(6), n(2), n(6))
    e_in_cp, e_cp_in = pair(s_prd_cp[:, a2:a2 + a3, :], rm_inp, cm_cpr, r(3), r(6), n(3), n(6))
    e_ip_cn, e_cn_ip = pair(s_prd_cn, rm_ipp, cm_cnr, r(2), r(7), n(2), n(7))

    s_ip_cp = obj_coef * n_ip_cp + pred_coef * e_ip_cp
    s_ip_cn = obj_coef * n_ip_cn + pred_coef * e_ip_cn
    s_in_cp = obj_coef * n_in_cp + pred_coef * e_in_cp
    s_cp_ip = obj_coef * n_cp_ip + pred_coef * e_cp_ip
    s_cp_in = obj_coef * n_cp_in + pred_coef * e_cp_in
    s_cn_ip = obj_coef * n_cn_ip + pred_coef * e_cn_ip

    image_anchor = jnp.maximum(margin - (s_ip_cp - s_ip_cn), 0.0)
    caption_anchor = jnp.maximum(margin - (s_ip_cp - s_in_cp), 0.0)
    image_anchor_2 = jnp.maximum(margin - (s_cp_ip - s_cp_in), 0.0)
    caption_anchor_2 = jnp.maximum(margin - (s_cp_ip - s_cn_ip), 0.0)

    loss = image_anchor + caption_anchor + image_anchor_2 + caption_anchor_2  # (C,1,1)

    # Lane-dense store: scatter the C per-sample scalars into one (1, C) lane
    # row via an identity mask (robustly lowerable alternative to a tiny
    # transpose), then store the whole row once per chunk.
    loss2 = loss[:, :, 0]                                                 # (C, 1)
    sub = lax.broadcasted_iota(jnp.int32, (c, c), 0)
    lane = lax.broadcasted_iota(jnp.int32, (c, c), 1)
    row = jnp.sum(jnp.where(sub == lane, jnp.broadcast_to(loss2, (c, c)), 0.0),
                  axis=0, keepdims=True)                                  # (1, C)
    out_ref[0] = row


# ------------------------------- wrapper -------------------------------------
def _round_up(n, m):
    n = int(n)
    return ((max(n, 1) + m - 1) // m) * m


def _pad_ragged(flat, counts, max_n, dtype):
    """Ragged rows [total, D] + per-sample counts -> zero-padded [B, max_n, D]."""
    counts = np.asarray(counts, np.int64)
    b = int(counts.shape[0])
    flat = jnp.asarray(flat, dtype)
    total, d = int(flat.shape[0]), int(flat.shape[1])
    valid = np.arange(max_n)[None, :] < counts[:, None]
    if total == 0:
        return jnp.zeros((b, max_n, d), dtype)
    offsets = np.zeros(b, np.int64)
    offsets[1:] = np.cumsum(counts)[:-1]       # same running counters as the torch loop
    idx = np.clip(offsets[:, None] + np.arange(max_n)[None, :], 0, total - 1)
    g = jnp.take(flat, jnp.asarray(idx.reshape(-1), jnp.int32), axis=0).reshape(b, max_n, d)
    return jnp.where(jnp.asarray(valid)[:, :, None], g, 0)


def _pad_dense(sent, lens, max_n, dtype):
    """[B, S, D] sentences -> [B, max_n, D] with positions >= len zeroed."""
    sent = jnp.asarray(sent, dtype)
    b, s, d = sent.shape
    if s >= max_n:
        sent = sent[:, :max_n, :]
    else:
        sent = jnp.pad(sent, ((0, 0), (0, max_n - s), (0, 0)))
    valid = np.arange(max_n)[None, :] < np.asarray(lens, np.int64)[:, None]
    return jnp.where(jnp.asarray(valid)[:, :, None], sent, 0)


def _pad_batch(x, b_pad):
    b = int(x.shape[0])
    if b == b_pad:
        return x
    return jnp.pad(x, ((0, b_pad - b),) + ((0, 0),) * (x.ndim - 1))


def matrix_loss(image_pos_obj, image_pos_pred, image_pos_numb_obj, image_pos_numb_pred,
                caption_pos_sent, caption_pos_rels, caption_pos_len_sent, caption_pos_numb_pred,
                image_neg_obj, image_neg_pred, image_neg_numb_obj, image_neg_numb_pred,
                caption_neg_sent, caption_neg_rels, caption_neg_len_sent, caption_neg_numb_pred,
                margin=1.0, obj_coef=1.0, pred_coef=1.0, reduction='mean',
                chunk=8, compute_dtype=jnp.float32):
    # Host-side static counts (data-dependent shapes -> host repacking).
    ipno = np.asarray(image_pos_numb_obj, np.int64)
    inno = np.asarray(image_neg_numb_obj, np.int64)
    ipnp = np.asarray(image_pos_numb_pred, np.int64)
    innp = np.asarray(image_neg_numb_pred, np.int64)
    cpls = np.asarray(caption_pos_len_sent, np.int64)
    cnls = np.asarray(caption_neg_len_sent, np.int64)
    cpnp = np.asarray(caption_pos_numb_pred, np.int64)
    cnnp = np.asarray(caption_neg_numb_pred, np.int64)
    bsz = int(ipnp.shape[0])

    dtype = jnp.dtype(compute_dtype)
    row_mult = 16 if dtype.itemsize == 2 else 8     # sublane packing (bf16 packs 2/row)

    a0 = _round_up(ipno.max(), row_mult)
    a1 = _round_up(inno.max(), row_mult)
    a2 = _round_up(ipnp.max(), row_mult)
    a3 = _round_up(innp.max(), row_mult)
    b0 = _round_up(cpls.max(), row_mult)
    b1 = _round_up(cnls.max(), row_mult)
    b2 = _round_up(cpnp.max(), row_mult)
    b3 = _round_up(cnnp.max(), row_mult)

    ip_obj = _pad_ragged(image_pos_obj, ipno, a0, dtype)
    in_obj = _pad_ragged(image_neg_obj, inno, a1, dtype)
    ip_prd = _pad_ragged(image_pos_pred, ipnp, a2, dtype)
    in_prd = _pad_ragged(image_neg_pred, innp, a3, dtype)
    cp_sent = _pad_dense(caption_pos_sent, cpls, b0, dtype)
    cn_sent = _pad_dense(caption_neg_sent, cnls, b1, dtype)
    cp_rels = _pad_ragged(caption_pos_rels, cpnp, b2, dtype)
    cn_rels = _pad_ragged(caption_neg_rels, cnnp, b3, dtype)

    d = int(np.asarray(caption_pos_sent).shape[-1]) if hasattr(caption_pos_sent, 'shape') else int(cp_sent.shape[-1])
    d = int(cp_sent.shape[-1])

    chunk = max(1, int(chunk))
    b_pad = _round_up(bsz, chunk)
    g = b_pad // chunk

    # Coalesced inputs: 2 embedding arrays + 1 counts block per grid step.
    lhs = _pad_batch(jnp.concatenate([ip_obj, in_obj, ip_prd, in_prd], axis=1), b_pad)
    rhs = _pad_batch(jnp.concatenate([cp_sent, cn_sent, cp_rels, cn_rels], axis=1), b_pad)

    counts_np = np.zeros((b_pad, 1, 8), np.int32)
    counts_np[:bsz, 0, 0] = ipno
    counts_np[:bsz, 0, 1] = inno
    counts_np[:bsz, 0, 2] = ipnp
    counts_np[:bsz, 0, 3] = innp
    counts_np[:bsz, 0, 4] = cpls
    counts_np[:bsz, 0, 5] = cnls
    counts_np[:bsz, 0, 6] = cpnp
    counts_np[:bsz, 0, 7] = cnnp
    counts = jnp.asarray(counts_np)

    m_lhs = a0 + a1 + a2 + a3
    m_rhs = b0 + b1 + b2 + b3
    dims = (a0, a1, a2, a3, b0, b1, b2, b3)

    kernel = functools.partial(_matrix_loss_kernel, dims=dims, margin=float(margin),
                               obj_coef=float(obj_coef), pred_coef=float(pred_coef))

    # VMEM budget: inputs are double-buffered by the pipeline; only raise the
    # scoped limit when the footprint actually needs it (v5e default 16 MiB,
    # v6e/v7x 32 MiB; keep comfortably under v7x's 64 MiB physical VMEM).
    block_bytes = chunk * (m_lhs + m_rhs) * d * dtype.itemsize + chunk * 8 * 4
    score_bytes = 4 * chunk * ((a0 + a1) * b0 + a0 * b1 + (a2 + a3) * b2 + a2 * b3)
    est_bytes = 2 * block_bytes + 4 * score_bytes + (1 << 20)
    cp_kwargs = dict(dimension_semantics=("parallel",))
    if est_bytes > 12 * 2**20:
        cp_kwargs["vmem_limit_bytes"] = int(min(60 * 2**20, 2 * est_bytes))

    out = pl.pallas_call(
        kernel,
        out_shape=jax.ShapeDtypeStruct((g, 1, chunk), jnp.float32),
        grid_spec=pltpu.PrefetchScalarGridSpec(
            num_scalar_prefetch=0,
            grid=(g,),
            in_specs=[
                pl.BlockSpec((chunk, 1, 8), lambda i: (i, 0, 0)),
                pl.BlockSpec((chunk, m_lhs, d), lambda i: (i, 0, 0)),
                pl.BlockSpec((chunk, m_rhs, d), lambda i: (i, 0, 0)),
            ],
            out_specs=pl.BlockSpec((1, 1, chunk), lambda i: (i, 0, 0)),
        ),
        compiler_params=pltpu.CompilerParams(**cp_kwargs),
    )(counts, lhs, rhs)

    per_sample = out.reshape(g * chunk)[:bsz]
    if reduction == 'mean':
        return jnp.mean(per_sample)
    elif reduction == 'sum':
        return jnp.sum(per_sample)
    elif reduction == 'none':
        return per_sample
    else:
        raise Exception('Unexpected reduction {}'.format(reduction))


# ----------------------------- numpy reference ------------------------------
def _reference(ipo, ipp, ipno, ipnp, cps, cpr, cpls, cpnp,
               ino, inp_, inno, innp, cns, cnr, cnls, cnnp,
               margin=1.0, obj_coef=1.0, pred_coef=1.0, reduction='mean'):
    ipo, ipp, cps, cpr = (np.asarray(x, np.float32) for x in (ipo, ipp, cps, cpr))
    ino, inp_, cns, cnr = (np.asarray(x, np.float32) for x in (ino, inp_, cns, cnr))
    bsz = len(ipnp)
    names = ["n_ip_cp", "e_ip_cp", "n_ip_cn", "e_ip_cn", "n_in_cp", "e_in_cp",
             "n_cp_ip", "e_cp_ip", "n_cn_ip", "e_cn_ip", "n_cp_in", "e_cp_in"]
    S = {k: np.zeros(bsz, np.float32) for k in names}
    co_ip = cp_ip = cp_cp = co_in = cp_in = cp_cn = 0
    for i in range(bsz):
        if ipno[i] != 0:
            img = ipo[co_ip:co_ip + ipno[i]]
            sent = cps[i, :cpls[i]]
            m = img @ sent.T
            S["n_ip_cp"][i] = m.max(1).sum() / ipno[i]
            S["n_cp_ip"][i] = m.max(0).sum() / cpls[i]
        if not (cpnp[i] == 0 or ipnp[i] == 0):
            m = ipp[cp_ip:cp_ip + ipnp[i]] @ cpr[cp_cp:cp_cp + cpnp[i]].T
            S["e_ip_cp"][i] = m.max(1).sum() / ipnp[i]
            S["e_cp_ip"][i] = m.max(0).sum() / cpnp[i]
        if ipno[i] != 0:
            img = ipo[co_ip:co_ip + ipno[i]]
            sent = cns[i, :cnls[i]]
            m = img @ sent.T
            S["n_ip_cn"][i] = m.max(1).sum() / ipno[i]
            S["n_cn_ip"][i] = m.max(0).sum() / cnls[i]
        if not (cnnp[i] == 0 or ipnp[i] == 0):
            m = ipp[cp_ip:cp_ip + ipnp[i]] @ cnr[cp_cn:cp_cn + cnnp[i]].T
            S["e_ip_cn"][i] = m.max(1).sum() / ipnp[i]
            S["e_cn_ip"][i] = m.max(0).sum() / cnnp[i]
        if inno[i] != 0:
            img = ino[co_in:co_in + inno[i]]
            sent = cps[i, :cpls[i]]
            m = img @ sent.T
            S["n_in_cp"][i] = m.max(1).sum() / inno[i]
            S["n_cp_in"][i] = m.max(0).sum() / cpls[i]
        if not (cpnp[i] == 0 or innp[i] == 0):
            m = inp_[cp_in:cp_in + innp[i]] @ cpr[cp_cp:cp_cp + cpnp[i]].T
            S["e_in_cp"][i] = m.max(1).sum() / innp[i]
            S["e_cp_in"][i] = m.max(0).sum() / cpnp[i]
        co_ip += ipno[i]; cp_ip += ipnp[i]; cp_cp += cpnp[i]
        co_in += inno[i]; cp_in += innp[i]; cp_cn += cnnp[i]
    S_ip_cp = obj_coef * S["n_ip_cp"] + pred_coef * S["e_ip_cp"]
    S_ip_cn = obj_coef * S["n_ip_cn"] + pred_coef * S["e_ip_cn"]
    S_in_cp = obj_coef * S["n_in_cp"] + pred_coef * S["e_in_cp"]
    S_cp_ip = obj_coef * S["n_cp_ip"] + pred_coef * S["e_cp_ip"]
    S_cp_in = obj_coef * S["n_cp_in"] + pred_coef * S["e_cp_in"]
    S_cn_ip = obj_coef * S["n_cn_ip"] + pred_coef * S["e_cn_ip"]
    image_anchor = np.maximum(margin - (S_ip_cp - S_ip_cn), 0.0)
    caption_anchor = np.maximum(margin - (S_ip_cp - S_in_cp), 0.0)
    image_anchor_2 = np.maximum(margin - (S_cp_ip - S_cp_in), 0.0)
    caption_anchor_2 = np.maximum(margin - (S_cp_ip - S_cn_ip), 0.0)
    loss = image_anchor + caption_anchor + image_anchor_2 + caption_anchor_2
    if reduction == 'mean':
        return loss.mean()
    elif reduction == 'sum':
        return loss.sum()
    return loss


if __name__ == "__main__":
    key = jax.random.PRNGKey(0)
    B, D, MAX_SEQ = 2, 32, 8

    ip_numb_obj = np.array([3, 5]); ip_numb_pred = np.array([2, 0])
    cp_len_sent = np.array([6, 4]); cp_numb_pred = np.array([2, 3])
    in_numb_obj = np.array([0, 2]); in_numb_pred = np.array([3, 1])
    cn_len_sent = np.array([5, 7]); cn_numb_pred = np.array([1, 2])

    ks = jax.random.split(key, 8)
    image_pos_obj = jax.random.normal(ks[0], (int(ip_numb_obj.sum()), D), jnp.float32)
    image_pos_pred = jax.random.normal(ks[1], (int(ip_numb_pred.sum()), D), jnp.float32)
    caption_pos_sent = jax.random.normal(ks[2], (B, MAX_SEQ, D), jnp.float32)
    caption_pos_rels = jax.random.normal(ks[3], (int(cp_numb_pred.sum()), D), jnp.float32)
    image_neg_obj = jax.random.normal(ks[4], (int(in_numb_obj.sum()), D), jnp.float32)
    image_neg_pred = jax.random.normal(ks[5], (int(in_numb_pred.sum()), D), jnp.float32)
    caption_neg_sent = jax.random.normal(ks[6], (B, MAX_SEQ, D), jnp.float32)
    caption_neg_rels = jax.random.normal(ks[7], (int(cn_numb_pred.sum()), D), jnp.float32)

    loss = matrix_loss(image_pos_obj, image_pos_pred, ip_numb_obj, ip_numb_pred,
                       caption_pos_sent, caption_pos_rels, cp_len_sent, cp_numb_pred,
                       image_neg_obj, image_neg_pred, in_numb_obj, in_numb_pred,
                       caption_neg_sent, caption_neg_rels, cn_len_sent, cn_numb_pred,
                       margin=1.0, obj_coef=1.0, pred_coef=1.0, reduction='mean')
    loss = jax.block_until_ready(loss)

    ref = _reference(image_pos_obj, image_pos_pred, ip_numb_obj, ip_numb_pred,
                     caption_pos_sent, caption_pos_rels, cp_len_sent, cp_numb_pred,
                     image_neg_obj, image_neg_pred, in_numb_obj, in_numb_pred,
                     caption_neg_sent, caption_neg_rels, cn_len_sent, cn_numb_pred,
                     margin=1.0, obj_coef=1.0, pred_coef=1.0, reduction='mean')

    assert np.isclose(float(loss), float(ref), rtol=1e-3, atol=1e-3), (float(loss), float(ref))
    print("KERNEL_OK")
</pallas_src>

<mosaic_0001>
module attributes {stable_mosaic.version = 11 : i64} {
  func.func @_matrix_loss_kernel(%arg0: i32, %arg1: memref<8x1x8xi32, #tpu.memory_space<vmem>>, %arg2: memref<8x32x32xf32, #tpu.memory_space<vmem>>, %arg3: memref<8x32x32xf32, #tpu.memory_space<vmem>>, %arg4: memref<1x1x8xf32, #tpu.memory_space<vmem>>) attributes {dimension_semantics = [#tpu.dimension_semantics<parallel>], iteration_bounds = array<i64: 1>, scalar_prefetch = 0 : i64, scratch_operands = 0 : i64, tpu.core_type = #tpu.core_type<tc>, window_params = [{transform_indices = @transform_0, window_bounds = array<i64: 8, 1, 8>}, {transform_indices = @transform_1, window_bounds = array<i64: 8, 32, 32>}, {transform_indices = @transform_2, window_bounds = array<i64: 8, 32, 32>}, {transform_indices = @transform_3, window_bounds = array<i64: 1, 1, 8>}]} {
    %c0 = arith.constant 0 : index
    %c0_0 = arith.constant 0 : index
    %c0_1 = arith.constant 0 : index
    %0 = vector.load %arg1[%c0, %c0_0, %c0_1] : memref<8x1x8xi32, #tpu.memory_space<vmem>>, vector<8x1x8xi32>
    %1 = arith.sitofp %0 : vector<8x1x8xi32> to vector<8x1x8xf32>
    %cst = arith.constant 1.000000e+00 : f32
    %2 = vector.broadcast %cst : f32 to vector<8x1x8xf32>
    %3 = arith.maximumf %1, %2 : vector<8x1x8xf32>
    %cst_2 = arith.constant 1.000000e+00 : f32
    %4 = vector.broadcast %cst_2 : f32 to vector<8x1x8xf32>
    %5 = arith.divf %4, %3 : vector<8x1x8xf32>
    %6 = tpu.iota {dimensions = array<i32: 1>} : vector<1x8x1xi32>
    %7 = vector.extract_strided_slice %0 {offsets = [0, 0, 0], sizes = [8, 1, 1], strides = [1, 1, 1]} : vector<8x1x8xi32> to vector<8x1x1xi32>
    %8 = vector.broadcast %6 : vector<1x8x1xi32> to vector<8x8x1xi32>
    %9 = vector.broadcast %7 : vector<8x1x1xi32> to vector<8x8x1xi32>
    %10 = arith.cmpi slt, %8, %9 : vector<8x8x1xi32>
    %11 = tpu.iota {dimensions = array<i32: 1>} : vector<1x8x1xi32>
    %12 = vector.extract_strided_slice %0 {offsets = [0, 0, 1], sizes = [8, 1, 1], strides = [1, 1, 1]} : vector<8x1x8xi32> to vector<8x1x1xi32>
    %13 = vector.broadcast %11 : vector<1x8x1xi32> to vector<8x8x1xi32>
    %14 = vector.broadcast %12 : vector<8x1x1xi32> to vector<8x8x1xi32>
    %15 = arith.cmpi slt, %13, %14 : vector<8x8x1xi32>
    %16 = tpu.iota {dimensions = array<i32: 1>} : vector<1x8x1xi32>
    %17 = vector.extract_strided_slice %0 {offsets = [0, 0, 2], sizes = [8, 1, 1], strides = [1, 1, 1]} : vector<8x1x8xi32> to vector<8x1x1xi32>
    %18 = vector.broadcast %16 : vector<1x8x1xi32> to vector<8x8x1xi32>
    %19 = vector.broadcast %17 : vector<8x1x1xi32> to vector<8x8x1xi32>
    %20 = arith.cmpi slt, %18, %19 : vector<8x8x1xi32>
    %21 = tpu.iota {dimensions = array<i32: 1>} : vector<1x8x1xi32>
    %22 = vector.extract_strided_slice %0 {offsets = [0, 0, 3], sizes = [8, 1, 1], strides = [1, 1, 1]} : vector<8x1x8xi32> to vector<8x1x1xi32>
    %23 = vector.broadcast %21 : vector<1x8x1xi32> to vector<8x8x1xi32>
    %24 = vector.broadcast %22 : vector<8x1x1xi32> to vector<8x8x1xi32>
    %25 = arith.cmpi slt, %23, %24 : vector<8x8x1xi32>
    %26 = tpu.iota {dimensions = array<i32: 2>} : vector<1x1x8xi32>
    %27 = vector.extract_strided_slice %0 {offsets = [0, 0, 4], sizes = [8, 1, 1], strides = [1, 1, 1]} : vector<8x1x8xi32> to vector<8x1x1xi32>
    %28 = vector.broadcast %26 : vector<1x1x8xi32> to vector<8x1x8xi32>
    %29 = vector.broadcast %27 : vector<8x1x1xi32> to vector<8x1x8xi32>
    %30 = arith.cmpi slt, %28, %29 : vector<8x1x8xi32>
    %31 = tpu.iota {dimensions = array<i32: 2>} : vector<1x1x8xi32>
    %32 = vector.extract_strided_slice %0 {offsets = [0, 0, 5], sizes = [8, 1, 1], strides = [1, 1, 1]} : vector<8x1x8xi32> to vector<8x1x1xi32>
    %33 = vector.broadcast %31 : vector<1x1x8xi32> to vector<8x1x8xi32>
    %34 = vector.broadcast %32 : vector<8x1x1xi32> to vector<8x1x8xi32>
    %35 = arith.cmpi slt, %33, %34 : vector<8x1x8xi32>
    %36 = tpu.iota {dimensions = array<i32: 2>} : vector<1x1x8xi32>
    %37 = vector.extract_strided_slice %0 {offsets = [0, 0, 6], sizes = [8, 1, 1], strides = [1, 1, 1]} : vector<8x1x8xi32> to vector<8x1x1xi32>
    %38 = vector.broadcast %36 : vector<1x1x8xi32> to vector<8x1x8xi32>
    %39 = vector.broadcast %37 : vector<8x1x1xi32> to vector<8x1x8xi32>
    %40 = arith.cmpi slt, %38, %39 : vector<8x1x8xi32>
    %41 = tpu.iota {dimensions = array<i32: 2>} : vector<1x1x8xi32>
    %42 = vector.extract_strided_slice %0 {offsets = [0, 0, 7], sizes = [8, 1, 1], strides = [1, 1, 1]} : vector<8x1x8xi32> to vector<8x1x1xi32>
    %43 = vector.broadcast %41 : vector<1x1x8xi32> to vector<8x1x8xi32>
    %44 = vector.broadcast %42 : vector<8x1x1xi32> to vector<8x1x8xi32>
    %45 = arith.cmpi slt, %43, %44 : vector<8x1x8xi32>
    %c0_3 = arith.constant 0 : index
    %c0_4 = arith.constant 0 : index
    %c0_5 = arith.constant 0 : index
    %46 = vector.load %arg2[%c0_3, %c0_4, %c0_5] : memref<8x32x32xf32, #tpu.memory_space<vmem>>, vector<8x16x32xf32>
    %c0_6 = arith.constant 0 : index
    %c16 = arith.constant 16 : index
    %c0_7 = arith.constant 0 : index
    %47 = vector.load %arg2[%c0_6, %c16, %c0_7] : memref<8x32x32xf32, #tpu.memory_space<vmem>>, vector<8x16x32xf32>
    %48 = vector.extract_strided_slice %46 {offsets = [0, 0, 0], sizes = [8, 8, 32], strides = [1, 1, 1]} : vector<8x16x32xf32> to vector<8x8x32xf32>
    %49 = vector.extract_strided_slice %47 {offsets = [0, 0, 0], sizes = [8, 8, 32], strides = [1, 1, 1]} : vector<8x16x32xf32> to vector<8x8x32xf32>
    %c0_8 = arith.constant 0 : index
    %c0_9 = arith.constant 0 : index
    %c0_10 = arith.constant 0 : index
    %50 = vector.load %arg3[%c0_8, %c0_9, %c0_10] : memref<8x32x32xf32, #tpu.memory_space<vmem>>, vector<8x8x32xf32>
    %c0_11 = arith.constant 0 : index
    %c8 = arith.constant 8 : index
    %c0_12 = arith.constant 0 : index
    %51 = vector.load %arg3[%c0_11, %c8, %c0_12] : memref<8x32x32xf32, #tpu.memory_space<vmem>>, vector<8x8x32xf32>
    %c0_13 = arith.constant 0 : index
    %c16_14 = arith.constant 16 : index
    %c0_15 = arith.constant 0 : index
    %52 = vector.load %arg3[%c0_13, %c16_14, %c0_15] : memref<8x32x32xf32, #tpu.memory_space<vmem>>, vector<8x8x32xf32>
    %c0_16 = arith.constant 0 : index
    %c24 = arith.constant 24 : index
    %c0_17 = arith.constant 0 : index
    %53 = vector.load %arg3[%c0_16, %c24, %c0_17] : memref<8x32x32xf32, #tpu.memory_space<vmem>>, vector<8x8x32xf32>
    "tpu.trace_start"() <{level = 10 : i32, message = "cmd,cnd->cmn"}> : () -> ()
    %cst_18 = arith.constant dense<0.000000e+00> : vector<8x16x8xf32>
    %54 = tpu.matmul %46, %50, %cst_18 {dimension_numbers = #tpu.dot_dimension_numbers<[2], [2], [1], [1], [0, 0, 0, 1, 1, 1], [0], [0]>} : vector<8x16x32xf32>, vector<8x8x32xf32>, vector<8x16x8xf32> -> vector<8x16x8xf32>
    %cst_19 = arith.constant dense<0.000000e+00> : vector<8x8x8xf32>
    %55 = tpu.matmul %48, %51, %cst_19 {dimension_numbers = #tpu.dot_dimension_numbers<[2], [2], [1], [1], [0, 0, 0, 1, 1, 1], [0], [0]>} : vector<8x8x32xf32>, vector<8x8x32xf32>, vector<8x8x8xf32> -> vector<8x8x8xf32>
    %cst_20 = arith.constant dense<0.000000e+00> : vector<8x16x8xf32>
    %56 = tpu.matmul %47, %52, %cst_20 {dimension_numbers = #tpu.dot_dimension_numbers<[2], [2], [1], [1], [0, 0, 0, 1, 1, 1], [0], [0]>} : vector<8x16x32xf32>, vector<8x8x32xf32>, vector<8x16x8xf32> -> vector<8x16x8xf32>
    %cst_21 = arith.constant dense<0.000000e+00> : vector<8x8x8xf32>
    %57 = tpu.matmul %49, %53, %cst_21 {dimension_numbers = #tpu.dot_dimension_numbers<[2], [2], [1], [1], [0, 0, 0, 1, 1, 1], [0], [0]>} : vector<8x8x32xf32>, vector<8x8x32xf32>, vector<8x8x8xf32> -> vector<8x8x8xf32>
    "tpu.trace_stop"() : () -> ()
    %58 = vector.extract_strided_slice %54 {offsets = [0, 0, 0], sizes = [8, 8, 8], strides = [1, 1, 1]} : vector<8x16x8xf32> to vector<8x8x8xf32>
    %59 = vector.extract_strided_slice %5 {offsets = [0, 0, 0], sizes = [8, 1, 1], strides = [1, 1, 1]} : vector<8x1x8xf32> to vector<8x1x1xf32>
    %60 = vector.extract_strided_slice %5 {offsets = [0, 0, 4], sizes = [8, 1, 1], strides = [1, 1, 1]} : vector<8x1x8xf32> to vector<8x1x1xf32>
    %61 = vector.extract_strided_slice %0 {offsets = [0, 0, 0], sizes = [8, 1, 1], strides = [1, 1, 1]} : vector<8x1x8xi32> to vector<8x1x1xi32>
    %62 = vector.extract_strided_slice %0 {offsets = [0, 0, 4], sizes = [8, 1, 1], strides = [1, 1, 1]} : vector<8x1x8xi32> to vector<8x1x1xi32>
    %cst_22 = arith.constant -1.000000e+30 : f32
    %63 = vector.shape_cast %30 : vector<8x1x8xi1> to vector<8x1x8xi1>
    %64 = vector.broadcast %63 : vector<8x1x8xi1> to vector<8x8x8xi1>
    %65 = vector.broadcast %cst_22 : f32 to vector<8x8x8xf32>
    %66 = arith.select %64, %58, %65 : vector<8x8x8xi1>, vector<8x8x8xf32>
    %cst_23 = arith.constant dense<0xFF800000> : vector<8x8xf32>
    %67 = vector.multi_reduction <maximumf>, %66, %cst_23 [2] : vector<8x8x8xf32> to vector<8x8xf32>
    %68 = vector.shape_cast %67 : vector<8x8xf32> to vector<8x8x1xf32>
    %cst_24 = arith.constant dense<0.000000e+00> : vector<8x1xf32>
    %69 = vector.multi_reduction <add>, %68, %cst_24 [1] : vector<8x8x1xf32> to vector<8x1xf32>
    %70 = vector.shape_cast %69 : vector<8x1xf32> to vector<8x1x1xf32>
    %cst_25 = arith.constant -1.000000e+30 : f32
    %71 = vector.shape_cast %10 : vector<8x8x1xi1> to vector<8x8x1xi1>
    %72 = vector.broadcast %71 : vector<8x8x1xi1> to vector<8x8x8xi1>
    %73 = vector.broadcast %cst_25 : f32 to vector<8x8x8xf32>
    %74 = arith.select %72, %58, %73 : vector<8x8x8xi1>, vector<8x8x8xf32>
    %cst_26 = arith.constant dense<0xFF800000> : vector<8x8xf32>
    %75 = vector.multi_reduction <maximumf>, %74, %cst_26 [1] : vector<8x8x8xf32> to vector<8x8xf32>
    %76 = vector.shape_cast %75 : vector<8x8xf32> to vector<8x1x8xf32>
    %cst_27 = arith.constant dense<0.000000e+00> : vector<8x1xf32>
    %77 = vector.multi_reduction <add>, %76, %cst_27 [2] : vector<8x1x8xf32> to vector<8x1xf32>
    %78 = vector.shape_cast %77 : vector<8x1xf32> to vector<8x1x1xf32>
    %c0_i32 = arith.constant 0 : i32
    %79 = vector.broadcast %c0_i32 : i32 to vector<8x1x1xi32>
    %80 = arith.cmpi sgt, %61, %79 : vector<8x1x1xi32>
    %c0_i32_28 = arith.constant 0 : i32
    %81 = vector.broadcast %c0_i32_28 : i32 to vector<8x1x1xi32>
    %82 = arith.cmpi sgt, %62, %81 : vector<8x1x1xi32>
    %83 = arith.andi %80, %82 : vector<8x1x1xi1>
    %84 = arith.mulf %70, %59 : vector<8x1x1xf32>
    %cst_29 = arith.constant 0.000000e+00 : f32
    %85 = vector.broadcast %cst_29 : f32 to vector<8x1x1xf32>
    %86 = arith.select %83, %84, %85 : vector<8x1x1xi1>, vector<8x1x1xf32>
    %87 = arith.mulf %78, %60 : vector<8x1x1xf32>
    %cst_30 = arith.constant 0.000000e+00 : f32
    %88 = vector.broadcast %cst_30 : f32 to vector<8x1x1xf32>
    %89 = arith.select %83, %87, %88 : vector<8x1x1xi1>, vector<8x1x1xf32>
    %90 = vector.extract_strided_slice %54 {offsets = [0, 8, 0], sizes = [8, 8, 8], strides = [1, 1, 1]} : vector<8x16x8xf32> to vector<8x8x8xf32>
    %91 = vector.extract_strided_slice %5 {offsets = [0, 0, 1], sizes = [8, 1, 1], strides = [1, 1, 1]} : vector<8x1x8xf32> to vector<8x1x1xf32>
    %92 = vector.extract_strided_slice %5 {offsets = [0, 0, 4], sizes = [8, 1, 1], strides = [1, 1, 1]} : vector<8x1x8xf32> to vector<8x1x1xf32>
    %93 = vector.extract_strided_slice %0 {offsets = [0, 0, 1], sizes = [8, 1, 1], strides = [1, 1, 1]} : vector<8x1x8xi32> to vector<8x1x1xi32>
    %94 = vector.extract_strided_slice %0 {offsets = [0, 0, 4], sizes = [8, 1, 1], strides = [1, 1, 1]} : vector<8x1x8xi32> to vector<8x1x1xi32>
    %cst_31 = arith.constant -1.000000e+30 : f32
    %95 = vector.shape_cast %30 : vector<8x1x8xi1> to vector<8x1x8xi1>
    %96 = vector.broadcast %95 : vector<8x1x8xi1> to vector<8x8x8xi1>
    %97 = vector.broadcast %cst_31 : f32 to vector<8x8x8xf32>
    %98 = arith.select %96, %90, %97 : vector<8x8x8xi1>, vector<8x8x8xf32>
    %cst_32 = arith.constant dense<0xFF800000> : vector<8x8xf32>
    %99 = vector.multi_reduction <maximumf>, %98, %cst_32 [2] : vector<8x8x8xf32> to vector<8x8xf32>
    %100 = vector.shape_cast %99 : vector<8x8xf32> to vector<8x8x1xf32>
    %cst_33 = arith.constant dense<0.000000e+00> : vector<8x1xf32>
    %101 = vector.multi_reduction <add>, %100, %cst_33 [1] : vector<8x8x1xf32> to vector<8x1xf32>
    %102 = vector.shape_cast %101 : vector<8x1xf32> to vector<8x1x1xf32>
    %cst_34 = arith.constant -1.000000e+30 : f32
    %103 = vector.shape_cast %15 : vector<8x8x1xi1> to vector<8x8x1xi1>
    %104 = vector.broadcast %103 : vector<8x8x1xi1> to vector<8x8x8xi1>
    %105 = vector.broadcast %cst_34 : f32 to vector<8x8x8xf32>
    %106 = arith.select %104, %90, %105 : vector<8x8x8xi1>, vector<8x8x8xf32>
    %cst_35 = arith.constant dense<0xFF800000> : vector<8x8xf32>
    %107 = vector.multi_reduction <maximumf>, %106, %cst_35 [1] : vector<8x8x8xf32> to vector<8x8xf32>
    %108 = vector.shape_cast %107 : vector<8x8xf32> to vector<8x1x8xf32>
    %cst_36 = arith.constant dense<0.000000e+00> : vector<8x1xf32>
    %109 = vector.multi_reduction <add>, %108, %cst_36 [2] : vector<8x1x8xf32> to vector<8x1xf32>
    %110 = vector.shape_cast %109 : vector<8x1xf32> to vector<8x1x1xf32>
    %c0_i32_37 = arith.constant 0 : i32
    %111 = vector.broadcast %c0_i32_37 : i32 to vector<8x1x1xi32>
    %112 = arith.cmpi sgt, %93, %111 : vector<8x1x1xi32>
    %c0_i32_38 = arith.constant 0 : i32
    %113 = vector.broadcast %c0_i32_38 : i32 to vector<8x1x1xi32>
    %114 = arith.cmpi sgt, %94, %113 : vector<8x1x1xi32>
    %115 = arith.andi %112, %114 : vector<8x1x1xi1>
    %116 = arith.mulf %102, %91 : vector<8x1x1xf32>
    %cst_39 = arith.constant 0.000000e+00 : f32
    %117 = vector.broadcast %cst_39 : f32 to vector<8x1x1xf32>
    %118 = arith.select %115, %116, %117 : vector<8x1x1xi1>, vector<8x1x1xf32>
    %119 = arith.mulf %110, %92 : vector<8x1x1xf32>
    %cst_40 = arith.constant 0.000000e+00 : f32
    %120 = vector.broadcast %cst_40 : f32 to vector<8x1x1xf32>
    %121 = arith.select %115, %119, %120 : vector<8x1x1xi1>, vector<8x1x1xf32>
    %122 = vector.extract_strided_slice %5 {offsets = [0, 0, 0], sizes = [8, 1, 1], strides = [1, 1, 1]} : vector<8x1x8xf32> to vector<8x1x1xf32>
    %123 = vector.extract_strided_slice %5 {offsets = [0, 0, 5], sizes = [8, 1, 1], strides = [1, 1, 1]} : vector<8x1x8xf32> to vector<8x1x1xf32>
    %124 = vector.extract_strided_slice %0 {offsets = [0, 0, 0], sizes = [8, 1, 1], strides = [1, 1, 1]} : vector<8x1x8xi32> to vector<8x1x1xi32>
    %125 = vector.extract_strided_slice %0 {offsets = [0, 0, 5], sizes = [8, 1, 1], strides = [1, 1, 1]} : vector<8x1x8xi32> to vector<8x1x1xi32>
    %cst_41 = arith.constant -1.000000e+30 : f32
    %126 = vector.shape_cast %35 : vector<8x1x8xi1> to vector<8x1x8xi1>
    %127 = vector.broadcast %126 : vector<8x1x8xi1> to vector<8x8x8xi1>
    %128 = vector.broadcast %cst_41 : f32 to vector<8x8x8xf32>
    %129 = arith.select %127, %55, %128 : vector<8x8x8xi1>, vector<8x8x8xf32>
    %cst_42 = arith.constant dense<0xFF800000> : vector<8x8xf32>
    %130 = vector.multi_reduction <maximumf>, %129, %cst_42 [2] : vector<8x8x8xf32> to vector<8x8xf32>
    %131 = vector.shape_cast %130 : vector<8x8xf32> to vector<8x8x1xf32>
    %cst_43 = arith.constant dense<0.000000e+00> : vector<8x1xf32>
    %132 = vector.multi_reduction <add>, %131, %cst_43 [1] : vector<8x8x1xf32> to vector<8x1xf32>
    %133 = vector.shape_cast %132 : vector<8x1xf32> to vector<8x1x1xf32>
    %cst_44 = arith.constant -1.000000e+30 : f32
    %134 = vector.shape_cast %10 : vector<8x8x1xi1> to vector<8x8x1xi1>
    %135 = vector.broadcast %134 : vector<8x8x1xi1> to vector<8x8x8xi1>
    %136 = vector.broadcast %cst_44 : f32 to vector<8x8x8xf32>
    %137 = arith.select %135, %55, %136 : vector<8x8x8xi1>, vector<8x8x8xf32>
    %cst_45 = arith.constant dense<0xFF800000> : vector<8x8xf32>
    %138 = vector.multi_reduction <maximumf>, %137, %cst_45 [1] : vector<8x8x8xf32> to vector<8x8xf32>
    %139 = vector.shape_cast %138 : vector<8x8xf32> to vector<8x1x8xf32>
    %cst_46 = arith.constant dense<0.000000e+00> : vector<8x1xf32>
    %140 = vector.multi_reduction <add>, %139, %cst_46 [2] : vector<8x1x8xf32> to vector<8x1xf32>
    %141 = vector.shape_cast %140 : vector<8x1xf32> to vector<8x1x1xf32>
    %c0_i32_47 = arith.constant 0 : i32
    %142 = vector.broadcast %c0_i32_47 : i32 to vector<8x1x1xi32>
    %143 = arith.cmpi sgt, %124, %142 : vector<8x1x1xi32>
    %c0_i32_48 = arith.constant 0 : i32
    %144 = vector.broadcast %c0_i32_48 : i32 to vector<8x1x1xi32>
    %145 = arith.cmpi sgt, %125, %144 : vector<8x1x1xi32>
    %146 = arith.andi %143, %145 : vector<8x1x1xi1>
    %147 = arith.mulf %133, %122 : vector<8x1x1xf32>
    %cst_49 = arith.constant 0.000000e+00 : f32
    %148 = vector.broadcast %cst_49 : f32 to vector<8x1x1xf32>
    %149 = arith.select %146, %147, %148 : vector<8x1x1xi1>, vector<8x1x1xf32>
    %150 = arith.mulf %141, %123 : vector<8x1x1xf32>
    %cst_50 = arith.constant 0.000000e+00 : f32
    %151 = vector.broadcast %cst_50 : f32 to vector<8x1x1xf32>
    %152 = arith.select %146, %150, %151 : vector<8x1x1xi1>, vector<8x1x1xf32>
    %153 = vector.extract_strided_slice %56 {offsets = [0, 0, 0], sizes = [8, 8, 8], strides = [1, 1, 1]} : vector<8x16x8xf32> to vector<8x8x8xf32>
    %154 = vector.extract_strided_slice %5 {offsets = [0, 0, 2], sizes = [8, 1, 1], strides = [1, 1, 1]} : vector<8x1x8xf32> to vector<8x1x1xf32>
    %155 = vector.extract_strided_slice %5 {offsets = [0, 0, 6], sizes = [8, 1, 1], strides = [1, 1, 1]} : vector<8x1x8xf32> to vector<8x1x1xf32>
    %156 = vector.extract_strided_slice %0 {offsets = [0, 0, 2], sizes = [8, 1, 1], strides = [1, 1, 1]} : vector<8x1x8xi32> to vector<8x1x1xi32>
    %157 = vector.extract_strided_slice %0 {offsets = [0, 0, 6], sizes = [8, 1, 1], strides = [1, 1, 1]} : vector<8x1x8xi32> to vector<8x1x1xi32>
    %cst_51 = arith.constant -1.000000e+30 : f32
    %158 = vector.shape_cast %40 : vector<8x1x8xi1> to vector<8x1x8xi1>
    %159 = vector.broadcast %158 : vector<8x1x8xi1> to vector<8x8x8xi1>
    %160 = vector.broadcast %cst_51 : f32 to vector<8x8x8xf32>
    %161 = arith.select %159, %153, %160 : vector<8x8x8xi1>, vector<8x8x8xf32>
    %cst_52 = arith.constant dense<0xFF800000> : vector<8x8xf32>
    %162 = vector.multi_reduction <maximumf>, %161, %cst_52 [2] : vector<8x8x8xf32> to vector<8x8xf32>
    %163 = vector.shape_cast %162 : vector<8x8xf32> to vector<8x8x1xf32>
    %cst_53 = arith.constant dense<0.000000e+00> : vector<8x1xf32>
    %164 = vector.multi_reduction <add>, %163, %cst_53 [1] : vector<8x8x1xf32> to vector<8x1xf32>
    %165 = vector.shape_cast %164 : vector<8x1xf32> to vector<8x1x1xf32>
    %cst_54 = arith.constant -1.000000e+30 : f32
    %166 = vector.shape_cast %20 : vector<8x8x1xi1> to vector<8x8x1xi1>
    %167 = vector.broadcast %166 : vector<8x8x1xi1> to vector<8x8x8xi1>
    %168 = vector.broadcast %cst_54 : f32 to vector<8x8x8xf32>
    %169 = arith.select %167, %153, %168 : vector<8x8x8xi1>, vector<8x8x8xf32>
    %cst_55 = arith.constant dense<0xFF800000> : vector<8x8xf32>
    %170 = vector.multi_reduction <maximumf>, %169, %cst_55 [1] : vector<8x8x8xf32> to vector<8x8xf32>
    %171 = vector.shape_cast %170 : vector<8x8xf32> to vector<8x1x8xf32>
    %cst_56 = arith.constant dense<0.000000e+00> : vector<8x1xf32>
    %172 = vector.multi_reduction <add>, %171, %cst_56 [2] : vector<8x1x8xf32> to vector<8x1xf32>
    %173 = vector.shape_cast %172 : vector<8x1xf32> to vector<8x1x1xf32>
    %c0_i32_57 = arith.constant 0 : i32
    %174 = vector.broadcast %c0_i32_57 : i32 to vector<8x1x1xi32>
    %175 = arith.cmpi sgt, %156, %174 : vector<8x1x1xi32>
    %c0_i32_58 = arith.constant 0 : i32
    %176 = vector.broadcast %c0_i32_58 : i32 to vector<8x1x1xi32>
    %177 = arith.cmpi sgt, %157, %176 : vector<8x1x1xi32>
    %178 = arith.andi %175, %177 : vector<8x1x1xi1>
    %179 = arith.mulf %165, %154 : vector<8x1x1xf32>
    %cst_59 = arith.constant 0.000000e+00 : f32
    %180 = vector.broadcast %cst_59 : f32 to vector<8x1x1xf32>
    %181 = arith.select %178, %179, %180 : vector<8x1x1xi1>, vector<8x1x1xf32>
    %182 = arith.mulf %173, %155 : vector<8x1x1xf32>
    %cst_60 = arith.constant 0.000000e+00 : f32
    %183 = vector.broadcast %cst_60 : f32 to vector<8x1x1xf32>
    %184 = arith.select %178, %182, %183 : vector<8x1x1xi1>, vector<8x1x1xf32>
    %185 = vector.extract_strided_slice %56 {offsets = [0, 8, 0], sizes = [8, 8, 8], strides = [1, 1, 1]} : vector<8x16x8xf32> to vector<8x8x8xf32>
    %186 = vector.extract_strided_slice %5 {offsets = [0, 0, 3], sizes = [8, 1, 1], strides = [1, 1, 1]} : vector<8x1x8xf32> to vector<8x1x1xf32>
    %187 = vector.extract_strided_slice %5 {offsets = [0, 0, 6], sizes = [8, 1, 1], strides = [1, 1, 1]} : vector<8x1x8xf32> to vector<8x1x1xf32>
    %188 = vector.extract_strided_slice %0 {offsets = [0, 0, 3], sizes = [8, 1, 1], strides = [1, 1, 1]} : vector<8x1x8xi32> to vector<8x1x1xi32>
    %189 = vector.extract_strided_slice %0 {offsets = [0, 0, 6], sizes = [8, 1, 1], strides = [1, 1, 1]} : vector<8x1x8xi32> to vector<8x1x1xi32>
    %cst_61 = arith.constant -1.000000e+30 : f32
    %190 = vector.shape_cast %40 : vector<8x1x8xi1> to vector<8x1x8xi1>
    %191 = vector.broadcast %190 : vector<8x1x8xi1> to vector<8x8x8xi1>
    %192 = vector.broadcast %cst_61 : f32 to vector<8x8x8xf32>
    %193 = arith.select %191, %185, %192 : vector<8x8x8xi1>, vector<8x8x8xf32>
    %cst_62 = arith.constant dense<0xFF800000> : vector<8x8xf32>
    %194 = vector.multi_reduction <maximumf>, %193, %cst_62 [2] : vector<8x8x8xf32> to vector<8x8xf32>
    %195 = vector.shape_cast %194 : vector<8x8xf32> to vector<8x8x1xf32>
    %cst_63 = arith.constant dense<0.000000e+00> : vector<8x1xf32>
    %196 = vector.multi_reduction <add>, %195, %cst_63 [1] : vector<8x8x1xf32> to vector<8x1xf32>
    %197 = vector.shape_cast %196 : vector<8x1xf32> to vector<8x1x1xf32>
    %cst_64 = arith.constant -1.000000e+30 : f32
    %198 = vector.shape_cast %25 : vector<8x8x1xi1> to vector<8x8x1xi1>
    %199 = vector.broadcast %198 : vector<8x8x1xi1> to vector<8x8x8xi1>
    %200 = vector.broadcast %cst_64 : f32 to vector<8x8x8xf32>
    %201 = arith.select %199, %185, %200 : vector<8x8x8xi1>, vector<8x8x8xf32>
    %cst_65 = arith.constant dense<0xFF800000> : vector<8x8xf32>
    %202 = vector.multi_reduction <maximumf>, %201, %cst_65 [1] : vector<8x8x8xf32> to vector<8x8xf32>
    %203 = vector.shape_cast %202 : vector<8x8xf32> to vector<8x1x8xf32>
    %cst_66 = arith.constant dense<0.000000e+00> : vector<8x1xf32>
    %204 = vector.multi_reduction <add>, %203, %cst_66 [2] : vector<8x1x8xf32> to vector<8x1xf32>
    %205 = vector.shape_cast %204 : vector<8x1xf32> to vector<8x1x1xf32>
    %c0_i32_67 = arith.constant 0 : i32
    %206 = vector.broadcast %c0_i32_67 : i32 to vector<8x1x1xi32>
    %207 = arith.cmpi sgt, %188, %206 : vector<8x1x1xi32>
    %c0_i32_68 = arith.constant 0 : i32
    %208 = vector.broadcast %c0_i32_68 : i32 to vector<8x1x1xi32>
    %209 = arith.cmpi sgt, %189, %208 : vector<8x1x1xi32>
    %210 = arith.andi %207, %209 : vector<8x1x1xi1>
    %211 = arith.mulf %197, %186 : vector<8x1x1xf32>
    %cst_69 = arith.constant 0.000000e+00 : f32
    %212 = vector.broadcast %cst_69 : f32 to vector<8x1x1xf32>
    %213 = arith.select %210, %211, %212 : vector<8x1x1xi1>, vector<8x1x1xf32>
    %214 = arith.mulf %205, %187 : vector<8x1x1xf32>
    %cst_70 = arith.constant 0.000000e+00 : f32
    %215 = vector.broadcast %cst_70 : f32 to vector<8x1x1xf32>
    %216 = arith.select %210, %214, %215 : vector<8x1x1xi1>, vector<8x1x1xf32>
    %217 = vector.extract_strided_slice %5 {offsets = [0, 0, 2], sizes = [8, 1, 1], strides = [1, 1, 1]} : vector<8x1x8xf32> to vector<8x1x1xf32>
    %218 = vector.extract_strided_slice %5 {offsets = [0, 0, 7], sizes = [8, 1, 1], strides = [1, 1, 1]} : vector<8x1x8xf32> to vector<8x1x1xf32>
    %219 = vector.extract_strided_slice %0 {offsets = [0, 0, 2], sizes = [8, 1, 1], strides = [1, 1, 1]} : vector<8x1x8xi32> to vector<8x1x1xi32>
    %220 = vector.extract_strided_slice %0 {offsets = [0, 0, 7], sizes = [8, 1, 1], strides = [1, 1, 1]} : vector<8x1x8xi32> to vector<8x1x1xi32>
    %cst_71 = arith.constant -1.000000e+30 : f32
    %221 = vector.shape_cast %45 : vector<8x1x8xi1> to vector<8x1x8xi1>
    %222 = vector.broadcast %221 : vector<8x1x8xi1> to vector<8x8x8xi1>
    %223 = vector.broadcast %cst_71 : f32 to vector<8x8x8xf32>
    %224 = arith.select %222, %57, %223 : vector<8x8x8xi1>, vector<8x8x8xf32>
    %cst_72 = arith.constant dense<0xFF800000> : vector<8x8xf32>
    %225 = vector.multi_reduction <maximumf>, %224, %cst_72 [2] : vector<8x8x8xf32> to vector<8x8xf32>
    %226 = vector.shape_cast %225 : vector<8x8xf32> to vector<8x8x1xf32>
    %cst_73 = arith.constant dense<0.000000e+00> : vector<8x1xf32>
    %227 = vector.multi_reduction <add>, %226, %cst_73 [1] : vector<8x8x1xf32> to vector<8x1xf32>
    %228 = vector.shape_cast %227 : vector<8x1xf32> to vector<8x1x1xf32>
    %cst_74 = arith.constant -1.000000e+30 : f32
    %229 = vector.shape_cast %20 : vector<8x8x1xi1> to vector<8x8x1xi1>
    %230 = vector.broadcast %229 : vector<8x8x1xi1> to vector<8x8x8xi1>
    %231 = vector.broadcast %cst_74 : f32 to vector<8x8x8xf32>
    %232 = arith.select %230, %57, %231 : vector<8x8x8xi1>, vector<8x8x8xf32>
    %cst_75 = arith.constant dense<0xFF800000> : vector<8x8xf32>
    %233 = vector.multi_reduction <maximumf>, %232, %cst_75 [1] : vector<8x8x8xf32> to vector<8x8xf32>
    %234 = vector.shape_cast %233 : vector<8x8xf32> to vector<8x1x8xf32>
    %cst_76 = arith.constant dense<0.000000e+00> : vector<8x1xf32>
    %235 = vector.multi_reduction <add>, %234, %cst_76 [2] : vector<8x1x8xf32> to vector<8x1xf32>
    %236 = vector.shape_cast %235 : vector<8x1xf32> to vector<8x1x1xf32>
    %c0_i32_77 = arith.constant 0 : i32
    %237 = vector.broadcast %c0_i32_77 : i32 to vector<8x1x1xi32>
    %238 = arith.cmpi sgt, %219, %237 : vector<8x1x1xi32>
    %c0_i32_78 = arith.constant 0 : i32
    %239 = vector.broadcast %c0_i32_78 : i32 to vector<8x1x1xi32>
    %240 = arith.cmpi sgt, %220, %239 : vector<8x1x1xi32>
    %241 = arith.andi %238, %240 : vector<8x1x1xi1>
    %242 = arith.mulf %228, %217 : vector<8x1x1xf32>
    %cst_79 = arith.constant 0.000000e+00 : f32
    %243 = vector.broadcast %cst_79 : f32 to vector<8x1x1xf32>
    %244 = arith.select %241, %242, %243 : vector<8x1x1xi1>, vector<8x1x1xf32>
    %245 = arith.mulf %236, %218 : vector<8x1x1xf32>
    %cst_80 = arith.constant 0.000000e+00 : f32
    %246 = vector.broadcast %cst_80 : f32 to vector<8x1x1xf32>
    %247 = arith.select %241, %245, %246 : vector<8x1x1xi1>, vector<8x1x1xf32>
    %cst_81 = arith.constant 1.000000e+00 : f32
    %248 = vector.broadcast %cst_81 : f32 to vector<8x1x1xf32>
    %249 = arith.mulf %248, %86 : vector<8x1x1xf32>
    %cst_82 = arith.constant 1.000000e+00 : f32
    %250 = vector.broadcast %cst_82 : f32 to vector<8x1x1xf32>
    %251 = arith.mulf %250, %181 : vector<8x1x1xf32>
    %252 = arith.addf %249, %251 : vector<8x1x1xf32>
    %cst_83 = arith.constant 1.000000e+00 : f32
    %253 = vector.broadcast %cst_83 : f32 to vector<8x1x1xf32>
    %254 = arith.mulf %253, %149 : vector<8x1x1xf32>
    %cst_84 = arith.constant 1.000000e+00 : f32
    %255 = vector.broadcast %cst_84 : f32 to vector<8x1x1xf32>
    %256 = arith.mulf %255, %244 : vector<8x1x1xf32>
    %257 = arith.addf %254, %256 : vector<8x1x1xf32>
    %cst_85 = arith.constant 1.000000e+00 : f32
    %258 = vector.broadcast %cst_85 : f32 to vector<8x1x1xf32>
    %259 = arith.mulf %258, %118 : vector<8x1x1xf32>
    %cst_86 = arith.constant 1.000000e+00 : f32
    %260 = vector.broadcast %cst_86 : f32 to vector<8x1x1xf32>
    %261 = arith.mulf %260, %213 : vector<8x1x1xf32>
    %262 = arith.addf %259, %261 : vector<8x1x1xf32>
    %cst_87 = arith.constant 1.000000e+00 : f32
    %263 = vector.broadcast %cst_87 : f32 to vector<8x1x1xf32>
    %264 = arith.mulf %263, %89 : vector<8x1x1xf32>
    %cst_88 = arith.constant 1.000000e+00 : f32
    %265 = vector.broadcast %cst_88 : f32 to vector<8x1x1xf32>
    %266 = arith.mulf %265, %184 : vector<8x1x1xf32>
    %267 = arith.addf %264, %266 : vector<8x1x1xf32>
    %cst_89 = arith.constant 1.000000e+00 : f32
    %268 = vector.broadcast %cst_89 : f32 to vector<8x1x1xf32>
    %269 = arith.mulf %268, %121 : vector<8x1x1xf32>
    %cst_90 = arith.constant 1.000000e+00 : f32
    %270 = vector.broadcast %cst_90 : f32 to vector<8x1x1xf32>
    %271 = arith.mulf %270, %216 : vector<8x1x1xf32>
    %272 = arith.addf %269, %271 : vector<8x1x1xf32>
    %cst_91 = arith.constant 1.000000e+00 : f32
    %273 = vector.broadcast %cst_91 : f32 to vector<8x1x1xf32>
    %274 = arith.mulf %273, %152 : vector<8x1x1xf32>
    %cst_92 = arith.constant 1.000000e+00 : f32
    %275 = vector.broadcast %cst_92 : f32 to vector<8x1x1xf32>
    %276 = arith.mulf %275, %247 : vector<8x1x1xf32>
    %277 = arith.addf %274, %276 : vector<8x1x1xf32>
    %278 = arith.subf %252, %257 : vector<8x1x1xf32>
    %cst_93 = arith.constant 1.000000e+00 : f32
    %279 = vector.broadcast %cst_93 : f32 to vector<8x1x1xf32>
    %280 = arith.subf %279, %278 : vector<8x1x1xf32>
    %cst_94 = arith.constant 0.000000e+00 : f32
    %281 = vector.broadcast %cst_94 : f32 to vector<8x1x1xf32>
    %282 = arith.maximumf %280, %281 : vector<8x1x1xf32>
    %283 = arith.subf %252, %262 : vector<8x1x1xf32>
    %cst_95 = arith.constant 1.000000e+00 : f32
    %284 = vector.broadcast %cst_95 : f32 to vector<8x1x1xf32>
    %285 = arith.subf %284, %283 : vector<8x1x1xf32>
    %cst_96 = arith.constant 0.000000e+00 : f32
    %286 = vector.broadcast %cst_96 : f32 to vector<8x1x1xf32>
    %287 = arith.maximumf %285, %286 : vector<8x1x1xf32>
    %288 = arith.subf %267, %272 : vector<8x1x1xf32>
    %cst_97 = arith.constant 1.000000e+00 : f32
    %289 = vector.broadcast %cst_97 : f32 to vector<8x1x1xf32>
    %290 = arith.subf %289, %288 : vector<8x1x1xf32>
    %cst_98 = arith.constant 0.000000e+00 : f32
    %291 = vector.broadcast %cst_98 : f32 to vector<8x1x1xf32>
    %292 = arith.maximumf %290, %291 : vector<8x1x1xf32>
    %293 = arith.subf %267, %277 : vector<8x1x1xf32>
    %cst_99 = arith.constant 1.000000e+00 : f32
    %294 = vector.broadcast %cst_99 : f32 to vector<8x1x1xf32>
    %295 = arith.subf %294, %293 : vector<8x1x1xf32>
    %cst_100 = arith.constant 0.000000e+00 : f32
    %296 = vector.broadcast %cst_100 : f32 to vector<8x1x1xf32>
    %297 = arith.maximumf %295, %296 : vector<8x1x1xf32>
    %298 = arith.addf %282, %287 : vector<8x1x1xf32>
    %299 = arith.addf %298, %292 : vector<8x1x1xf32>
    %300 = arith.addf %299, %297 : vector<8x1x1xf32>
    %301 = vector.shape_cast %300 : vector<8x1x1xf32> to vector<8x1xf32>
    %302 = tpu.iota {dimensions = array<i32: 0>} : vector<8x8xi32>
    %303 = tpu.iota {dimensions = array<i32: 1>} : vector<8x8xi32>
    %304 = arith.cmpi eq, %302, %303 : vector<8x8xi32>
    %305 = vector.shape_cast %301 : vector<8x1xf32> to vector<8x1xf32>
    %306 = vector.broadcast %305 : vector<8x1xf32> to vector<8x8xf32>
    %cst_101 = arith.constant 0.000000e+00 : f32
    %307 = vector.broadcast %cst_101 : f32 to vector<8x8xf32>
    %308 = arith.select %304, %306, %307 : vector<8x8xi1>, vector<8x8xf32>
    %cst_102 = arith.constant dense<0.000000e+00> : vector<8xf32>
    %309 = vector.multi_reduction <add>, %308, %cst_102 [0] : vector<8x8xf32> to vector<8xf32>
    %310 = vector.shape_cast %309 : vector<8xf32> to vector<1x8xf32>
    %c0_103 = arith.constant 0 : index
    %c0_104 = arith.constant 0 : index
    %c0_105 = arith.constant 0 : index
    %311 = vector.load %arg4[%c0_103, %c0_104, %c0_105] : memref<1x1x8xf32, #tpu.memory_space<vmem>>, vector<1x1x8xf32>
    %312 = vector.shape_cast %311 : vector<1x1x8xf32> to vector<1x8xf32>
    %313 = vector.shape_cast %310 : vector<1x8xf32> to vector<1x1x8xf32>
    tpu.vector_store %arg4[%c0_103, %c0_104, %c0_105], %313 {strides = array<i32>} : memref<1x1x8xf32, #tpu.memory_space<vmem>>, vector<1x1x8xf32>,
    return
  }
  func.func @transform_0(%arg0: i32) -> (i32, i32, i32) {
    %c0_i32 = arith.constant 0 : i32
    %c0_i32_0 = arith.constant 0 : i32
    %c0_i32_1 = arith.constant 0 : i32
    return %arg0, %c0_i32, %c0_i32_0 : i32, i32, i32
  }
  func.func @transform_1(%arg0: i32) -> (i32, i32, i32) {
    %c0_i32 = arith.constant 0 : i32
    %c0_i32_0 = arith.constant 0 : i32
    %c0_i32_1 = arith.constant 0 : i32
    return %arg0, %c0_i32, %c0_i32_0 : i32, i32, i32
  }
  func.func @transform_2(%arg0: i32) -> (i32, i32, i32) {
    %c0_i32 = arith.constant 0 : i32
    %c0_i32_0 = arith.constant 0 : i32
    %c0_i32_1 = arith.constant 0 : i32
    return %arg0, %c0_i32, %c0_i32_0 : i32, i32, i32
  }
  func.func @transform_3(%arg0: i32) -> (i32, i32, i32) {
    %c0_i32 = arith.constant 0 : i32
    %c0_i32_0 = arith.constant 0 : i32
    %c0_i32_1 = arith.constant 0 : i32
    return %arg0, %c0_i32, %c0_i32_0 : i32, i32, i32
  }
}

</mosaic_0001>

<bundles_post_ra>
// kernel: tpu_custom_call.1
= control target key start
LH: loop header
LB: loop body
LE: loop exit
PB: predicated region body
PF: predicated region fallthrough
CT: control target
= control target key end

     0   :  { %8 = vsyncpa [#allocation3], 0  ;;  %s8202_s0 = inlined_call_operand.hbm [shape: s32[8,1,8], index: 0, kind: input, shape index: {}]   ;;  %s8203_s1 = inlined_call_operand.hbm [shape: f32[8,32,32], index: 1, kind: input, shape index: {}]   ;;  %s8204_s2 = inlined_call_operand.hbm [shape: f32[8,32,32], index: 2, kind: input, shape index: {}]   ;;  %s8205_s3 = inlined_call_operand.hbm [shape: f32[1,1,8], index: 3, kind: output, shape index: {}]  }
   0x1   :  { %9 = vsyncpa [#allocation6], 0 }
   0x2   :  { %10 = vsyncpa [#allocation4], 0  ;;  %s5740_s12 = smov [#allocation5]   ;;  %s5646_s16 = scalar_lea.hbm %s8203_s1, 4096 }
   0x3   :  { %s28_s13 = sshll.u32 %s5740_s12, 4  ;;  %p5647_p0 = scmp.ne.s32.totalorder %s8203_s1, %s5646_s16  ;;  %s29_s13 = int_to_ptr.vmem [resolvable:$true] %s28_s13 }
   0x4   :  { %p5650_p1 = scmp.lt.u32.totalorder %s5646_s16, %s8203_s1 }
   0x6   :  { %p5652_p2 = pnand %p5650_p1, %p5647_p0 }
   0x8   :  { %5655 = shalt.err (!%p5652_p2)
}
   0x9   :  { %s5656_s21 = scalar_lea.vmem %s29_s13, 4096  ;;  %p5661_p4 = scmp.lt.s32.totalorder %s29_s13, %s29_s13 }
   0xa   :  { %p5657_p3 = scmp.ne.s32.totalorder %s29_s13, %s5656_s21  ;;  %p5662_p5 = scmp.lt.s32.totalorder %s5656_s21, %s5656_s21 }
   0xc   :  { %p5663_p6 = por %p5662_p5, %p5661_p4 }
   0xe   :  { %p5664_p7 = pnand %p5663_p6, %p5657_p3 }
  0x10   :  { %5667 = shalt.err (!%p5664_p7)
}
  0x11   :  { %s5741_s22 = smov 128   ;;  %s5742_s23 = smov 8  }
  0x12   :  { %34 = dma.hbm_to_vmem [thread:$0]  %s8203_s1, 4096, %s29_s13, [#allocation6], %s5741_s22, %s5741_s22, %s5742_s23  }
  0x13   :  { %s5743_s26 = smov [#allocation2]   ;;  %s5668_s30 = scalar_lea.hbm %s8202_s0, 128 }
  0x14   :  { %s16_s27 = sshll.u32 %s5743_s26, 4  ;;  %p5669_p8 = scmp.ne.s32.totalorder %s8202_s0, %s5668_s30  ;;  %s17_s27 = int_to_ptr.vmem [resolvable:$true] %s16_s27 }
  0x15   :  { %p5672_p9 = scmp.lt.u32.totalorder %s5668_s30, %s8202_s0 }
  0x17   :  { %p5674_p10 = pnand %p5672_p9, %p5669_p8 }
  0x19   :  { %5677 = shalt.err (!%p5674_p10)
}
  0x1a   :  { %s5678_s8 = scalar_lea.vmem %s17_s27, 128  ;;  %p5683_p12 = scmp.lt.s32.totalorder %s17_s27, %s17_s27 }
  0x1b   :  { %p5679_p11 = scmp.ne.s32.totalorder %s17_s27, %s5678_s8  ;;  %p5684_p13 = scmp.lt.s32.totalorder %s5678_s8, %s5678_s8 }
  0x1d   :  { %p5685_p0 = por %p5684_p13, %p5683_p12 }
  0x1f   :  { %p5686_p1 = pnand %p5685_p0, %p5679_p11 }
  0x21   :  { %5689 = shalt.err (!%p5686_p1)
}
  0x22   :  { %s5744_s1 = smov 16   ;;  %s5745_s9 = smov 1  }
  0x23   :  { %22 = dma.hbm_to_vmem [thread:$0]  %s8202_s0, 128, %s17_s27, [#allocation3], %s5744_s1, %s5744_s1, %s5745_s9  }
  0x24   :  { %s5746_s12 = smov [#allocation7]   ;;  %s5690_s16 = scalar_lea.hbm %s8204_s2, 4096 }
  0x25   :  { %s40_s13 = sshll.u32 %s5746_s12, 4  ;;  %p5691_p2 = scmp.ne.s32.totalorder %s8204_s2, %s5690_s16  ;;  %s41_s13 = int_to_ptr.vmem [resolvable:$true] %s40_s13 }
  0x26   :  { %p5694_p3 = scmp.lt.u32.totalorder %s5690_s16, %s8204_s2 }
  0x28   :  { %p5696_p4 = pnand %p5694_p3, %p5691_p2 }
  0x2a   :  { %5699 = shalt.err (!%p5696_p4)
}
  0x2b   :  { %s5700_s21 = scalar_lea.vmem %s41_s13, 4096  ;;  %p5705_p6 = scmp.lt.s32.totalorder %s41_s13, %s41_s13 }
  0x2c   :  { %p5701_p5 = scmp.ne.s32.totalorder %s41_s13, %s5700_s21  ;;  %p5706_p7 = scmp.lt.s32.totalorder %s5700_s21, %s5700_s21 }
  0x2e   :  { %p5707_p8 = por %p5706_p7, %p5705_p6 }
  0x30   :  { %p5708_p9 = pnand %p5707_p8, %p5701_p5 }
  0x32   :  { %5711 = shalt.err (!%p5708_p9)
}
  0x33   :  { %46 = dma.hbm_to_vmem [thread:$0]  %s8204_s2, 4096, %s41_s13, [#allocation6], %s5741_s22, %s5741_s22, %s5742_s23  }
  0x34   :  { %5734 = dma.done.wait [#allocation3], 128  }
  0x35   :  { %5735 = vsyncadd [#allocation3], 4294967168 }
  0x36   :  { %5736 = dma.done.wait [#allocation6], 8192  }
  0x37   :  { %5737 = vsyncadd [#allocation6], 4294959104  ;;  %v5747_v0 = vmov 4   ;;  %vm460_vm0 = vcmask 261120   ;;  %v428_v1 = vld [vmem:[#allocation7] sm:$0xff]  ;;  %v397_v6 = vld [vmem:[#allocation5 + $0x8] sm:$0xff] }
  0x38   :  { %5604 = vset.pattern.permute.xlu1 %v5747_v0  ;;  %5603 = vset.pattern.permute.xlu0 %v5747_v0  ;;  %v429_v2 = vld [vmem:[#allocation7 + $0x20] sm:$0xff]  ;;  %v5826_v3 = vld [vmem:[#allocation2 + $0x2] sm:$0x1]  ;;  %v399_v9 = vld [vmem:[#allocation5 + $0x28] sm:$0xff]  ;;  %v5748_v30 = vmov 0.0   ;;  %v5749_v34 = vmov 5  }
  0x39   :  { %8406 = vst [vmem:[#allocation12_spill] sm:$0xff] %v5826_v3  ;;  %5419 = vmatprep.subr.msk.mxu0 %vm460_vm0, %v428_v1  ;;  %5424 = vmatprep.subr.msk.mxu1 %vm460_vm0, %v429_v2  ;;  %v5830_v4 = vld [vmem:[#allocation5] sm:$0xff]  ;;  %v5839_v10 = vld [vmem:[#allocation2 + $0x3] sm:$0x1]  ;;  %v401_v15 = vld [vmem:[#allocation5 + $0x48] sm:$0xff]  ;;  %vm5750_vm1 = vmmov 0  }
  0x3a   :  { %v5832_v5 = vld [vmem:[#allocation5 + $0x20] sm:$0xff]  ;;  %155 = vperm.xlu1 %5604, %v5826_v3   ;;  %5420 = vmatpush3.xpose.msk.msra.mxu0 %vm460_vm0, %v428_v1  ;;  %8407 = vst [vmem:[#allocation13_spill] sm:$0xff] %v5839_v10  ;;  %v403_v16 = vld [vmem:[#allocation5 + $0x68] sm:$0xff]  ;;  %v5858_v17 = vld [vmem:[#allocation2 + $0x5] sm:$0x1]  ;;  %v5751_v48 = vmov 6  }
  0x3b   :  { %v430_v7 = vld [vmem:[#allocation7 + $0x40] sm:$0xff]  ;;  %5425 = vmatpush3.xpose.msk.msra.mxu1 %vm460_vm0, %v429_v2  ;;  %5421 = vmatprep.mubr.msk.f32.mxu0 %vm460_vm0, %v5830_v4  ;;  %8408 = vst [vmem:[#allocation14_spill] sm:$0xff] %v5858_v17  ;;  %v405_v21 = vld [vmem:[#allocation5 + $0x88] sm:$0xff]  ;;  %v5873_v24 = vld [vmem:[#allocation2 + $0x7] sm:$0x1]  ;;  %vm8228_vm9 = vcmp.gt.s32.totalorder %v5839_v10, 0 }
  0x3c   :  { %v431_v8 = vld [vmem:[#allocation7 + $0x60] sm:$0xff]  ;;  %5426 = vmatprep.mubr.msk.f32.mxu1 %vm460_vm0, %v5832_v5  ;;  %5429 = vmatprep.subr.msk.mxu0 %vm460_vm0, %v430_v7  ;;  %v407_v23 = vld [vmem:[#allocation5 + $0xa8] sm:$0xff]  ;;  %8409 = vst [vmem:[#allocation15_spill] sm:$0xff] %v5873_v24  ;;  %v5892_v29 = vld [vmem:[#allocation2] sm:$0x1]  ;;  %s5754_s2 = smov 124  }
  0x3d   :  { %5422 = vmatmul.mubr.msk.f32.vlgmr.msra.gmra.mrb[0].mxu0 %vm460_vm0, %v397_v6  ;;  %5434 = vmatprep.subr.msk.mxu1 %vm460_vm0, %v431_v8  ;;  %v5846_v11 = vld [vmem:[#allocation5 + $0x40] sm:$0xff]  ;;  %v409_v27 = vld [vmem:[#allocation5 + $0xc8] sm:$0xff]  ;;  %8410 = vst [vmem:[#allocation16_spill] sm:$0xff] %v5892_v29  ;;  %v5898_v33 = vld [vmem:[#allocation2 + $0x1] sm:$0x1]  ;;  %vm8236_vm7 = vcmp.gt.s32.totalorder %v5892_v29, 0 }
  0x3e   :  { %v5848_v12 = vld [vmem:[#allocation5 + $0x60] sm:$0xff]  ;;  %5427 = vmatmul.mubr.msk.f32.vlgmr.msra.gmra.mrb[0].mxu1 %vm460_vm0, %v399_v9  ;;  %162 = vperm.xlu1 %5604, %v5839_v10   ;;  %v411_v28 = vld [vmem:[#allocation5 + $0xe8] sm:$0xff]  ;;  %8411 = vst [vmem:[#allocation17_spill] sm:$0xff] %v5898_v33  ;;  %v5920_v37 = vld [vmem:[#allocation2 + $0x4] sm:$0x1]  ;;  %v96_v9 = vlaneseq  ;;  %vm8227_vm11 = vcmp.gt.s32.totalorder %v5858_v17, 0 }
  0x3f   :  { %v432_v13 = vld [vmem:[#allocation7 + $0x80] sm:$0xff]  ;;  %5430 = vmatpush3.xpose.msk.msra.mxu0 %vm460_vm0, %v430_v7  ;;  %5435 = vmatpush3.xpose.msk.msra.mxu1 %vm460_vm0, %v431_v8  ;;  %v436_v31 = vld [vmem:[#allocation7 + $0x8] sm:$0xff]  ;;  %8412 = vst [vmem:[#allocation18_spill] sm:$0xff] %v5920_v37  ;;  %v5936_v40 = vld [vmem:[#allocation2 + $0x6] sm:$0x1]  ;;  %vm8226_vm13 = vcmp.gt.s32.totalorder %v5873_v24, 0 }
  0x40   :  { %v433_v14 = vld [vmem:[#allocation7 + $0xa0] sm:$0xff]  ;;  %5431 = vmatprep.mubr.msk.f32.mxu0 %vm460_vm0, %v5846_v11  ;;  %5436 = vmatprep.mubr.msk.f32.mxu1 %vm460_vm0, %v5848_v12  ;;  %v437_v32 = vld [vmem:[#allocation7 + $0x28] sm:$0xff]  ;;  %8413 = vst [vmem:[#allocation19_spill] sm:$0xff] %v5936_v40  ;;  %v444_v43 = vld [vmem:[#allocation7 + $0x10] sm:$0xff]  ;;  %vm8247_vm14 = vcmp.gt.s32.totalorder %v5898_v33, 0  ;;  %vm8229_vm15 = vcmp.gt.s32.totalorder %v5826_v3, 0 }
  0x41   :  { %5439 = vmatprep.subr.msk.mxu0 %vm460_vm0, %v432_v13  ;;  %5444 = vmatprep.subr.msk.mxu1 %vm460_vm0, %v433_v14  ;;  %v5862_v18 = vld [vmem:[#allocation5 + $0x80] sm:$0xff]  ;;  %v438_v35 = vld [vmem:[#allocation7 + $0x48] sm:$0xff]  ;;  %v445_v44 = vld [vmem:[#allocation7 + $0x30] sm:$0xff]  ;;  %s5756_s22 = smov 125   ;;  %s5757_s23 = smov 123  }
  0x42   :  { %5432 = vmatmul.mubr.msk.f32.vlgmr.msra.gmra.mrb[2].mxu0 %vm460_vm0, %v401_v15  ;;  %5437 = vmatmul.mubr.msk.f32.vlgmr.msra.gmra.mrb[2].mxu1 %vm460_vm0, %v403_v16  ;;  %v5866_v19 = vld [vmem:[#allocation5 + $0xa0] sm:$0xff]  ;;  %v439_v36 = vld [vmem:[#allocation7 + $0x68] sm:$0xff]  ;;  %v5960_v45 = vld [vmem:[#allocation5 + $0x10] sm:$0xff]  ;;  %s5760_s25 = smov 126   ;;  %s5761_s26 = smov 127  }
  0x43   :  { %v434_v20 = vld [vmem:[#allocation7 + $0xc0] sm:$0xff]  ;;  %176 = vperm.xlu1 %5604, %v5858_v17   ;;  %5440 = vmatpush3.xpose.msk.msra.mxu0 %vm460_vm0, %v432_v13  ;;  %v440_v38 = vld [vmem:[#allocation7 + $0x88] sm:$0xff]  ;;  %v5964_v46 = vld [vmem:[#allocation5 + $0x30] sm:$0xff]  ;;  %s5763_s27 = smov [#allocation8]  }
  0x44   :  { %v435_v22 = vld [vmem:[#allocation7 + $0xe0] sm:$0xff]  ;;  %5445 = vmatpush3.xpose.msk.msra.mxu1 %vm460_vm0, %v433_v14  ;;  %5441 = vmatprep.mubr.msk.f32.mxu0 %vm460_vm0, %v5862_v18  ;;  %v441_v39 = vld [vmem:[#allocation7 + $0xa8] sm:$0xff]  ;;  %v413_v47 = vld [vmem:[#allocation5 + $0x18] sm:$0xff]  ;;  %v6054_v14 = vshrl.u32 %v96_v9, 7  ;;  %s5249_s28 = sshll.u32 %s5763_s27, 4  ;;  %s5250_s28 = int_to_ptr.vmem [resolvable:$true] %s5249_s28 }
  0x45   :  { %5446 = vmatprep.mubr.msk.f32.mxu1 %vm460_vm0, %v5866_v19  ;;  %5449 = vmatprep.subr.msk.mxu0 %vm460_vm0, %v434_v20  ;;  %v5880_v25 = vld [vmem:[#allocation5 + $0xc0] sm:$0xff]  ;;  %v442_v41 = vld [vmem:[#allocation7 + $0xc8] sm:$0xff]  ;;  %v415_v49 = vld [vmem:[#allocation5 + $0x38] sm:$0xff]  ;;  %s5712_s29 = scalar_lea.vmem %s5250_s28, 16  ;;  %s5716_s30 = scalar_lea.vmem %s5250_s28, 32 }
  0x46   :  { %5442 = vmatmul.mubr.msk.f32.vlgmr.msra.gmra.mrb[4].mxu0 %vm460_vm0, %v405_v21  ;;  %5454 = vmatprep.subr.msk.mxu1 %vm460_vm0, %v435_v22  ;;  %v5882_v26 = vld [vmem:[#allocation5 + $0xe0] sm:$0xff]  ;;  %v443_v42 = vld [vmem:[#allocation7 + $0xe8] sm:$0xff]  ;;  %v446_v50 = vld [vmem:[#allocation7 + $0x50] sm:$0xff]  ;;  %8414 = vst [vmem:[#allocation20_spill] sm:$0xff] %v6054_v14  ;;  %v8206_v21 = vmov 0   ;;  %p5713_p10 = scmp.ne.s32.totalorder %s5250_s28, %s5712_s29  ;;  %p5717_p11 = scmp.lt.s32.totalorder %s5250_s28, %s5250_s28 }
  0x47   :  { %5447 = vmatmul.mubr.msk.f32.vlgmr.msra.gmra.mrb[4].mxu1 %vm460_vm0, %v407_v23  ;;  %190 = vperm.xlu1 %5604, %v5873_v24   ;;  %v447_v51 = vld [vmem:[#allocation7 + $0x70] sm:$0xff]  ;;  %v417_v54 = vld [vmem:[#allocation5 + $0x58] sm:$0xff]  ;;  %p5718_p12 = scmp.lt.s32.totalorder %s5716_s30, %s5712_s29 }
  0x48   :  { %5450 = vmatpush3.xpose.msk.msra.mxu0 %vm460_vm0, %v434_v20  ;;  %5455 = vmatpush3.xpose.msk.msra.mxu1 %vm460_vm0, %v435_v22  ;;  %v5976_v52 = vld [vmem:[#allocation5 + $0x50] sm:$0xff]  ;;  %v419_v55 = vld [vmem:[#allocation5 + $0x78] sm:$0xff] }
  0x49   :  { %5451 = vmatprep.mubr.msk.f32.mxu0 %vm460_vm0, %v5880_v25  ;;  %5456 = vmatprep.mubr.msk.f32.mxu1 %vm460_vm0, %v5882_v26  ;;  %v5980_v53 = vld [vmem:[#allocation5 + $0x70] sm:$0xff]  ;;  %v421_v60 = vld [vmem:[#allocation5 + $0x98] sm:$0xff]  ;;  %p5719_p13 = por %p5718_p12, %p5717_p11 }
  0x4a   :  { %5459 = vmatprep.subr.mxu0 %v5748_v30  ;;  %5464 = vmatprep.subr.mxu1 %v5748_v30  ;;  %v448_v56 = vld [vmem:[#allocation7 + $0x90] sm:$0xff]  ;;  %v423_v61 = vld [vmem:[#allocation5 + $0xb8] sm:$0xff] }
  0x4b   :  { %5452 = vmatmul.mubr.msk.f32.vlgmr.msra.gmra.mrb[6].mxu0 %vm460_vm0, %v409_v27  ;;  %5457 = vmatmul.mubr.msk.f32.vlgmr.msra.gmra.mrb[6].mxu1 %vm460_vm0, %v411_v28  ;;  %v449_v57 = vld [vmem:[#allocation7 + $0xb0] sm:$0xff]  ;;  %v425_v2 = vld [vmem:[#allocation5 + $0xd8] sm:$0xff]  ;;  %p5720_p0 = pnand %p5719_p13, %p5713_p10 }
  0x4c   :  { %5606 = vset.pattern.permute.xlu1 %v5749_v34  ;;  %141 = vperm.xlu0 %5603, %v5892_v29   ;;  %v5992_v58 = vld [vmem:[#allocation5 + $0x90] sm:$0xff]  ;;  %v453_v6 = vld [vmem:[#allocation7 + $0x38] sm:$0xff] }
  0x4d   :  { %5460 = vmatpush3.xpose.msk.msra.mxu0 %vm460_vm0, %v436_v31  ;;  %5465 = vmatpush3.xpose.msk.msra.mxu1 %vm460_vm0, %v437_v32  ;;  %v5996_v59 = vld [vmem:[#allocation5 + $0xb0] sm:$0xff]  ;;  %v454_v7 = vld [vmem:[#allocation7 + $0x58] sm:$0xff] }
  0x4e   :  { %212 = vperm.xlu1 %5606, %v5898_v33   ;;  %5461 = vmatprep.mubr.msk.f32.mxu0 %vm5750_vm1, %v5748_v30  ;;  %v450_v62 = vld [vmem:[#allocation7 + $0xd0] sm:$0xff]  ;;  %v455_v8 = vld [vmem:[#allocation7 + $0x78] sm:$0xff] }
  0x4f   :  { %5466 = vmatprep.mubr.msk.f32.mxu1 %vm5750_vm1, %v5748_v30  ;;  %5469 = vmatprep.subr.mxu0 %v5748_v30  ;;  %v451_v63 = vld [vmem:[#allocation7 + $0xf0] sm:$0xff]  ;;  %v457_v13 = vld [vmem:[#allocation7 + $0xb8] sm:$0xff] }
  0x50   :  { %5462 = vmatmul.mubr.msk.f32.vlgmr.msra.gmra.mrb[8].mxu0 %vm460_vm0, %v5830_v4  ;;  %5467 = vmatmul.mubr.msk.f32.vlgmr.msra.gmra.mrb[8].mxu1 %vm460_vm0, %v5832_v5  ;;  %v6008_v0 = vld [vmem:[#allocation5 + $0xd0] sm:$0xff]  ;;  %v427_v4 = vld [vmem:[#allocation5 + $0xf8] sm:$0xff] }
  0x51   :  { %5474 = vmatprep.subr.mxu1 %v5748_v30  ;;  %148 = vperm.xlu0 %5603, %v5898_v33   ;;  %v6012_v1 = vld [vmem:[#allocation5 + $0xf0] sm:$0xff]  ;;  %v452_v5 = vld [vmem:[#allocation7 + $0x18] sm:$0xff] }
  0x52   :  { %5470 = vmatpush3.xpose.msk.msra.mxu0 %vm460_vm0, %v438_v35  ;;  %5475 = vmatpush3.xpose.msk.msra.mxu1 %vm460_vm0, %v439_v36  ;;  %v458_v15 = vld [vmem:[#allocation7 + $0xd8] sm:$0xff] }
  0x53   :  { %219 = vperm.xlu1 %5606, %v5826_v3   ;;  %5471 = vmatprep.mubr.msk.f32.mxu0 %vm5750_vm1, %v5748_v30  ;;  %v459_v16 = vld [vmem:[#allocation7 + $0xf8] sm:$0xff] }
  0x54   :  { %5476 = vmatprep.mubr.msk.f32.mxu1 %vm5750_vm1, %v5748_v30  ;;  %5479 = vmatprep.subr.mxu0 %v5748_v30 }
  0x55   :  { %5472 = vmatmul.mubr.msk.f32.vlgmr.msra.gmra.mrb[10].mxu0 %vm460_vm0, %v5846_v11  ;;  %5477 = vmatmul.mubr.msk.f32.vlgmr.msra.gmra.mrb[10].mxu1 %vm460_vm0, %v5848_v12  ;;  %v5752_v11 = vmov 7   ;;  %v456_v12 = vld [vmem:[#allocation7 + $0x98] sm:$0xff] }
  0x56   :  { %5484 = vmatprep.subr.mxu1 %v5748_v30  ;;  %169 = vperm.xlu0 %5603, %v5920_v37  }
  0x57   :  { %5480 = vmatpush3.xpose.msk.msra.mxu0 %vm460_vm0, %v440_v38  ;;  %5485 = vmatpush3.xpose.msk.msra.mxu1 %vm460_vm0, %v441_v39  ;;  %v6147_v38 = vsel %vm8228_vm9, 1, %v8206_v21 }
  0x58   :  { %233 = vperm.xlu1 %5606, %v5920_v37   ;;  %5481 = vmatprep.mubr.msk.f32.mxu0 %vm5750_vm1, %v5748_v30  ;;  %8423 = vst [vmem:[#allocation29_spill] sm:$0xff] %v6147_v38 }
  0x59   :  { %5486 = vmatprep.mubr.msk.f32.mxu1 %vm5750_vm1, %v5748_v30  ;;  %5489 = vmatprep.subr.mxu0 %v5748_v30 }
  0x5a   :  { %5482 = vmatmul.mubr.msk.f32.vlgmr.msra.gmra.mrb[12].mxu0 %vm460_vm0, %v5862_v18  ;;  %5487 = vmatmul.mubr.msk.f32.vlgmr.msra.gmra.mrb[12].mxu1 %vm460_vm0, %v5866_v19  ;;  %v6068_v18 = vsub.s32 0, %v6054_v14 }
  0x5b   :  { %5494 = vmatprep.subr.mxu1 %v5748_v30  ;;  %183 = vperm.xlu0 %5603, %v5936_v40  }
  0x5c   :  { %5490 = vmatpush3.xpose.msk.msra.mxu0 %vm460_vm0, %v442_v41  ;;  %5495 = vmatpush3.xpose.msk.msra.mxu1 %vm460_vm0, %v443_v42  ;;  %8415 = vst [vmem:[#allocation21_spill] sm:$0xff] %v6068_v18  ;;  %v105_v19 = vrot.slane %v5898_v33, %v6068_v18  ;;  %v109_v20 = vrot.slane %v5826_v3, %v6068_v18  ;;  %v6162_v42 = vsel %vm8227_vm11, 1, %v8206_v21 }
  0x5d   :  { %247 = vperm.xlu1 %5606, %v5936_v40   ;;  %5491 = vmatprep.mubr.msk.f32.mxu0 %vm5750_vm1, %v5748_v30  ;;  %v113_v23 = vrot.slane %v5839_v10, %v6068_v18  ;;  %v117_v27 = vrot.slane %v5920_v37, %v6068_v18  ;;  %v121_v31 = vrot.slane %v5858_v17, %v6068_v18 }
  0x5e   :  { %5496 = vmatprep.mubr.msk.f32.mxu1 %vm5750_vm1, %v5748_v30  ;;  %5499 = vmatprep.subr.msk.mxu0 %vm460_vm0, %v444_v43  ;;  %vm131_vm2 = vcmp.lt.s32.totalorder %v6054_v14, %v105_v19  ;;  %vm132_vm3 = vcmp.lt.s32.totalorder %v6054_v14, %v109_v20  ;;  %v125_v35 = vrot.slane %v5936_v40, %v6068_v18 }
  0x5f   :  { %5492 = vmatmul.mubr.msk.f32.vlgmr.msra.gmra.mrb[14].mxu0 %vm460_vm0, %v5880_v25  ;;  %5497 = vmatmul.mubr.msk.f32.vlgmr.msra.gmra.mrb[14].mxu1 %vm460_vm0, %v5882_v26  ;;  %v6094_v22 = vsel %vm131_vm2, 1, %v8206_v21  ;;  %v101_v25 = vrot.slane %v5892_v29, %v6068_v18  ;;  %v6105_v26 = vsel %vm132_vm3, 1, %v8206_v21  ;;  %vm133_vm4 = vcmp.lt.s32.totalorder %v6054_v14, %v113_v23  ;;  %8425 = vst [vmem:[#allocation31_spill] sm:$0xff] %v6162_v42 }
  0x60   :  { %5504 = vmatprep.subr.msk.mxu1 %vm460_vm0, %v445_v44  ;;  %5605 = vset.pattern.permute.xlu0 %v5749_v34  ;;  %8416 = vst [vmem:[#allocation22_spill] sm:$0xff] %v6094_v22  ;;  %8417 = vst [vmem:[#allocation23_spill] sm:$0xff] %v6105_v26  ;;  %v6114_v28 = vsel %vm133_vm4, 1, %v8206_v21  ;;  %vm134_vm6 = vcmp.lt.s32.totalorder %v6054_v14, %v117_v27  ;;  %v6132_v34 = vsel %vm8236_vm7, 1, %v8206_v21  ;;  %vm8346_vm2 = vcmask 64512  }
  0x61   :  { %5500 = vmatpush3.xpose.msk.msra.mxu0 %vm460_vm0, %v444_v43  ;;  %5505 = vmatpush3.xpose.msk.msra.mxu1 %vm460_vm0, %v445_v44  ;;  %vm130_vm5 = vcmp.lt.s32.totalorder %v6054_v14, %v101_v25  ;;  %8418 = vst [vmem:[#allocation24_spill] sm:$0xff] %v6114_v28  ;;  %v6127_v32 = vsel %vm134_vm6, 1, %v8206_v21  ;;  %8421 = vst [vmem:[#allocation27_spill] sm:$0xff] %v6132_v34  ;;  %vm135_vm8 = vcmp.lt.s32.totalorder %v6054_v14, %v121_v31 }
  0x62   :  { %5607 = vset.pattern.permute.xlu1 %v5751_v48  ;;  %205 = vperm.xlu0 %5605, %v5892_v29   ;;  %8420 = vst [vmem:[#allocation26_spill] sm:$0xff] %v6127_v32  ;;  %v6142_v36 = vsel %vm135_vm8, 1, %v8206_v21  ;;  %vm136_vm10 = vcmp.lt.s32.totalorder %v6054_v14, %v125_v35  ;;  %v129_v39 = vrot.slane %v5873_v24, %v6068_v18  ;;  %v6175_v44 = vsel %vm8226_vm13, 1, %v8206_v21 }
  0x63   :  { %269 = vperm.xlu1 %5607, %v5892_v29   ;;  %5501 = vmatprep.mubr.msk.f32.mxu0 %vm460_vm0, %v5960_v45  ;;  %8422 = vst [vmem:[#allocation28_spill] sm:$0xff] %v6142_v36  ;;  %v6157_v41 = vsel %vm136_vm10, 1, %v8206_v21  ;;  %8427 = vst [vmem:[#allocation33_spill] sm:$0xff] %v6175_v44  ;;  %v6271_v31 = vand.u32 127, %v96_v9 }
  0x64   :  { %5506 = vmatprep.mubr.msk.f32.mxu1 %vm460_vm0, %v5964_v46  ;;  %5502 = vmatmul.mubr.msk.f32.vlgmr.msra.gmra.mrb[16].mxu0 %vm460_vm0, %v413_v47  ;;  %8424 = vst [vmem:[#allocation30_spill] sm:$0xff] %v6157_v41  ;;  %vm137_vm12 = vcmp.lt.s32.totalorder %v6054_v14, %v129_v39 }
  0x65   :  { %5507 = vmatmul.mubr.msk.f32.vlgmr.msra.gmra.mrb[16].mxu1 %vm460_vm0, %v415_v49  ;;  %5509 = vmatprep.subr.msk.mxu0 %vm460_vm0, %v446_v50  ;;  %v6170_v43 = vsel %vm137_vm12, 1, %v8206_v21  ;;  %8446 = vst [vmem:[#allocation52_spill] sm:$0xff] %v6271_v31 }
  0x66   :  { %5514 = vmatprep.subr.msk.mxu1 %vm460_vm0, %v447_v51  ;;  %5510 = vmatpush3.xpose.msk.msra.mxu0 %vm460_vm0, %v446_v50  ;;  %8426 = vst [vmem:[#allocation32_spill] sm:$0xff] %v6170_v43 }
  0x67   :  { %5515 = vmatpush3.xpose.msk.msra.mxu1 %vm460_vm0, %v447_v51  ;;  %226 = vperm.xlu0 %5605, %v5839_v10  }
  0x68   :  { %283 = vperm.xlu1 %5607, %v5826_v3   ;;  %5511 = vmatprep.mubr.msk.f32.mxu0 %vm460_vm0, %v5976_v52 }
  0x69   :  { %5516 = vmatprep.mubr.msk.f32.mxu1 %vm460_vm0, %v5980_v53  ;;  %5512 = vmatmul.mubr.msk.f32.vlgmr.msra.gmra.mrb[18].mxu0 %vm460_vm0, %v417_v54 }
  0x6a   :  { %5517 = vmatmul.mubr.msk.f32.vlgmr.msra.gmra.mrb[18].mxu1 %vm460_vm0, %v419_v55  ;;  %5519 = vmatprep.subr.msk.mxu0 %vm460_vm0, %v448_v56 }
  0x6b   :  { %5524 = vmatprep.subr.msk.mxu1 %vm460_vm0, %v449_v57  ;;  %5520 = vmatpush3.xpose.msk.msra.mxu0 %vm460_vm0, %v448_v56 }
  0x6c   :  { %5525 = vmatpush3.xpose.msk.msra.mxu1 %vm460_vm0, %v449_v57  ;;  %240 = vperm.xlu0 %5605, %v5858_v17  }
  0x6d   :  { %290 = vperm.xlu1 %5607, %v5839_v10   ;;  %5521 = vmatprep.mubr.msk.f32.mxu0 %vm460_vm0, %v5992_v58 }
  0x6e   :  { %5526 = vmatprep.mubr.msk.f32.mxu1 %vm460_vm0, %v5996_v59  ;;  %5522 = vmatmul.mubr.msk.f32.vlgmr.msra.gmra.mrb[20].mxu0 %vm460_vm0, %v421_v60 }
  0x6f   :  { %5527 = vmatmul.mubr.msk.f32.vlgmr.msra.gmra.mrb[20].mxu1 %vm460_vm0, %v423_v61  ;;  %5529 = vmatprep.subr.msk.mxu0 %vm460_vm0, %v450_v62  ;;  %v5755_v61 = vmov 1  }
  0x70   :  { %5534 = vmatprep.subr.msk.mxu1 %vm460_vm0, %v451_v63  ;;  %5530 = vmatpush3.xpose.msk.msra.mxu0 %vm460_vm0, %v450_v62 }
  0x71   :  { %5535 = vmatpush3.xpose.msk.msra.mxu1 %vm460_vm0, %v451_v63  ;;  %254 = vperm.xlu0 %5605, %v5873_v24  }
  0x72   :  { %304 = vperm.xlu1 %5607, %v5858_v17   ;;  %5531 = vmatprep.mubr.msk.f32.mxu0 %vm460_vm0, %v6008_v0 }
  0x73   :  { %5536 = vmatprep.mubr.msk.f32.mxu1 %vm460_vm0, %v6012_v1  ;;  %5532 = vmatmul.mubr.msk.f32.vlgmr.msra.gmra.mrb[22].mxu0 %vm460_vm0, %v425_v2 }
  0x74   :  { %5537 = vmatmul.mubr.msk.f32.vlgmr.msra.gmra.mrb[22].mxu1 %vm460_vm0, %v427_v4  ;;  %5539 = vmatprep.subr.mxu0 %v5748_v30 }
  0x75   :  { %5544 = vmatprep.subr.mxu1 %v5748_v30  ;;  %5540 = vmatpush3.xpose.msk.msra.mxu0 %vm460_vm0, %v452_v5 }
  0x76   :  { %5545 = vmatpush3.xpose.msk.msra.mxu1 %vm460_vm0, %v453_v6  ;;  %5608 = vset.pattern.permute.xlu0 %v5751_v48 }
  0x77   :  { %318 = vperm.xlu1 %5607, %v5873_v24   ;;  %276 = vperm.xlu0 %5608, %v5898_v33  }
  0x78   :  { %5541 = vmatprep.mubr.msk.f32.mxu0 %vm5750_vm1, %v5748_v30  ;;  %5546 = vmatprep.mubr.msk.f32.mxu1 %vm5750_vm1, %v5748_v30 }
  0x79   :  { %5542 = vmatmul.mubr.msk.f32.vlgmr.msra.gmra.mrb[24].mxu0 %vm460_vm0, %v5960_v45  ;;  %5547 = vmatmul.mubr.msk.f32.vlgmr.msra.gmra.mrb[24].mxu1 %vm460_vm0, %v5964_v46  ;;  %v6184_v45 = vsel %vm8247_vm14, 1, %v8206_v21  ;;  %v6192_v46 = vsel %vm8229_vm15, 1, %v8206_v21 }
  0x7a   :  { %5549 = vmatprep.subr.mxu0 %v5748_v30  ;;  %5554 = vmatprep.subr.mxu1 %v5748_v30  ;;  %8428 = vst [vmem:[#allocation34_spill] sm:$0xff] %v6184_v45  ;;  %8429 = vst [vmem:[#allocation35_spill] sm:$0xff] %v6192_v46 }
  0x7b   :  { %5550 = vmatpush3.xpose.msk.msra.mxu0 %vm460_vm0, %v454_v7  ;;  %5555 = vmatpush3.xpose.msk.msra.mxu1 %vm460_vm0, %v455_v8 }
  0x7c   :  { %5610 = vset.pattern.permute.xlu1 %v5752_v11  ;;  %297 = vperm.xlu0 %5608, %v5920_v37  }
  0x7d   :  { %5551 = vmatprep.mubr.msk.f32.mxu0 %vm5750_vm1, %v5748_v30  ;;  %5556 = vmatprep.mubr.msk.f32.mxu1 %vm5750_vm1, %v5748_v30 }
  0x7e   :  { %340 = vperm.xlu1 %5610, %v5898_v33   ;;  %5552 = vmatmul.mubr.msk.f32.vlgmr.msra.gmra.mrb[26].mxu0 %vm460_vm0, %v5976_v52 }
  0x7f   :  { %5557 = vmatmul.mubr.msk.f32.vlgmr.msra.gmra.mrb[26].mxu1 %vm460_vm0, %v5980_v53  ;;  %5559 = vmatprep.subr.mxu0 %v5748_v30 }
  0x80   :  { %5564 = vmatprep.subr.mxu1 %v5748_v30  ;;  %5560 = vmatpush3.xpose.msk.msra.mxu0 %vm460_vm0, %v456_v12 }
  0x81   :  { %5565 = vmatpush3.xpose.msk.msra.mxu1 %vm460_vm0, %v457_v13  ;;  %311 = vperm.xlu0 %5608, %v5936_v40  }
  0x82   :  { %5561 = vmatprep.mubr.msk.f32.mxu0 %vm5750_vm1, %v5748_v30  ;;  %5566 = vmatprep.mubr.msk.f32.mxu1 %vm5750_vm1, %v5748_v30 }
  0x83   :  { %347 = vperm.xlu1 %5610, %v5826_v3   ;;  %5562 = vmatmul.mubr.msk.f32.vlgmr.msra.gmra.mrb[28].mxu0 %vm460_vm0, %v5992_v58 }
  0x84   :  { %5567 = vmatmul.mubr.msk.f32.vlgmr.msra.gmra.mrb[28].mxu1 %vm460_vm0, %v5996_v59  ;;  %5569 = vmatprep.subr.mxu0 %v5748_v30 }
  0x85   :  { %5574 = vmatprep.subr.mxu1 %v5748_v30  ;;  %5570 = vmatpush3.xpose.msk.msra.mxu0 %vm460_vm0, %v458_v15 }
  0x86   :  { %5575 = vmatpush3.xpose.msk.msra.mxu1 %vm460_vm0, %v459_v16  ;;  %5609 = vset.pattern.permute.xlu0 %v5752_v11 }
  0x87   :  { %5571 = vmatprep.mubr.msk.f32.mxu0 %vm5750_vm1, %v5748_v30  ;;  %5576 = vmatprep.mubr.msk.f32.mxu1 %vm5750_vm1, %v5748_v30  ;;  %v6117_v30 = vsel %vm130_vm5, 1, %v8206_v21  ;;  %vm8237_vm1 = vcmp.gt.s32.totalorder %v5936_v40, 0 }
  0x88   :  { %361 = vperm.xlu1 %5610, %v5920_v37   ;;  %333 = vperm.xlu0 %5609, %v5892_v29   ;;  %8419 = vst [vmem:[#allocation25_spill] sm:$0xff] %v6117_v30  ;;  %v6208_v48 = vsel %vm8237_vm1, 1, %v8206_v21 }
  0x89   :  { %5572 = vmatmul.mubr.msk.f32.vlgmr.msra.gmra.mrb[30].mxu0 %vm460_vm0, %v6008_v0  ;;  %5577 = vmatmul.mubr.msk.f32.vlgmr.msra.gmra.mrb[30].mxu1 %vm460_vm0, %v6012_v1  ;;  %vm8238_vm0 = vcmp.gt.s32.totalorder %v5920_v37, 0  ;;  %8431 = vst [vmem:[#allocation37_spill] sm:$0xff] %v6208_v48 }
  0x8a   :  { %v6200_v47 = vsel %vm8238_vm0, 1, %v8206_v21 }
  0x8b   :  { %8430 = vst [vmem:[#allocation36_spill] sm:$0xff] %v6200_v47 }
  0x8c   :  { %375 = vperm.xlu1 %5610, %v5936_v40   ;;  %354 = vperm.xlu0 %5609, %v5839_v10  }
  0x90   :  { %5612 = vset.pattern.permute.xlu1 %v8206_v21  ;;  %368 = vperm.xlu0 %5609, %v5858_v17  }
  0x91   :  { %3082 = vperm.xlu1 %5612, %v6094_v22  }
  0x94   :  { %382 = vperm.xlu0 %5609, %v5873_v24  }
  0x95   :  { %3085 = vperm.xlu1 %5612, %v6105_v26  }
  0x98   :  { %5611 = vset.pattern.permute.xlu0 %v8206_v21 }
  0x99   :  { %3088 = vperm.xlu1 %5612, %v6114_v28   ;;  %3079 = vperm.xlu0 %5611, %v6117_v30  }
  0x9d   :  { %3091 = vperm.xlu1 %5612, %v6127_v32   ;;  %3214 = vrot.lane.b32.xlu0 %v6132_v34, %s5754_s2 }
  0x9e   :  { %5613 = vset.pattern.permute.xlu0 %v5755_v61 }
  0xa1   :  { %3094 = vperm.xlu1 %5612, %v6142_v36   ;;  %3220 = vrot.lane.b32.xlu0 %v6147_v38, %s5754_s2 }
  0xa5   :  { %3097 = vperm.xlu1 %5612, %v6157_v41   ;;  %3224 = vrot.lane.b32.xlu0 %v6162_v42, %s5754_s2 }
  0xa9   :  { %3100 = vperm.xlu1 %5612, %v6170_v43   ;;  %3228 = vrot.lane.b32.xlu0 %v6175_v44, %s5754_s2 }
  0xad   :  { %3216 = vrot.lane.b32.xlu1 %v6184_v45, %s5754_s2 }
  0xae   :  { %5614 = vset.pattern.permute.xlu1 %v5755_v61 }
  0xb1   :  { %3218 = vrot.lane.b32.xlu1 %v6192_v46, %s5754_s2 }
  0xb5   :  { %3222 = vrot.lane.b32.xlu1 %v6200_v47, %s5754_s2 }
  0xb9   :  { %v6210_v49 = vpop.permute.xlu1 %155  ;;  %3226 = vrot.lane.b32.xlu1 %v6208_v48, %s5754_s2 }
  0xba   :  { %v160_v21 = vrot.slane %v6210_v49, %v6068_v18 }
  0xbc   :  { %vm6316_vm6 = vcmp.lt.s32.totalorder %v6271_v31, %v160_v21 }
  0xbd   :  { %v6214_v50 = vpop.permute.xlu1 %162 }
  0xbe   :  { %v167_v14 = vrot.slane %v6214_v50, %v6068_v18 }
  0xc0   :  { %vm6324_vm10 = vcmp.lt.s32.totalorder %v6271_v31, %v167_v14 }
  0xc2   :  { %v6216_v51 = vpop.permute.xlu1 %176 }
  0xc6   :  { %v6218_v52 = vpop.permute.xlu1 %190 }
  0xc7   :  { %v195_v14 = vrot.slane %v6218_v52, %v6068_v18 }
  0xc9   :  { %vm6383_vm7 = vcmp.lt.s32.totalorder %v6271_v31, %v195_v14 }
  0xcb   :  { %v142_v53 = vpop.permute.xlu0 %141 }
  0xcc   :  { %v146_v25 = vrot.slane %v142_v53, %v6068_v18 }
  0xcd   :  { %v6220_v54 = vpop.permute.xlu1 %212 }
  0xce   :  { %8432 = vst [vmem:[#allocation38_spill] sm:$0xff] %v6220_v54  ;;  %vm6286_vm3 = vcmp.lt.s32.totalorder %v6271_v31, %v146_v25 }
  0xd0   :  { %v149_v55 = vpop.permute.xlu0 %148 }
  0xd1   :  { %v153_v27 = vrot.slane %v149_v55, %v6068_v18  ;;  %v181_v55 = vrot.slane %v6216_v51, %v6068_v18 }
  0xd2   :  { %v6222_v56 = vpop.permute.xlu1 %219 }
  0xd3   :  { %8433 = vst [vmem:[#allocation39_spill] sm:$0xff] %v6222_v56  ;;  %vm6296_vm5 = vcmp.lt.s32.totalorder %v6271_v31, %v153_v27  ;;  %vm6329_vm12 = vcmp.lt.s32.totalorder %v6271_v31, %v181_v55 }
  0xd5   :  { %v6224_v57 = vpop.permute.xlu0 %169 }
  0xd7   :  { %v6226_v58 = vpop.permute.xlu1 %233 }
  0xd8   :  { %8434 = vst [vmem:[#allocation40_spill] sm:$0xff] %v6226_v58 }
  0xda   :  { %v6228_v59 = vpop.permute.xlu0 %183 }
  0xdb   :  { %v188_v52 = vrot.slane %v6228_v59, %v6068_v18 }
  0xdc   :  { %v6230_v60 = vpop.permute.xlu1 %247 }
  0xdd   :  { %8435 = vst [vmem:[#allocation41_spill] sm:$0xff] %v6230_v60  ;;  %vm6393_vm1 = vcmp.lt.s32.totalorder %v6271_v31, %v188_v52 }
  0xe1   :  { %v6232_v62 = vpop.permute.xlu0 %205 }
  0xe2   :  { %8436 = vst [vmem:[#allocation42_spill] sm:$0xff] %v6232_v62  ;;  %v6234_v63 = vpop.permute.xlu1 %269 }
  0xe6   :  { %v6236_v0 = vpop.permute.xlu0 %226 }
  0xe7   :  { %8437 = vst [vmem:[#allocation43_spill] sm:$0xff] %v6236_v0  ;;  %v6238_v1 = vpop.permute.xlu1 %283 }
  0xeb   :  { %v6240_v2 = vpop.permute.xlu0 %240 }
  0xec   :  { %8438 = vst [vmem:[#allocation44_spill] sm:$0xff] %v6240_v2  ;;  %v6242_v4 = vpop.permute.xlu1 %290 }
  0xf0   :  { %v6246_v6 = vpop.permute.xlu0 %254 }
  0xf1   :  { %v6244_v5 = vpop.permute.xlu1 %304  ;;  %8439 = vst [vmem:[#allocation45_spill] sm:$0xff] %v6246_v6  ;;  %v8491_v6 = vmov 0 }
  0xf2   :  { %v309_v50 = vrot.slane %v6244_v5, %v6068_v18 }
  0xf6   :  { %v6248_v7 = vpop.permute.xlu0 %276  ;;  %v6250_v8 = vpop.permute.xlu1 %318 }
  0xfb   :  { %v6252_v11 = vpop.permute.xlu0 %297 }
  0xfd   :  { %v6254_v12 = vpop.permute.xlu1 %340 }
  0xfe   :  { %8440 = vst [vmem:[#allocation46_spill] sm:$0xff] %v6254_v12 }
 0x100   :  { %v6256_v13 = vpop.permute.xlu0 %311 }
 0x101   :  { %v316_v9 = vrot.slane %v6256_v13, %v6068_v18  ;;  %v323_v13 = vrot.slane %v6250_v8, %v6068_v18 }
 0x102   :  { %v6258_v15 = vpop.permute.xlu1 %347 }
 0x103   :  { %8441 = vst [vmem:[#allocation47_spill] sm:$0xff] %v6258_v15 }
 0x107   :  { %v6260_v16 = vpop.permute.xlu1 %361  ;;  %v6262_v19 = vpop.permute.xlu0 %333 }
 0x108   :  { %8442 = vst [vmem:[#allocation48_spill] sm:$0xff] %v6260_v16  ;;  %8443 = vst [vmem:[#allocation49_spill] sm:$0xff] %v6262_v19 }
 0x10b   :  { %v6264_v20 = vpop.permute.xlu1 %375  ;;  %v6266_v23 = vpop.permute.xlu0 %354 }
 0x10c   :  { %8444 = vst [vmem:[#allocation50_spill] sm:$0xff] %v6264_v20  ;;  %8445 = vst [vmem:[#allocation51_spill] sm:$0xff] %v6266_v23 }
 0x10f   :  { %v6273_v35 = vpop.permute.xlu0 %368 }
 0x110   :  { %8447 = vst [vmem:[#allocation53_spill] sm:$0xff] %v6273_v35  ;;  %v6275_v39 = vpop.permute.xlu1 %3082  ;;  %v6277_v61 = vpop.f32.mrb[0].mxu0 }
 0x111   :  { %v6283_v24 = vpop.f32.mrb[0].mxu1  ;;  %v536_v53 = vpop.f32.mrb[1].mxu0  ;;  %vm3103_vm4 = vcmp.eq.s32.totalorder %v6275_v39, 1 }
 0x112   :  { %v620_v17 = vpop.f32.mrb[1].mxu1  ;;  %v2989_v49 = vsel %vm6286_vm3, %v536_v53, -1e+30 }
 0x113   :  { %v3111_v25 = vsel %vm3103_vm4, %v620_v17, -1e+30  ;;  %v2998_v10 = vsel %vm8346_vm2, %v2989_v49, -inf  ;;  %v2990_v3 = vsel %vm6296_vm5, %v620_v17, -1e+30  ;;  %v6305_v51 = vpop.permute.xlu0 %382  ;;  %v174_v17 = vrot.slane %v6224_v57, %v6068_v18 }
 0x114   :  { %8452 = vst [vmem:[#allocation54_spill] sm:$0xff] %v6305_v51  ;;  %v6307_v29 = vpop.permute.xlu1 %3085  ;;  %v3125_v20 = vsel %vm8346_vm2, %v3111_v25, -inf  ;;  %2999 = vmax.xlane.f32.xlu1 %v2998_v10  ;;  %v3001_v27 = vsel %vm8346_vm2, %v2990_v3, -inf }
 0x115   :  { %v3126_v40 = vrot.slane %v3125_v20, 4  ;;  %v6311_v16 = vpop.f32.mrb[2].mxu0  ;;  %v6313_v12 = vpop.f32.mrb[2].mxu1  ;;  %3002 = vmax.xlane.f32.xlu0 %v3001_v27  ;;  %vm3104_vm8 = vcmp.eq.s32.totalorder %v6307_v29, 1  ;;  %vm6361_vm9 = vcmp.lt.s32.totalorder %v6271_v31, %v174_v17 }
 0x116   :  { %v704_v25 = vpop.f32.mrb[3].mxu0  ;;  %v788_v10 = vpop.f32.mrb[3].mxu1  ;;  %v3313_v49 = vsel %vm6324_vm10, %v6313_v12, -1e+30 }
 0x117   :  { %v3127_v21 = vmax.f32 %v3125_v20, %v3126_v40  ;;  %v3112_v37 = vsel %vm3104_vm8, %v704_v25, -1e+30  ;;  %v2992_v57 = vsel %vm6324_vm10, %v788_v10, -1e+30  ;;  %v2991_v33 = vsel %vm6316_vm6, %v704_v25, -1e+30 }
 0x118   :  { %v6341_v51 = vpop.permute.xlu1 %3088  ;;  %v6343_v35 = vpop.permute.xlu0 %3079  ;;  %v3132_v55 = vsel %vm8346_vm2, %v3112_v37, -inf  ;;  %v3007_v40 = vsel %vm8346_vm2, %v2992_v57, -inf  ;;  %v3004_v20 = vsel %vm8346_vm2, %v2991_v33, -inf }
 0x119   :  { %vm3105_vm13 = vcmp.eq.s32.totalorder %v6341_v51, 1  ;;  %vm3102_vm11 = vcmp.eq.s32.totalorder %v6343_v35, 1  ;;  %v3128_v23 = vrot.slane %v3127_v21, 2  ;;  %v3133_v15 = vrot.slane %v3132_v55, 4  ;;  %v6350_v25 = vpop.f32.mrb[4].mxu0  ;;  %3008 = vmax.xlane.f32.xlu1 %v3007_v40  ;;  %3005 = vmax.xlane.f32.xlu0 %v3004_v20 }
 0x11a   :  { %v3110_v37 = vsel %vm3102_vm11, %v536_v53, -1e+30  ;;  %v3113_v57 = vsel %vm3105_vm13, %v788_v10, -1e+30  ;;  %v6358_v33 = vpop.f32.mrb[4].mxu1  ;;  %v872_v19 = vpop.f32.mrb[5].mxu0 }
 0x11b   :  { %v3118_v40 = vsel %vm8346_vm2, %v3110_v37, -inf  ;;  %v3134_v20 = vmax.f32 %v3132_v55, %v3133_v15  ;;  %v3139_v60 = vsel %vm8346_vm2, %v3113_v57, -inf  ;;  %v956_v59 = vpop.f32.mrb[5].mxu1  ;;  %v2993_v53 = vsel %vm6361_vm9, %v872_v19, -1e+30 }
 0x11c   :  { %v6369_v2 = vpop.permute.xlu1 %3091  ;;  %v3119_v10 = vrot.slane %v3118_v40, 4  ;;  %v3140_v58 = vrot.slane %v3139_v60, 4  ;;  %v2994_v54 = vsel %vm6329_vm12, %v956_v59, -1e+30  ;;  %v3010_v17 = vsel %vm8346_vm2, %v2993_v53, -inf }
 0x11d   :  { %vm3106_vm15 = vcmp.eq.s32.totalorder %v6369_v2, 1  ;;  %v3135_v0 = vrot.slane %v3134_v20, 2  ;;  %v3013_v15 = vsel %vm8346_vm2, %v2994_v54, -inf  ;;  %3011 = vmax.xlane.f32.xlu0 %v3010_v17  ;;  %v3129_v55 = vmax.f32 %v3127_v21, %v3128_v23 }
 0x11e   :  { %v3120_v37 = vmax.f32 %v3118_v40, %v3119_v10  ;;  %v3141_v57 = vmax.f32 %v3139_v60, %v3140_v58  ;;  %v3114_v56 = vsel %vm3106_vm15, %v872_v19, -1e+30  ;;  %v6378_v62 = vpop.f32.mrb[6].mxu0  ;;  %v6380_v48 = vpop.f32.mrb[6].mxu1  ;;  %3014 = vmax.xlane.f32.xlu1 %v3013_v15  ;;  %v274_v2 = vrot.slane %v6234_v63, %v6068_v18 }
 0x11f   :  { %v1040_v44 = vpop.f32.mrb[7].mxu0  ;;  %v1124_v47 = vpop.f32.mrb[7].mxu1  ;;  %v3130_v54 = vrot.slane %v3129_v55, 1  ;;  %v3146_v58 = vsel %vm8346_vm2, %v3114_v56, -inf  ;;  %v3136_v40 = vmax.f32 %v3134_v20, %v3135_v0  ;;  %v288_v63 = vrot.slane %v6238_v1, %v6068_v18 }
 0x120   :  { %v6387_v17 = vpop.permute.xlu1 %3094  ;;  %v3121_v23 = vrot.slane %v3120_v37, 2  ;;  %v2996_v60 = vsel %vm6383_vm7, %v1124_v47, -1e+30  ;;  %v2995_v14 = vsel %vm6393_vm1, %v1040_v44, -1e+30  ;;  %v3142_v10 = vrot.slane %v3141_v57, 2 }
 0x121   :  { %vm3107_vm0 = vcmp.eq.s32.totalorder %v6387_v17, 1  ;;  %v3019_v21 = vsel %vm8346_vm2, %v2996_v60, -inf  ;;  %v3016_v15 = vsel %vm8346_vm2, %v2995_v14, -inf  ;;  %v3131_v42 = vmax.f32 %v3129_v55, %v3130_v54 }
 0x122   :  { %v3115_v56 = vsel %vm3107_vm0, %v956_v59, -1e+30  ;;  %3020 = vmax.xlane.f32.xlu1 %v3019_v21  ;;  %3017 = vmax.xlane.f32.xlu0 %v3016_v15  ;;  %v3147_v46 = vrot.slane %v3146_v58, 4  ;;  %v3122_v20 = vmax.f32 %v3120_v37, %v3121_v23  ;;  %v3137_v54 = vrot.slane %v3136_v40, 1 }
 0x123   :  { %v3153_v52 = vsel %vm8346_vm2, %v3115_v56, -inf  ;;  %v6405_v45 = vpop.f32.mrb[8].mxu0  ;;  %v6407_v38 = vpop.f32.mrb[8].mxu1  ;;  %v3177_v15 = vsel %vm8346_vm2, %v3131_v42, 0.0  ;;  %v3143_v34 = vmax.f32 %v3141_v57, %v3142_v10  ;;  %v3314_v3 = vsel %vm6361_vm9, %v6350_v25, -1e+30 }
 0x124   :  { %8465 = vst [vmem:[#allocation55_spill] sm:$0xff] %v6405_v45  ;;  %8466 = vst [vmem:[#allocation56_spill] sm:$0xff] %v6407_v38  ;;  %v3098_v60 = vpop.permute.xlu1 %3097  ;;  %v6412_v0 = vsel %vm3102_vm11, %v6405_v45, -1e+30  ;;  %v3154_v59 = vrot.slane %v3153_v52, 4  ;;  %v5463_v14 = vpop.f32.mrb[9].mxu0  ;;  %v3148_v37 = vmax.f32 %v3146_v58, %v3147_v46  ;;  %v3138_v42 = vmax.f32 %v3136_v40, %v3137_v54 }
 0x125   :  { %8467 = vst [vmem:[#allocation57_spill] sm:$0xff] %v6412_v0  ;;  %vm3108_vm14 = vcmp.eq.s32.totalorder %v3098_v60, 1  ;;  %v6417_v55 = vsel %vm3103_vm4, %v6407_v38, -1e+30  ;;  %v5468_v56 = vpop.f32.mrb[9].mxu1  ;;  %v3123_v43 = vrot.slane %v3122_v20, 1 }
 0x126   :  { %v3116_v21 = vsel %vm3108_vm14, %v1040_v44, -1e+30  ;;  %3178 = vadd.xlane.f32.xlu0 %v3177_v15  ;;  %v3155_v39 = vmax.f32 %v3153_v52, %v3154_v59  ;;  %v3144_v46 = vrot.slane %v3143_v34, 1  ;;  %v3149_v59 = vrot.slane %v3148_v37, 2 }
 0x127   :  { %v3160_v35 = vsel %vm8346_vm2, %v3116_v21, -inf  ;;  %v3124_v29 = vmax.f32 %v3122_v20, %v3123_v43  ;;  %v3330_v27 = vsel %vm8346_vm2, %v3314_v3, -inf }
 0x128   :  { %v3101_v45 = vpop.permute.xlu1 %3100  ;;  %v3161_v23 = vrot.slane %v3160_v35, 4  ;;  %v6422_v0 = vpop.f32.mrb[10].mxu0  ;;  %v3156_v38 = vrot.slane %v3155_v39, 2 }
 0x129   :  { %8468 = vst [vmem:[#allocation58_spill] sm:$0xff] %v6422_v0  ;;  %vm3109_vm11 = vcmp.eq.s32.totalorder %v3101_v45, 1  ;;  %v6427_v44 = vsel %vm3104_vm8, %v6422_v0, -1e+30  ;;  %v6429_v14 = vpop.f32.mrb[10].mxu1  ;;  %v5473_v21 = vpop.f32.mrb[11].mxu0 }
 0x12a   :  { %v3162_v57 = vmax.f32 %v3160_v35, %v3161_v23  ;;  %v3117_v10 = vsel %vm3109_vm11, %v1124_v47, -1e+30  ;;  %v5478_v56 = vpop.f32.mrb[11].mxu1  ;;  %v6436_v52 = vsel %vm3105_vm13, %v6429_v14, -1e+30  ;;  %v3180_v47 = vsel %vm8346_vm2, %v3138_v42, 0.0 }
 0x12b   :  { %v3167_v58 = vsel %vm8346_vm2, %v3117_v10, -inf  ;;  %v3174_v23 = vsel %vm8346_vm2, %v3124_v29, 0.0  ;;  %3181 = vadd.xlane.f32.xlu0 %v3180_v47  ;;  %v3145_v10 = vmax.f32 %v3143_v34, %v3144_v46  ;;  %v3150_v42 = vmax.f32 %v3148_v37, %v3149_v59 }
 0x12c   :  { %v3168_v15 = vrot.slane %v3167_v58, 4  ;;  %v3163_v54 = vrot.slane %v3162_v57, 2  ;;  %3175 = vadd.xlane.f32.xlu1 %v3174_v23  ;;  %v281_v37 = vrot.slane %v6248_v7, %v6068_v18  ;;  %vm6474_vm13 = vcmp.lt.s32.totalorder %v6271_v31, %v274_v2 }
 0x12d   :  { %v6438_v0 = vpop.f32.mrb[12].mxu0  ;;  %v6440_v40 = vpop.f32.mrb[12].mxu1 }
 0x12e   :  { %v3169_v35 = vmax.f32 %v3167_v58, %v3168_v15  ;;  %v5483_v21 = vpop.f32.mrb[13].mxu0  ;;  %v5488_v56 = vpop.f32.mrb[13].mxu1  ;;  %v6447_v43 = vsel %vm3106_vm15, %v6438_v0, -1e+30  ;;  %v6452_v20 = vsel %vm3107_vm0, %v6440_v40, -1e+30  ;;  %v3157_v58 = vmax.f32 %v3155_v39, %v3156_v38 }
 0x12f   :  { %v3183_v15 = vsel %vm8346_vm2, %v3145_v10, 0.0  ;;  %v3164_v46 = vmax.f32 %v3162_v57, %v3163_v54  ;;  %v3151_v39 = vrot.slane %v3150_v42, 1  ;;  %vm6503_vm15 = vcmp.lt.s32.totalorder %v6271_v31, %v288_v63 }
 0x130   :  { %v3170_v51 = vrot.slane %v3169_v35, 2  ;;  %3184 = vadd.xlane.f32.xlu1 %v3183_v15  ;;  %v3158_v57 = vrot.slane %v3157_v58, 1  ;;  %v295_v15 = vrot.slane %v6242_v4, %v6068_v18  ;;  %v3311_v4 = vsel %vm6296_vm5, %v6283_v24, -1e+30 }
 0x131   :  { %v3152_v54 = vmax.f32 %v3150_v42, %v3151_v39  ;;  %v3165_v10 = vrot.slane %v3164_v46, 1  ;;  %vm6579_vm5 = vcmp.lt.s32.totalorder %v6271_v31, %v316_v9 }
 0x132   :  { %v6455_v29 = vpop.f32.mrb[14].mxu0  ;;  %v6457_v34 = vpop.f32.mrb[14].mxu1  ;;  %v3171_v17 = vmax.f32 %v3169_v35, %v3170_v51  ;;  %v3159_v60 = vmax.f32 %v3157_v58, %v3158_v57  ;;  %vm6519_vm0 = vcmp.lt.s32.totalorder %v6271_v31, %v295_v15  ;;  %v3321_v15 = vsel %vm8346_vm2, %v3311_v4, -inf }
 0x133   :  { %v6463_v47 = vsel %vm3108_vm14, %v6455_v29, -1e+30  ;;  %v6469_v38 = vsel %vm3109_vm11, %v6457_v34, -1e+30  ;;  %v5493_v59 = vpop.f32.mrb[15].mxu0  ;;  %v5498_v23 = vpop.f32.mrb[15].mxu1  ;;  %vm6485_vm14 = vcmp.lt.s32.totalorder %v6271_v31, %v281_v37  ;;  %v3166_v42 = vmax.f32 %v3164_v46, %v3165_v10 }
 0x134   :  { %v3172_v45 = vrot.slane %v3171_v17, 1  ;;  %v3186_v21 = vsel %vm8346_vm2, %v3152_v54, 0.0  ;;  %v3189_v2 = vsel %vm8346_vm2, %v3159_v60, 0.0  ;;  %v302_v54 = vrot.slane %v6252_v11, %v6068_v18 }
 0x135   :  { %3187 = vadd.xlane.f32.xlu0 %v3186_v21  ;;  %3190 = vadd.xlane.f32.xlu1 %v3189_v2  ;;  %v3192_v23 = vsel %vm8346_vm2, %v3166_v42, 0.0  ;;  %v3310_v21 = vsel %vm6286_vm3, %v6277_v61, -1e+30  ;;  %vm6555_vm3 = vcmp.lt.s32.totalorder %v6271_v31, %v309_v50  ;;  %v3327_v4 = vsel %vm8346_vm2, %v3313_v49, -inf }
 0x136   :  { %v3173_v59 = vmax.f32 %v3171_v17, %v3172_v45  ;;  %v3318_v2 = vsel %vm8346_vm2, %v3310_v21, -inf  ;;  %vm6540_vm4 = vcmp.lt.s32.totalorder %v6271_v31, %v302_v54  ;;  %v8487_v11 = vmov 0 }
 0x137   :  { %v6478_v7 = vpop.f32.mrb[16].mxu0  ;;  %v8488_v11 = vsel %vm6579_vm5, 4294967295, %v8487_v11  ;;  %v3317_v10 = vsel %vm6383_vm7, %v6380_v48, -1e+30 }
 0x138   :  { %8471 = vst [vmem:[#allocation59_spill] sm:$0xff] %v6478_v7  ;;  %v6489_v1 = vpop.f32.mrb[16].mxu1  ;;  %v6491_v58 = vpop.f32.mrb[17].mxu0  ;;  %v3195_v17 = vsel %vm8346_vm2, %v3173_v59, 0.0  ;;  %8489 = vst [vmem:[#allocation65_spill] sm:$0xff] %v8488_v11 }
 0x139   :  { %8474 = vst [vmem:[#allocation60_spill] sm:$0xff] %v6489_v1  ;;  %v6499_v37 = vpop.f32.mrb[17].mxu1  ;;  %3193 = vadd.xlane.f32.xlu0 %v3192_v23  ;;  %3196 = vadd.xlane.f32.xlu1 %v3195_v17  ;;  %v3312_v23 = vsel %vm6316_vm6, %v6311_v16, -1e+30  ;;  %vm6592_vm6 = vcmp.lt.s32.totalorder %v6271_v31, %v323_v13  ;;  %v3316_v13 = vsel %vm6393_vm1, %v6378_v62, -1e+30 }
 0x13a   :  { %v3324_v50 = vsel %vm8346_vm2, %v3312_v23, -inf  ;;  %v8492_v6 = vsel %vm6592_vm6, 4294967295, %v8491_v6  ;;  %v3336_v3 = vsel %vm8346_vm2, %v3316_v13, -inf }
 0x13b   :  { %8493 = vst [vmem:[#allocation67_spill] sm:$0xff] %v8492_v6 }
 0x13c   :  { %v6507_v57 = vpop.f32.mrb[18].mxu0 }
 0x13d   :  { %8477 = vst [vmem:[#allocation61_spill] sm:$0xff] %v6507_v57  ;;  %v6523_v60 = vpop.f32.mrb[18].mxu1  ;;  %v6525_v45 = vpop.f32.mrb[19].mxu0  ;;  %3322 = vmax.xlane.f32.xlu0 %v3321_v15  ;;  %3319 = vmax.xlane.f32.xlu1 %v3318_v2  ;;  %v3315_v15 = vsel %vm6329_vm12, %v6358_v33, -1e+30 }
 0x13e   :  { %8480 = vst [vmem:[#allocation62_spill] sm:$0xff] %v6523_v60  ;;  %v6535_v42 = vpop.f32.mrb[19].mxu1  ;;  %v3333_v23 = vsel %vm8346_vm2, %v3315_v15, -inf }
 0x141   :  { %v6544_v5 = vpop.f32.mrb[20].mxu0  ;;  %3325 = vmax.xlane.f32.xlu0 %v3324_v50  ;;  %3328 = vmax.xlane.f32.xlu1 %v3327_v4 }
 0x142   :  { %8483 = vst [vmem:[#allocation63_spill] sm:$0xff] %v6544_v5  ;;  %v6559_v17 = vpop.f32.mrb[20].mxu1  ;;  %v6564_v21 = vpop.f32.mrb[21].mxu0 }
 0x143   :  { %8486 = vst [vmem:[#allocation64_spill] sm:$0xff] %v6559_v17  ;;  %v6571_v2 = vpop.f32.mrb[21].mxu1 }
 0x145   :  { %3331 = vmax.xlane.f32.xlu0 %v3330_v27  ;;  %3334 = vmax.xlane.f32.xlu1 %v3333_v23  ;;  %v3339_v27 = vsel %vm8346_vm2, %v3317_v10, -inf }
 0x146   :  { %v6583_v8 = vpop.f32.mrb[22].mxu0 }
 0x147   :  { %8490 = vst [vmem:[#allocation66_spill] sm:$0xff] %v6583_v8  ;;  %v6596_v4 = vpop.f32.mrb[22].mxu1  ;;  %v6598_v9 = vpop.f32.mrb[23].mxu0 }
 0x148   :  { %8494 = vst [vmem:[#allocation68_spill] sm:$0xff] %v6596_v4  ;;  %8495 = vst [vmem:[#allocation69_spill] sm:$0xff] %v6598_v9  ;;  %v6604_v50 = vpop.f32.mrb[23].mxu1 }
 0x149   :  { %8496 = vst [vmem:[#allocation70_spill] sm:$0xff] %v6604_v50  ;;  %3337 = vmax.xlane.f32.xlu0 %v3336_v3  ;;  %3340 = vmax.xlane.f32.xlu1 %v3339_v27 }
 0x14c   :  { %v6613_v56 = vpop.f32.mrb[24].mxu0  ;;  %v6615_v39 = vpop.f32.mrb[24].mxu1 }
 0x14d   :  { %8497 = vst [vmem:[#allocation71_spill] sm:$0xff] %v6613_v56  ;;  %8498 = vst [vmem:[#allocation72_spill] sm:$0xff] %v6615_v39  ;;  %v5543_v49 = vpop.f32.mrb[25].mxu0  ;;  %v5548_v15 = vpop.f32.mrb[25].mxu1 }
 0x151   :  { %v6619_v17 = vpop.f32.mrb[26].mxu0 }
 0x152   :  { %8499 = vst [vmem:[#allocation73_spill] sm:$0xff] %v6619_v17  ;;  %v6621_v19 = vpop.f32.mrb[26].mxu1  ;;  %v5553_v23 = vpop.f32.mrb[27].mxu0 }
 0x153   :  { %8500 = vst [vmem:[#allocation74_spill] sm:$0xff] %v6621_v19  ;;  %v5558_v4 = vpop.f32.mrb[27].mxu1 }
 0x154   :  { %v6641_v4 = vpop.permute.xlu1 %3216 }
 0x155   :  { %8507 = vst [vmem:[#allocation80_spill] sm:$0xff] %v6641_v4 }
 0x156   :  { %v6623_v53 = vpop.f32.mrb[28].mxu0 }
 0x157   :  { %8501 = vst [vmem:[#allocation75_spill] sm:$0xff] %v6623_v53  ;;  %v6625_v8 = vpop.f32.mrb[28].mxu1  ;;  %v5563_v5 = vpop.f32.mrb[29].mxu0 }
 0x158   :  { %8502 = vst [vmem:[#allocation76_spill] sm:$0xff] %v6625_v8  ;;  %v5568_v60 = vpop.f32.mrb[29].mxu1  ;;  %v6639_v5 = vpop.permute.xlu0 %3214 }
 0x159   :  { %v8505_v60 = vld [vmem:[#allocation32_spill] sm:$0xff]  ;;  %8506 = vst [vmem:[#allocation79_spill] sm:$0xff] %v6639_v5  ;;  %v6645_v27 = vpop.permute.xlu1 %3218 }
 0x15a   :  { %3394 = vperm.xlu1 %5614, %v6094_v22   ;;  %8509 = vst [vmem:[#allocation82_spill] sm:$0xff] %v6645_v27 }
 0x15c   :  { %v6627_v57 = vpop.f32.mrb[30].mxu0  ;;  %v6629_v13 = vpop.f32.mrb[30].mxu1 }
 0x15d   :  { %8503 = vst [vmem:[#allocation77_spill] sm:$0xff] %v6627_v57  ;;  %8504 = vst [vmem:[#allocation78_spill] sm:$0xff] %v6629_v13  ;;  %v5573_v10 = vpop.f32.mrb[31].mxu0  ;;  %v5578_v49 = vpop.f32.mrb[31].mxu1 }
 0x15e   :  { %3397 = vperm.xlu1 %5614, %v6105_v26   ;;  %v6643_v3 = vpop.permute.xlu0 %3220  ;;  %v6649_v23 = vpop.permute.xlu1 %3222 }
 0x15f   :  { %3391 = vperm.xlu0 %5613, %v6117_v30   ;;  %8508 = vst [vmem:[#allocation81_spill] sm:$0xff] %v6643_v3  ;;  %8511 = vst [vmem:[#allocation84_spill] sm:$0xff] %v6649_v23 }
 0x162   :  { %3400 = vperm.xlu1 %5614, %v6114_v28   ;;  %v6647_v15 = vpop.permute.xlu0 %3224  ;;  %v6653_v49 = vpop.permute.xlu1 %3226 }
 0x163   :  { %8510 = vst [vmem:[#allocation83_spill] sm:$0xff] %v6647_v15  ;;  %8513 = vst [vmem:[#allocation86_spill] sm:$0xff] %v6653_v49 }
 0x166   :  { %3403 = vperm.xlu1 %5614, %v6127_v32   ;;  %v6651_v10 = vpop.permute.xlu0 %3228 }
 0x167   :  { %8512 = vst [vmem:[#allocation85_spill] sm:$0xff] %v6651_v10 }
 0x16a   :  { %3406 = vperm.xlu1 %5614, %v6142_v36  }
 0x16e   :  { %3409 = vperm.xlu1 %5614, %v6157_v41  }
 0x172   :  { %3412 = vperm.xlu1 %5614, %v8505_v60  }
 0x1a1   :  { %v6657_v57 = vpop.xlane.xlu1 %2999 }
 0x1a2   :  { %v6655_v13 = vpop.xlane.xlu0 %3002  ;;  %8515 = vst [vmem:[#allocation88_spill] sm:$0xff] %v6657_v57 }
 0x1a3   :  { %8514 = vst [vmem:[#allocation87_spill] sm:$0xff] %v6655_v13 }
 0x1a6   :  { %v6659_v1 = vpop.xlane.xlu0 %3005  ;;  %v6661_v5 = vpop.xlane.xlu1 %3008 }
 0x1a7   :  { %8516 = vst [vmem:[#allocation89_spill] sm:$0xff] %v6659_v1  ;;  %8517 = vst [vmem:[#allocation90_spill] sm:$0xff] %v6661_v5 }
 0x1aa   :  { %v6663_v4 = vpop.xlane.xlu0 %3011 }
 0x1ab   :  { %8518 = vst [vmem:[#allocation91_spill] sm:$0xff] %v6663_v4  ;;  %v6665_v3 = vpop.xlane.xlu1 %3014 }
 0x1ac   :  { %8519 = vst [vmem:[#allocation92_spill] sm:$0xff] %v6665_v3 }
 0x1af   :  { %v6667_v27 = vpop.xlane.xlu0 %3017  ;;  %v6669_v15 = vpop.xlane.xlu1 %3020 }
 0x1b0   :  { %8520 = vst [vmem:[#allocation93_spill] sm:$0xff] %v6667_v27  ;;  %8521 = vst [vmem:[#allocation94_spill] sm:$0xff] %v6669_v15 }
 0x1b3   :  { %v6671_v23 = vpop.xlane.xlu0 %3178 }
 0x1b8   :  { %v6675_v49 = vpop.xlane.xlu0 %3181 }
 0x1b9   :  { %v6673_v10 = vpop.xlane.xlu1 %3175 }
 0x1bd   :  { %v6677_v13 = vpop.xlane.xlu1 %3184 }
 0x1c2   :  { %v6679_v57 = vpop.xlane.xlu0 %3187  ;;  %v6681_v1 = vpop.xlane.xlu1 %3190 }
 0x1c6   :  { %v6683_v5 = vpop.xlane.xlu0 %3193  ;;  %v6685_v4 = vpop.xlane.xlu1 %3196 }
 0x1ca   :  { %v6687_v3 = vpop.xlane.xlu0 %3322  ;;  %v6689_v27 = vpop.xlane.xlu1 %3319 }
 0x1cb   :  { %8522 = vst [vmem:[#allocation95_spill] sm:$0xff] %v6687_v3  ;;  %8523 = vst [vmem:[#allocation96_spill] sm:$0xff] %v6689_v27 }
 0x1ce   :  { %v6691_v15 = vpop.xlane.xlu0 %3325  ;;  %v6693_v7 = vpop.xlane.xlu1 %3328 }
 0x1cf   :  { %8524 = vst [vmem:[#allocation97_spill] sm:$0xff] %v6691_v15  ;;  %8525 = vst [vmem:[#allocation98_spill] sm:$0xff] %v6693_v7 }
 0x1d2   :  { %v6695_v8 = vpop.xlane.xlu1 %3334  ;;  %v6697_v39 = vpop.xlane.xlu0 %3331 }
 0x1d3   :  { %8526 = vst [vmem:[#allocation99_spill] sm:$0xff] %v6695_v8  ;;  %8527 = vst [vmem:[#allocation100_spill] sm:$0xff] %v6697_v39 }
 0x1d6   :  { %v6699_v53 = vpop.xlane.xlu1 %3340  ;;  %v6701_v19 = vpop.xlane.xlu0 %3337 }
 0x1d7   :  { %8528 = vst [vmem:[#allocation101_spill] sm:$0xff] %v6699_v53  ;;  %8529 = vst [vmem:[#allocation102_spill] sm:$0xff] %v6701_v19 }
 0x1da   :  { %v3395_v17 = vpop.permute.xlu1 %3394 }
 0x1db   :  { %vm3415_vm7 = vcmp.eq.s32.totalorder %v3395_v17, 1 }
 0x1dc   :  { %v3423_v56 = vsel %vm3415_vm7, %v6283_v24, -1e+30 }
 0x1dd   :  { %v3437_v3 = vsel %vm8346_vm2, %v3423_v56, -inf }
 0x1de   :  { %v3392_v60 = vpop.permute.xlu0 %3391  ;;  %v3438_v27 = vrot.slane %v3437_v3, 4  ;;  %v3398_v41 = vpop.permute.xlu1 %3397 }
 0x1df   :  { %vm3414_vm9 = vcmp.eq.s32.totalorder %v3392_v60, 1  ;;  %vm3416_vm1 = vcmp.eq.s32.totalorder %v3398_v41, 1 }
 0x1e0   :  { %v3422_v7 = vsel %vm3414_vm9, %v6277_v61, -1e+30  ;;  %v3439_v8 = vmax.f32 %v3437_v3, %v3438_v27  ;;  %v3424_v39 = vsel %vm3416_vm1, %v6311_v16, -1e+30 }
 0x1e1   :  { %v3430_v53 = vsel %vm8346_vm2, %v3422_v7, -inf  ;;  %v3444_v19 = vsel %vm8346_vm2, %v3424_v39, -inf }
 0x1e2   :  { %v3431_v15 = vrot.slane %v3430_v53, 4  ;;  %v3445_v17 = vrot.slane %v3444_v19, 4  ;;  %v3401_v22 = vpop.permute.xlu1 %3400  ;;  %v3440_v24 = vrot.slane %v3439_v8, 2 }
 0x1e3   :  { %vm3417_vm8 = vcmp.eq.s32.totalorder %v3401_v22, 1 }
 0x1e4   :  { %v3432_v32 = vmax.f32 %v3430_v53, %v3431_v15  ;;  %v3446_v56 = vmax.f32 %v3444_v19, %v3445_v17  ;;  %v3425_v36 = vsel %vm3417_vm8, %v6313_v12, -1e+30  ;;  %v3441_v60 = vmax.f32 %v3439_v8, %v3440_v24 }
 0x1e5   :  { %v3451_v41 = vsel %vm8346_vm2, %v3425_v36, -inf }
 0x1e6   :  { %v3433_v61 = vrot.slane %v3432_v32, 2  ;;  %v3452_v3 = vrot.slane %v3451_v41, 4  ;;  %v3404_v27 = vpop.permute.xlu1 %3403  ;;  %v3442_v16 = vrot.slane %v3441_v60, 1  ;;  %v3447_v28 = vrot.slane %v3446_v56, 2 }
 0x1e7   :  { %vm3418_vm10 = vcmp.eq.s32.totalorder %v3404_v27, 1 }
 0x1e8   :  { %v3434_v7 = vmax.f32 %v3432_v32, %v3433_v61  ;;  %v3453_v39 = vmax.f32 %v3451_v41, %v3452_v3  ;;  %v3426_v26 = vsel %vm3418_vm10, %v6350_v25, -1e+30  ;;  %v3443_v30 = vmax.f32 %v3441_v60, %v3442_v16 }
 0x1e9   :  { %v3448_v6 = vmax.f32 %v3446_v56, %v3447_v28  ;;  %v3458_v22 = vsel %vm8346_vm2, %v3426_v26, -inf }
 0x1ea   :  { %v3435_v19 = vrot.slane %v3434_v7, 1  ;;  %v3459_v53 = vrot.slane %v3458_v22, 4  ;;  %v3407_v12 = vpop.permute.xlu1 %3406  ;;  %v3489_v8 = vsel %vm8346_vm2, %v3443_v30, 0.0  ;;  %v3454_v15 = vrot.slane %v3453_v39, 2 }
 0x1eb   :  { %v3449_v36 = vrot.slane %v3448_v6, 1  ;;  %vm3419_vm12 = vcmp.eq.s32.totalorder %v3407_v12, 1  ;;  %3490 = vadd.xlane.f32.xlu1 %v3489_v8 }
 0x1ec   :  { %v3436_v17 = vmax.f32 %v3434_v7, %v3435_v19  ;;  %v3460_v24 = vmax.f32 %v3458_v22, %v3459_v53  ;;  %v3427_v32 = vsel %vm3419_vm12, %v6358_v33, -1e+30  ;;  %v3455_v41 = vmax.f32 %v3453_v39, %v3454_v15 }
 0x1ed   :  { %v3465_v25 = vsel %vm8346_vm2, %v3427_v32, -inf  ;;  %v3450_v56 = vmax.f32 %v3448_v6, %v3449_v36 }
 0x1ee   :  { %v3486_v28 = vsel %vm8346_vm2, %v3436_v17, 0.0  ;;  %v3466_v26 = vrot.slane %v3465_v25, 4  ;;  %v3410_v60 = vpop.permute.xlu1 %3409  ;;  %v3461_v61 = vrot.slane %v3460_v24, 2  ;;  %v3456_v3 = vrot.slane %v3455_v41, 1 }
 0x1ef   :  { %3487 = vadd.xlane.f32.xlu0 %v3486_v28  ;;  %vm3420_vm11 = vcmp.eq.s32.totalorder %v3410_v60, 1  ;;  %v3492_v33 = vsel %vm8346_vm2, %v3450_v56, 0.0 }
 0x1f0   :  { %v3467_v30 = vmax.f32 %v3465_v25, %v3466_v26  ;;  %v3428_v27 = vsel %vm3420_vm11, %v6378_v62, -1e+30  ;;  %v3462_v16 = vmax.f32 %v3460_v24, %v3461_v61  ;;  %v3457_v39 = vmax.f32 %v3455_v41, %v3456_v3 }
 0x1f1   :  { %v3472_v7 = vsel %vm8346_vm2, %v3428_v27, -inf }
 0x1f2   :  { %v3473_v22 = vrot.slane %v3472_v7, 4  ;;  %v3413_v19 = vpop.permute.xlu1 %3412  ;;  %v3463_v53 = vrot.slane %v3462_v16, 1  ;;  %v3468_v6 = vrot.slane %v3467_v30, 2  ;;  %v3495_v62 = vsel %vm8346_vm2, %v3457_v39, 0.0 }
 0x1f3   :  { %3493 = vadd.xlane.f32.xlu0 %v3492_v33  ;;  %vm3421_vm7 = vcmp.eq.s32.totalorder %v3413_v19, 1  ;;  %v5639_v19 = vld [vmem:[#allocation2 + $0x2] sm:$0x1] }
 0x1f4   :  { %v3474_v12 = vmax.f32 %v3472_v7, %v3473_v22  ;;  %v3429_v8 = vsel %vm3421_vm7, %v6380_v48, -1e+30  ;;  %v3464_v36 = vmax.f32 %v3462_v16, %v3463_v53  ;;  %v3469_v15 = vmax.f32 %v3467_v30, %v3468_v6  ;;  %v5638_v7 = vld [vmem:[#allocation2] sm:$0x1] }
 0x1f5   :  { %v3479_v17 = vsel %vm8346_vm2, %v3429_v8, -inf  ;;  %v64_v33 = vcvt.s32.f32 %v5638_v7  ;;  %v66_v53 = vcvt.s32.f32 %v5639_v19 }
 0x1f6   :  { %v3475_v24 = vrot.slane %v3474_v12, 2  ;;  %v3480_v32 = vrot.slane %v3479_v17, 4  ;;  %v3498_v25 = vsel %vm8346_vm2, %v3464_v36, 0.0  ;;  %v3470_v41 = vrot.slane %v3469_v15, 1 }
 0x1f7   :  { %3496 = vadd.xlane.f32.xlu0 %v3495_v62  ;;  %3499 = vadd.xlane.f32.xlu1 %v3498_v25  ;;  %v72_v6 = vmax.f32 %v64_v33, 1.0  ;;  %v74_v36 = vmax.f32 %v66_v53, 1.0  ;;  %v5642_v62 = vld [vmem:[#allocation2 + $0x3] sm:$0x1] }
 0x1f8   :  { %v3481_v28 = vmax.f32 %v3479_v17, %v3480_v32  ;;  %v3471_v56 = vmax.f32 %v3469_v15, %v3470_v41  ;;  %v3476_v26 = vmax.f32 %v3474_v12, %v3475_v24  ;;  %v5640_v12 = vld [vmem:[#allocation2 + $0x1] sm:$0x1]  ;;  %v5641_v15 = vld [vmem:[#allocation2 + $0x4] sm:$0x1]  ;;  %v67_v24 = vcvt.s32.f32 %v5642_v62  ;;  %v5643_v41 = vld [vmem:[#allocation2 + $0x6] sm:$0x1] }
 0x1f9   :  { %v65_v8 = vcvt.s32.f32 %v5640_v12  ;;  %5622 = vrcp.f32 %v72_v6  ;;  %v68_v17 = vcvt.s32.f32 %v5641_v15  ;;  %v8534_v62 = vld [vmem:[#allocation29_spill] sm:$0xff] }
 0x1fa   :  { %v3501_v60 = vsel %vm8346_vm2, %v3471_v56, 0.0  ;;  %v3477_v61 = vrot.slane %v3476_v26, 1  ;;  %v3482_v48 = vrot.slane %v3481_v28, 2  ;;  %5624 = vrcp.f32 %v74_v36 }
 0x1fb   :  { %3502 = vadd.xlane.f32.xlu0 %v3501_v60  ;;  %v73_v32 = vmax.f32 %v65_v8, 1.0  ;;  %v76_v25 = vmax.f32 %v68_v17, 1.0  ;;  %v75_v56 = vmax.f32 %v67_v24, 1.0  ;;  %v8533_v17 = vld [vmem:[#allocation35_spill] sm:$0xff]  ;;  %v8537_v24 = vld [vmem:[#allocation36_spill] sm:$0xff] }
 0x1fc   :  { %v3478_v3 = vmax.f32 %v3476_v26, %v3477_v61  ;;  %v3483_v30 = vmax.f32 %v3481_v28, %v3482_v48  ;;  %v70_v28 = vcvt.s32.f32 %v5643_v41  ;;  %v5644_v26 = vld [vmem:[#allocation2 + $0x5] sm:$0x1] }
 0x1fd   :  { %v69_v60 = vcvt.s32.f32 %v5644_v26  ;;  %5626 = vrcp.f32 %v73_v32  ;;  %v8538_v32 = vld [vmem:[#allocation33_spill] sm:$0xff] }
 0x1fe   :  { %v3504_v27 = vsel %vm8346_vm2, %v3478_v3, 0.0  ;;  %v3484_v16 = vrot.slane %v3483_v30, 1  ;;  %5628 = vrcp.f32 %v76_v25  ;;  %v78_v61 = vmax.f32 %v70_v28, 1.0  ;;  %v5645_v3 = vld [vmem:[#allocation2 + $0x7] sm:$0x1] }
 0x1ff   :  { %3505 = vadd.xlane.f32.xlu1 %v3504_v27  ;;  %5630 = vrcp.f32 %v75_v56  ;;  %v77_v48 = vmax.f32 %v69_v60, 1.0  ;;  %v8530_v27 = vld [vmem:[#allocation27_spill] sm:$0xff] }
 0x200   :  { %v3485_v39 = vmax.f32 %v3483_v30, %v3484_v16  ;;  %v71_v30 = vcvt.s32.f32 %v5645_v3  ;;  %5632 = vrcp.f32 %v78_v61 }
 0x201   :  { %5634 = vrcp.f32 %v77_v48 }
 0x202   :  { %v3507_v22 = vsel %vm8346_vm2, %v3485_v39, 0.0  ;;  %v79_v33 = vmax.f32 %v71_v30, 1.0 }
 0x203   :  { %3508 = vadd.xlane.f32.xlu0 %v3507_v22  ;;  %v6729_v16 = vpop.eup %5622 }
 0x204   :  { %v3262_v7 = vmul.f32 %v6729_v16, %v6673_v10  ;;  %v6734_v39 = vpop.eup %5624  ;;  %5636 = vrcp.f32 %v79_v33 }
 0x205   :  { %v3264_v19 = vmul.f32 %v6734_v39, %v6675_v49 }
 0x207   :  { %v6736_v22 = vpop.eup %5626 }
 0x208   :  { %v3263_v53 = vmul.f32 %v6736_v22, %v6671_v23  ;;  %v6743_v6 = vpop.eup %5628 }
 0x209   :  { %v6746_v10 = vpop.eup %5630  ;;  %v3266_v12 = vmul.f32 %v6743_v6, %v6679_v57 }
 0x20a   :  { %v3265_v8 = vmul.f32 %v6746_v10, %v6677_v13  ;;  %v6753_v49 = vpop.eup %5632 }
 0x20b   :  { %v6756_v23 = vpop.eup %5634  ;;  %v3268_v36 = vmul.f32 %v6753_v49, %v6683_v5  ;;  %v8535_v5 = vld [vmem:[#allocation34_spill] sm:$0xff] }
 0x20c   :  { %8531 = vst [vmem:[#allocation27_spill] sm:$0xff] %v6756_v23  ;;  %v3267_v15 = vmul.f32 %v6756_v23, %v6681_v1  ;;  %v8536_v1 = vld [vmem:[#allocation31_spill] sm:$0xff] }
 0x20e   :  { %v6764_v57 = vpop.eup %5636 }
 0x20f   :  { %8532 = vst [vmem:[#allocation103_spill] sm:$0xff] %v6764_v57  ;;  %v3269_v13 = vmul.f32 %v6764_v57, %v6685_v4  ;;  %v8539_v4 = vld [vmem:[#allocation37_spill] sm:$0xff] }
 0x210   :  { %3510 = vrot.lane.b32.xlu1 %v8530_v27, %s5756_s22 }
 0x214   :  { %3278 = vrot.lane.b32.xlu1 %v3262_v7, %s5754_s2 }
 0x218   :  { %3282 = vrot.lane.b32.xlu1 %v3264_v19, %s5754_s2 }
 0x219   :  { %3280 = vrot.lane.b32.xlu0 %v3263_v53, %s5754_s2 }
 0x21c   :  { %3286 = vrot.lane.b32.xlu1 %v3266_v12, %s5754_s2 }
 0x21d   :  { %3284 = vrot.lane.b32.xlu0 %v3265_v8, %s5754_s2 }
 0x220   :  { %3290 = vrot.lane.b32.xlu1 %v3268_v36, %s5754_s2  ;;  %v8540_v36 = vld [vmem:[#allocation42_spill] sm:$0xff] }
 0x221   :  { %3288 = vrot.lane.b32.xlu0 %v3267_v15, %s5754_s2  ;;  %v210_v15 = vrot.slane %v8540_v36, %v6068_v18 }
 0x223   :  { %vm260_vm9 = vcmp.lt.s32.totalorder %v6271_v31, %v210_v15  ;;  %v8548_v15 = vld [vmem:[#allocation58_spill] sm:$0xff] }
 0x224   :  { %3514 = vrot.lane.b32.xlu1 %v8533_v17, %s5756_s22 }
 0x225   :  { %3292 = vrot.lane.b32.xlu0 %v3269_v13, %s5754_s2  ;;  %v3717_v13 = vsel %vm8346_vm2, %v6417_v55, -inf  ;;  %v8544_v55 = vld [vmem:[#allocation43_spill] sm:$0xff] }
 0x228   :  { %3516 = vrot.lane.b32.xlu1 %v8534_v62, %s5756_s22 }
 0x229   :  { %3512 = vrot.lane.b32.xlu0 %v8535_v5, %s5756_s22 }
 0x22c   :  { %3520 = vrot.lane.b32.xlu1 %v8536_v1, %s5756_s22 }
 0x22d   :  { %3518 = vrot.lane.b32.xlu0 %v8537_v24, %s5756_s22 }
 0x230   :  { %3524 = vrot.lane.b32.xlu1 %v8538_v32, %s5756_s22 }
 0x231   :  { %3522 = vrot.lane.b32.xlu0 %v8539_v4, %s5756_s22 }
 0x278   :  { %v3491_v25 = vpop.xlane.xlu1 %3490 }
 0x279   :  { %v3559_v41 = vmul.f32 %v6736_v22, %v3491_v25  ;;  %v8541_v25 = vld [vmem:[#allocation57_spill] sm:$0xff] }
 0x27b   :  { %3576 = vrot.lane.b32.xlu1 %v3559_v41, %s5756_s22  ;;  %v3710_v41 = vsel %vm8346_vm2, %v8541_v25, -inf }
 0x27c   :  { %v3488_v28 = vpop.xlane.xlu0 %3487 }
 0x27d   :  { %v3558_v56 = vmul.f32 %v6729_v16, %v3488_v28  ;;  %v3718_v28 = vrot.slane %v3717_v13, 4 }
 0x27f   :  { %3574 = vrot.lane.b32.xlu0 %v3558_v56, %s5756_s22  ;;  %v8542_v56 = vld [vmem:[#allocation39_spill] sm:$0xff] }
 0x280   :  { %v3494_v26 = vpop.xlane.xlu0 %3493 }
 0x281   :  { %v3560_v60 = vmul.f32 %v6734_v39, %v3494_v26  ;;  %v224_v26 = vrot.slane %v8542_v56, %v6068_v18 }
 0x283   :  { %3578 = vrot.lane.b32.xlu0 %v3560_v60, %s5756_s22  ;;  %v3724_v60 = vsel %vm8346_vm2, %v6427_v44, -inf  ;;  %vm6816_vm1 = vcmp.lt.s32.totalorder %v6271_v31, %v224_v26  ;;  %v8547_v44 = vld [vmem:[#allocation38_spill] sm:$0xff] }
 0x284   :  { %v3497_v61 = vpop.xlane.xlu0 %3496  ;;  %v3500_v48 = vpop.xlane.xlu1 %3499  ;;  %v217_v36 = vrot.slane %v8547_v44, %v6068_v18  ;;  %v3624_v25 = vsel %vm6816_vm1, %v8548_v15, -1e+30 }
 0x285   :  { %v3561_v3 = vmul.f32 %v6746_v10, %v3497_v61  ;;  %v3562_v30 = vmul.f32 %v6743_v6, %v3500_v48  ;;  %v3731_v61 = vsel %vm8346_vm2, %v6436_v52, -inf  ;;  %v8543_v48 = vld [vmem:[#allocation55_spill] sm:$0xff] }
 0x286   :  { %vm6845_vm10 = vcmp.lt.s32.totalorder %v6271_v31, %v217_v36 }
 0x287   :  { %3580 = vrot.lane.b32.xlu1 %v3561_v3, %s5756_s22  ;;  %3582 = vrot.lane.b32.xlu0 %v3562_v30, %s5756_s22  ;;  %v3622_v3 = vsel %vm260_vm9, %v8543_v48, -1e+30  ;;  %v3711_v30 = vrot.slane %v3710_v41, 4  ;;  %v3738_v48 = vsel %vm8346_vm2, %v6447_v43, -inf }
 0x288   :  { %v3503_v7 = vpop.xlane.xlu0 %3502 }
 0x289   :  { %v3563_v33 = vmul.f32 %v6756_v23, %v3503_v7  ;;  %v231_v7 = vrot.slane %v8544_v55, %v6068_v18  ;;  %v3712_v52 = vmax.f32 %v3710_v41, %v3711_v30  ;;  %v8552_v41 = vld [vmem:[#allocation44_spill] sm:$0xff] }
 0x28b   :  { %3584 = vrot.lane.b32.xlu1 %v3563_v33, %s5756_s22  ;;  %v3719_v33 = vmax.f32 %v3717_v13, %v3718_v28  ;;  %v3745_v13 = vsel %vm8346_vm2, %v6452_v20, -inf  ;;  %v8549_v28 = vld [vmem:[#allocation40_spill] sm:$0xff]  ;;  %vm6831_vm8 = vcmp.lt.s32.totalorder %v6271_v31, %v231_v7  ;;  %v3752_v20 = vsel %vm8346_vm2, %v6463_v47, -inf }
 0x28c   :  { %v3506_v19 = vpop.xlane.xlu1 %3505  ;;  %v238_v56 = vrot.slane %v8549_v28, %v6068_v18  ;;  %v3746_v44 = vrot.slane %v3745_v13, 4  ;;  %v3636_v7 = vsel %vm8346_vm2, %v3624_v25, -inf  ;;  %v3713_v15 = vrot.slane %v3712_v52, 2 }
 0x28d   :  { %v3564_v53 = vmul.f32 %v6753_v49, %v3506_v19  ;;  %v3725_v19 = vrot.slane %v3724_v60, 4  ;;  %v3720_v30 = vrot.slane %v3719_v33, 2  ;;  %v3625_v43 = vsel %vm6831_vm8, %v6429_v14, -1e+30 }
 0x28e   :  { %vm6860_vm12 = vcmp.lt.s32.totalorder %v6271_v31, %v238_v56  ;;  %v3753_v26 = vrot.slane %v3752_v20, 4  ;;  %v3747_v50 = vmax.f32 %v3745_v13, %v3746_v44  ;;  %v3714_v11 = vmax.f32 %v3712_v52, %v3713_v15 }
 0x28f   :  { %3586 = vrot.lane.b32.xlu0 %v3564_v53, %s5756_s22  ;;  %v3732_v53 = vrot.slane %v3731_v61, 4  ;;  %v3726_v55 = vmax.f32 %v3724_v60, %v3725_v19  ;;  %v3739_v60 = vrot.slane %v3738_v48, 4  ;;  %v8556_v19 = vld [vmem:[#allocation45_spill] sm:$0xff] }
 0x290   :  { %v3509_v12 = vpop.xlane.xlu0 %3508 }
 0x291   :  { %v3565_v8 = vmul.f32 %v6764_v57, %v3509_v12  ;;  %v3733_v12 = vmax.f32 %v3731_v61, %v3732_v53  ;;  %v8555_v61 = vld [vmem:[#allocation41_spill] sm:$0xff]  ;;  %v8557_v53 = vld [vmem:[#allocation56_spill] sm:$0xff]  ;;  %v3740_v28 = vmax.f32 %v3738_v48, %v3739_v60  ;;  %v3748_v48 = vrot.slane %v3747_v50, 2 }
 0x292   :  { %v252_v47 = vrot.slane %v8555_v61, %v6068_v18  ;;  %v3623_v25 = vsel %vm6845_vm10, %v8557_v53, -1e+30  ;;  %v3715_v60 = vrot.slane %v3714_v11, 1 }
 0x293   :  { %3588 = vrot.lane.b32.xlu1 %v3565_v8, %s5756_s22  ;;  %v3630_v8 = vsel %vm8346_vm2, %v3622_v3, -inf  ;;  %v245_v3 = vrot.slane %v8552_v41, %v6068_v18  ;;  %v3727_v41 = vrot.slane %v3726_v55, 2  ;;  %v3734_v61 = vrot.slane %v3733_v12, 2 }
 0x294   :  { %v3633_v53 = vsel %vm8346_vm2, %v3623_v25, -inf  ;;  %vm6883_vm9 = vcmp.lt.s32.totalorder %v6271_v31, %v252_v47  ;;  %v3741_v15 = vrot.slane %v3740_v28, 2  ;;  %v3749_v36 = vmax.f32 %v3747_v50, %v3748_v48 }
 0x295   :  { %vm6865_vm11 = vcmp.lt.s32.totalorder %v6271_v31, %v245_v3  ;;  %v3626_v3 = vsel %vm6860_vm12, %v6438_v0, -1e+30  ;;  %v3735_v44 = vmax.f32 %v3733_v12, %v3734_v61  ;;  %v3728_v47 = vmax.f32 %v3726_v55, %v3727_v41 }
 0x296   :  { %v3627_v56 = vsel %vm6865_vm11, %v6440_v40, -1e+30  ;;  %v3754_v40 = vmax.f32 %v3752_v20, %v3753_v26  ;;  %v3628_v20 = vsel %vm6883_vm9, %v6455_v29, -1e+30  ;;  %v3716_v14 = vmax.f32 %v3714_v11, %v3715_v60 }
 0x297   :  { %v3645_v0 = vsel %vm8346_vm2, %v3627_v56, -inf  ;;  %v3736_v25 = vrot.slane %v3735_v44, 1  ;;  %v3648_v12 = vsel %vm8346_vm2, %v3628_v20, -inf  ;;  %v3729_v26 = vrot.slane %v3728_v47, 1 }
 0x298   :  { %v3750_v61 = vrot.slane %v3749_v36, 1 }
 0x299   :  { %v3737_v41 = vmax.f32 %v3735_v44, %v3736_v25  ;;  %v3730_v56 = vmax.f32 %v3728_v47, %v3729_v26 }
 0x29b   :  { %v3775_v50 = vsel %vm8346_vm2, %v3737_v41, 0.0  ;;  %v3772_v11 = vsel %vm8346_vm2, %v3730_v56, 0.0 }
 0x2ae   :  { %3631 = vmax.xlane.f32.xlu0 %v3630_v8  ;;  %v3759_v8 = vsel %vm8346_vm2, %v6469_v38, -inf  ;;  %v259_v38 = vrot.slane %v8556_v19, %v6068_v18  ;;  %v3639_v19 = vsel %vm8346_vm2, %v3625_v43, -inf  ;;  %v3721_v18 = vmax.f32 %v3719_v33, %v3720_v30 }
 0x2af   :  { %v3642_v43 = vsel %vm8346_vm2, %v3626_v3, -inf  ;;  %v3751_v3 = vmax.f32 %v3749_v36, %v3750_v61 }
 0x2b0   :  { %vm6878_vm7 = vcmp.lt.s32.totalorder %v6271_v31, %v259_v38  ;;  %v3722_v30 = vrot.slane %v3721_v18, 1  ;;  %v3755_v38 = vrot.slane %v3754_v40, 2 }
 0x2b1   :  { %v3629_v52 = vsel %vm6878_vm7, %v6457_v34, -1e+30  ;;  %v3781_v48 = vsel %vm8346_vm2, %v3751_v3, 0.0 }
 0x2b2   :  { %3637 = vmax.xlane.f32.xlu0 %v3636_v7  ;;  %v3760_v7 = vrot.slane %v3759_v8, 4  ;;  %v3651_v34 = vsel %vm8346_vm2, %v3629_v52, -inf }
 0x2b4   :  { %v3761_v13 = vmax.f32 %v3759_v8, %v3760_v7  ;;  %v3723_v8 = vmax.f32 %v3721_v18, %v3722_v30  ;;  %v3742_v7 = vmax.f32 %v3740_v28, %v3741_v15  ;;  %v3756_v18 = vmax.f32 %v3754_v40, %v3755_v38 }
 0x2b5   :  { %v8317_v38 = vmov 3  }
 0x2b6   :  { %3640 = vmax.xlane.f32.xlu0 %v3639_v19  ;;  %v3762_v9 = vrot.slane %v3761_v13, 2  ;;  %v3769_v55 = vsel %vm8346_vm2, %v3723_v8, 0.0  ;;  %v3766_v19 = vsel %vm8346_vm2, %v3716_v14, 0.0  ;;  %v3757_v52 = vrot.slane %v3756_v18, 1 }
 0x2b7   :  { %3634 = vmax.xlane.f32.xlu1 %v3633_v53  ;;  %v3743_v53 = vrot.slane %v3742_v7, 1  ;;  %5617 = vset.pattern.permute.xlu0 %v8317_v38 }
 0x2b8   :  { %v3763_v29 = vmax.f32 %v3761_v13, %v3762_v9  ;;  %v3758_v30 = vmax.f32 %v3756_v18, %v3757_v52 }
 0x2b9   :  { %v3744_v28 = vmax.f32 %v3742_v7, %v3743_v53 }
 0x2ba   :  { %3646 = vmax.xlane.f32.xlu0 %v3645_v0  ;;  %v3764_v33 = vrot.slane %v3763_v29, 1  ;;  %v3784_v44 = vsel %vm8346_vm2, %v3758_v30, 0.0 }
 0x2bb   :  { %3643 = vmax.xlane.f32.xlu1 %v3642_v43  ;;  %v3778_v0 = vsel %vm8346_vm2, %v3744_v28, 0.0  ;;  %v8318_v43 = vmov 2  }
 0x2bc   :  { %v3765_v13 = vmax.f32 %v3763_v29, %v3764_v33  ;;  %5615 = vset.pattern.permute.xlu1 %v8318_v43 }
 0x2be   :  { %3652 = vmax.xlane.f32.xlu0 %v3651_v34  ;;  %v3787_v40 = vsel %vm8346_vm2, %v3765_v13, 0.0 }
 0x2bf   :  { %3649 = vmax.xlane.f32.xlu1 %v3648_v12 }
 0x2c2   :  { %3770 = vadd.xlane.f32.xlu0 %v3769_v55 }
 0x2c3   :  { %3767 = vadd.xlane.f32.xlu1 %v3766_v19 }
 0x2c6   :  { %3776 = vadd.xlane.f32.xlu0 %v3775_v50 }
 0x2c7   :  { %3773 = vadd.xlane.f32.xlu1 %v3772_v11 }
 0x2ca   :  { %3782 = vadd.xlane.f32.xlu0 %v3781_v48 }
 0x2cb   :  { %3779 = vadd.xlane.f32.xlu1 %v3778_v0 }
 0x2ce   :  { %3788 = vadd.xlane.f32.xlu0 %v3787_v40 }
 0x2cf   :  { %3785 = vadd.xlane.f32.xlu1 %v3784_v44 }
 0x2e0   :  { %3790 = vrot.lane.b32.xlu1 %v8530_v27, %s5757_s23  ;;  %v6921_v27 = vpop.permute.xlu1 %3510 }
 0x2e1   :  { %8566 = vst [vmem:[#allocation35_spill] sm:$0xff] %v6921_v27 }
 0x2e4   :  { %3792 = vrot.lane.b32.xlu0 %v8535_v5, %s5757_s23  ;;  %3794 = vrot.lane.b32.xlu1 %v8533_v17, %s5757_s23  ;;  %v6923_v5 = vpop.permute.xlu0 %3280  ;;  %v6925_v17 = vpop.permute.xlu1 %3278 }
 0x2e5   :  { %8567 = vst [vmem:[#allocation29_spill] sm:$0xff] %v6923_v5  ;;  %8568 = vst [vmem:[#allocation34_spill] sm:$0xff] %v6925_v17 }
 0x2e8   :  { %3798 = vrot.lane.b32.xlu0 %v8537_v24, %s5757_s23  ;;  %3796 = vrot.lane.b32.xlu1 %v8534_v62, %s5757_s23  ;;  %v6927_v15 = vpop.permute.xlu0 %3284  ;;  %v6929_v24 = vpop.permute.xlu1 %3282 }
 0x2e9   :  { %8569 = vst [vmem:[#allocation31_spill] sm:$0xff] %v6927_v15  ;;  %8570 = vst [vmem:[#allocation36_spill] sm:$0xff] %v6929_v24  ;;  %v8604_v15 = vld [vmem:[#allocation24_spill] sm:$0xff] }
 0x2ec   :  { %3802 = vrot.lane.b32.xlu0 %v8539_v4, %s5757_s23  ;;  %3800 = vrot.lane.b32.xlu1 %v8536_v1, %s5757_s23  ;;  %v6931_v62 = vpop.permute.xlu0 %3288  ;;  %v6934_v4 = vpop.permute.xlu1 %3286 }
 0x2ed   :  { %8571 = vst [vmem:[#allocation33_spill] sm:$0xff] %v6931_v62  ;;  %8572 = vst [vmem:[#allocation37_spill] sm:$0xff] %v6934_v4  ;;  %v8602_v62 = vld [vmem:[#allocation25_spill] sm:$0xff]  ;;  %v8609_v4 = vmov 3  }
 0x2f0   :  { %3804 = vrot.lane.b32.xlu1 %v8538_v32, %s5757_s23  ;;  %v6936_v1 = vpop.permute.xlu0 %3292  ;;  %v6938_v32 = vpop.permute.xlu1 %3290 }
 0x2f1   :  { %8573 = vst [vmem:[#allocation42_spill] sm:$0xff] %v6936_v1  ;;  %8574 = vst [vmem:[#allocation57_spill] sm:$0xff] %v6938_v32  ;;  %v8603_v32 = vld [vmem:[#allocation23_spill] sm:$0xff] }
 0x2f4   :  { %v6940_v60 = vpop.permute.xlu0 %3512  ;;  %v6942_v47 = vpop.permute.xlu1 %3514 }
 0x2f5   :  { %8575 = vst [vmem:[#allocation39_spill] sm:$0xff] %v6940_v60  ;;  %8576 = vst [vmem:[#allocation55_spill] sm:$0xff] %v6942_v47 }
 0x2f8   :  { %v6944_v20 = vpop.permute.xlu0 %3518  ;;  %v6947_v9 = vpop.permute.xlu1 %3516 }
 0x2f9   :  { %8577 = vst [vmem:[#allocation43_spill] sm:$0xff] %v6944_v20  ;;  %8578 = vst [vmem:[#allocation38_spill] sm:$0xff] %v6947_v9  ;;  %v8650_v20 = vld [vmem:[#allocation66_spill] sm:$0xff] }
 0x2fc   :  { %v6949_v34 = vpop.permute.xlu0 %3522  ;;  %v6953_v25 = vpop.permute.xlu1 %3520 }
 0x2fd   :  { %8579 = vst [vmem:[#allocation58_spill] sm:$0xff] %v6949_v34  ;;  %8581 = vst [vmem:[#allocation44_spill] sm:$0xff] %v6953_v25 }
 0x300   :  { %v6951_v8 = vpop.permute.xlu0 %3574  ;;  %v6957_v12 = vpop.permute.xlu1 %3524 }
 0x301   :  { %8580 = vst [vmem:[#allocation40_spill] sm:$0xff] %v6951_v8  ;;  %8583 = vst [vmem:[#allocation45_spill] sm:$0xff] %v6957_v12  ;;  %v8639_v8 = vld [vmem:[#allocation74_spill] sm:$0xff] }
 0x304   :  { %v6955_v36 = vpop.permute.xlu0 %3578  ;;  %v6959_v14 = vpop.permute.xlu1 %3576 }
 0x305   :  { %8582 = vst [vmem:[#allocation41_spill] sm:$0xff] %v6955_v36  ;;  %8584 = vst [vmem:[#allocation56_spill] sm:$0xff] %v6959_v14 }
 0x308   :  { %v6961_v26 = vpop.permute.xlu0 %3582  ;;  %v6963_v7 = vpop.permute.xlu1 %3580 }
 0x309   :  { %8585 = vst [vmem:[#allocation104_spill] sm:$0xff] %v6961_v26  ;;  %8586 = vst [vmem:[#allocation105_spill] sm:$0xff] %v6963_v7  ;;  %v8638_v7 = vld [vmem:[#allocation73_spill] sm:$0xff] }
 0x30c   :  { %v6965_v55 = vpop.permute.xlu0 %3586  ;;  %v6969_v61 = vpop.permute.xlu1 %3584 }
 0x30d   :  { %8587 = vst [vmem:[#allocation106_spill] sm:$0xff] %v6965_v55  ;;  %8589 = vst [vmem:[#allocation108_spill] sm:$0xff] %v6969_v61 }
 0x310   :  { %v6973_v19 = vpop.permute.xlu1 %3588 }
 0x311   :  { %8591 = vst [vmem:[#allocation110_spill] sm:$0xff] %v6973_v19 }
 0x33b   :  { %v6967_v41 = vpop.xlane.xlu0 %3631 }
 0x33c   :  { %8588 = vst [vmem:[#allocation107_spill] sm:$0xff] %v6967_v41 }
 0x33f   :  { %v6971_v29 = vpop.xlane.xlu0 %3637 }
 0x340   :  { %8590 = vst [vmem:[#allocation109_spill] sm:$0xff] %v6971_v29 }
 0x343   :  { %v6975_v56 = vpop.xlane.xlu0 %3640 }
 0x344   :  { %8592 = vst [vmem:[#allocation111_spill] sm:$0xff] %v6975_v56  ;;  %v6977_v53 = vpop.xlane.xlu1 %3634 }
 0x345   :  { %8593 = vst [vmem:[#allocation112_spill] sm:$0xff] %v6977_v53 }
 0x347   :  { %v6979_v18 = vpop.xlane.xlu0 %3646 }
 0x348   :  { %8594 = vst [vmem:[#allocation113_spill] sm:$0xff] %v6979_v18  ;;  %v6981_v50 = vpop.xlane.xlu1 %3643 }
 0x349   :  { %8595 = vst [vmem:[#allocation114_spill] sm:$0xff] %v6981_v50 }
 0x34b   :  { %v6983_v3 = vpop.xlane.xlu0 %3652 }
 0x34c   :  { %8596 = vst [vmem:[#allocation115_spill] sm:$0xff] %v6983_v3  ;;  %v6985_v33 = vpop.xlane.xlu1 %3649 }
 0x34d   :  { %8597 = vst [vmem:[#allocation116_spill] sm:$0xff] %v6985_v33 }
 0x34f   :  { %v3771_v11 = vpop.xlane.xlu0 %3770 }
 0x350   :  { %v3839_v28 = vmul.f32 %v6736_v22, %v3771_v11  ;;  %v3768_v52 = vpop.xlane.xlu1 %3767 }
 0x351   :  { %v3838_v48 = vmul.f32 %v6729_v16, %v3768_v52 }
 0x352   :  { %3856 = vrot.lane.b32.xlu1 %v3839_v28, %s5757_s23 }
 0x353   :  { %v3777_v13 = vpop.xlane.xlu0 %3776  ;;  %3854 = vrot.lane.b32.xlu0 %v3838_v48, %s5757_s23 }
 0x354   :  { %v3841_v0 = vmul.f32 %v6746_v10, %v3777_v13  ;;  %v3774_v30 = vpop.xlane.xlu1 %3773 }
 0x355   :  { %v3840_v40 = vmul.f32 %v6734_v39, %v3774_v30 }
 0x356   :  { %3860 = vrot.lane.b32.xlu1 %v3841_v0, %s5757_s23  ;;  %v3902_v0 = vsel %vm6474_vm13, %v6491_v58, -1e+30 }
 0x357   :  { %v3783_v44 = vpop.xlane.xlu0 %3782  ;;  %3858 = vrot.lane.b32.xlu0 %v3840_v40, %s5757_s23  ;;  %v3903_v40 = vsel %vm6485_vm14, %v6499_v37, -1e+30 }
 0x358   :  { %v3843_v11 = vmul.f32 %v6756_v23, %v3783_v44  ;;  %v3780_v38 = vpop.xlane.xlu1 %3779  ;;  %v3904_v44 = vsel %vm6503_vm15, %v6525_v45, -1e+30 }
 0x359   :  { %v3842_v52 = vmul.f32 %v6743_v6, %v3780_v38  ;;  %v3910_v38 = vsel %vm8346_vm2, %v3902_v0, -inf  ;;  %v3907_v0 = vsel %vm6555_vm3, %v6571_v2, -1e+30 }
 0x35a   :  { %3864 = vrot.lane.b32.xlu1 %v3843_v11, %s5757_s23  ;;  %v3913_v11 = vsel %vm8346_vm2, %v3903_v40, -inf  ;;  %v3925_v1 = vsel %vm8346_vm2, %v3907_v0, -inf  ;;  %v8607_v0 = vmov 2  }
 0x35b   :  { %v3789_v28 = vpop.xlane.xlu0 %3788  ;;  %3862 = vrot.lane.b32.xlu0 %v3842_v52, %s5757_s23  ;;  %v3916_v52 = vsel %vm8346_vm2, %v3904_v44, -inf }
 0x35c   :  { %v3845_v48 = vmul.f32 %v6764_v57, %v3789_v28  ;;  %v3786_v13 = vpop.xlane.xlu1 %3785  ;;  %v3905_v28 = vsel %vm6519_vm0, %v6535_v42, -1e+30 }
 0x35d   :  { %v3844_v30 = vmul.f32 %v6753_v49, %v3786_v13 }
 0x35e   :  { %3868 = vrot.lane.b32.xlu1 %v3845_v48, %s5757_s23  ;;  %v3906_v48 = vsel %vm6540_vm4, %v6564_v21, -1e+30 }
 0x35f   :  { %3866 = vrot.lane.b32.xlu0 %v3844_v30, %s5757_s23  ;;  %v3922_v13 = vsel %vm8346_vm2, %v3906_v48, -inf  ;;  %v3919_v30 = vsel %vm8346_vm2, %v3905_v28, -inf }
 0x37e   :  { %3911 = vmax.xlane.f32.xlu0 %v3910_v38  ;;  %v8598_v38 = vld [vmem:[#allocation69_spill] sm:$0xff] }
 0x37f   :  { %v3908_v44 = vsel %vm6579_vm5, %v8598_v38, -1e+30 }
 0x380   :  { %v3928_v43 = vsel %vm8346_vm2, %v3908_v44, -inf  ;;  %v8608_v44 = vld [vmem:[#allocation22_spill] sm:$0xff] }
 0x382   :  { %3914 = vmax.xlane.f32.xlu1 %v3913_v11  ;;  %3917 = vmax.xlane.f32.xlu0 %v3916_v52  ;;  %v8600_v11 = vld [vmem:[#allocation70_spill] sm:$0xff] }
 0x383   :  { %v3909_v48 = vsel %vm6592_vm6, %v8600_v11, -1e+30 }
 0x384   :  { %v3931_v28 = vsel %vm8346_vm2, %v3909_v48, -inf  ;;  %v8612_v48 = vld [vmem:[#allocation32_spill] sm:$0xff] }
 0x386   :  { %3923 = vmax.xlane.f32.xlu1 %v3922_v13  ;;  %3920 = vmax.xlane.f32.xlu0 %v3919_v30  ;;  %v8605_v13 = vld [vmem:[#allocation28_spill] sm:$0xff]  ;;  %v8606_v30 = vld [vmem:[#allocation26_spill] sm:$0xff] }
 0x38a   :  { %3929 = vmax.xlane.f32.xlu1 %v3928_v43  ;;  %3926 = vmax.xlane.f32.xlu0 %v3925_v1  ;;  %v8610_v43 = vmov 0   ;;  %v8611_v1 = vld [vmem:[#allocation30_spill] sm:$0xff] }
 0x38e   :  { %3932 = vmax.xlane.f32.xlu0 %v3931_v28 }
 0x39b   :  { %3983 = vperm.xlu1 %5615, %v8602_v62  }
 0x39f   :  { %3989 = vperm.xlu1 %5615, %v8603_v32  }
 0x3a3   :  { %3992 = vperm.xlu1 %5615, %v8604_v15  }
 0x3a4   :  { %4262 = vperm.xlu0 %5617, %v8605_v13  }
 0x3a7   :  { %3995 = vperm.xlu1 %5615, %v8606_v30  }
 0x3a8   :  { %5618 = vset.pattern.permute.xlu0 %v8607_v0 }
 0x3a9   :  { %3986 = vperm.xlu0 %5618, %v8608_v44  }
 0x3ab   :  { %5616 = vset.pattern.permute.xlu1 %v8609_v4 }
 0x3ac   :  { %4247 = vperm.xlu1 %5616, %v8602_v62   ;;  %v7056_v62 = vpop.permute.xlu1 %3790 }
 0x3ad   :  { %3998 = vperm.xlu0 %5618, %v8605_v13   ;;  %8613 = vst [vmem:[#allocation69_spill] sm:$0xff] %v7056_v62  ;;  %v8642_v62 = vld [vmem:[#allocation76_spill] sm:$0xff] }
 0x3b0   :  { %4250 = vperm.xlu1 %5616, %v8608_v44   ;;  %v7058_v4 = vpop.permute.xlu1 %3794 }
 0x3b1   :  { %5620 = vset.pattern.permute.xlu0 %v8610_v43  ;;  %8614 = vst [vmem:[#allocation65_spill] sm:$0xff] %v7058_v4 }
 0x3b4   :  { %4253 = vperm.xlu1 %5616, %v8603_v32   ;;  %v7060_v32 = vpop.permute.xlu0 %3792 }
 0x3b5   :  { %8615 = vst [vmem:[#allocation70_spill] sm:$0xff] %v7060_v32  ;;  %v8641_v32 = vld [vmem:[#allocation72_spill] sm:$0xff] }
 0x3b8   :  { %4256 = vperm.xlu1 %5616, %v8604_v15   ;;  %v7062_v15 = vpop.permute.xlu1 %3796  ;;  %v7064_v28 = vpop.permute.xlu0 %3798 }
 0x3b9   :  { %8616 = vst [vmem:[#allocation67_spill] sm:$0xff] %v7062_v15  ;;  %8617 = vst [vmem:[#allocation25_spill] sm:$0xff] %v7064_v28  ;;  %v8640_v28 = vld [vmem:[#allocation75_spill] sm:$0xff] }
 0x3bc   :  { %4259 = vperm.xlu1 %5616, %v8606_v30   ;;  %v7066_v13 = vpop.permute.xlu1 %3800  ;;  %v7068_v30 = vpop.permute.xlu0 %3802 }
 0x3bd   :  { %8618 = vst [vmem:[#allocation23_spill] sm:$0xff] %v7066_v13  ;;  %8619 = vst [vmem:[#allocation24_spill] sm:$0xff] %v7068_v30 }
 0x3c0   :  { %4265 = vperm.xlu1 %5616, %v8611_v1  }
 0x3c4   :  { %4268 = vperm.xlu1 %5616, %v8612_v48  }
 0x3c5   :  { %v7072_v44 = vpop.permute.xlu0 %3854 }
 0x3c6   :  { %8621 = vst [vmem:[#allocation26_spill] sm:$0xff] %v7072_v44 }
 0x3c8   :  { %5619 = vset.pattern.permute.xlu1 %v8607_v0  ;;  %v7070_v0 = vpop.permute.xlu1 %3804 }
 0x3c9   :  { %4001 = vperm.xlu1 %5619, %v8611_v1   ;;  %8620 = vst [vmem:[#allocation28_spill] sm:$0xff] %v7070_v0 }
 0x3cc   :  { %v7074_v1 = vpop.permute.xlu1 %3856 }
 0x3cd   :  { %4004 = vperm.xlu1 %5619, %v8612_v48   ;;  %8622 = vst [vmem:[#allocation22_spill] sm:$0xff] %v7074_v1 }
 0x3d0   :  { %v7078_v48 = vpop.permute.xlu1 %3860 }
 0x3d1   :  { %5621 = vset.pattern.permute.xlu1 %v8610_v43  ;;  %v7076_v43 = vpop.permute.xlu0 %3858  ;;  %8624 = vst [vmem:[#allocation32_spill] sm:$0xff] %v7078_v48 }
 0x3d2   :  { %8623 = vst [vmem:[#allocation30_spill] sm:$0xff] %v7076_v43 }
 0x3d4   :  { %v7082_v5 = vpop.permute.xlu1 %3864 }
 0x3d5   :  { %v7080_v24 = vpop.permute.xlu0 %3862  ;;  %8626 = vst [vmem:[#allocation118_spill] sm:$0xff] %v7082_v5  ;;  %v8636_v5 = vld [vmem:[#allocation71_spill] sm:$0xff] }
 0x3d6   :  { %8625 = vst [vmem:[#allocation117_spill] sm:$0xff] %v7080_v24 }
 0x3d8   :  { %v7086_v3 = vpop.permute.xlu1 %3868 }
 0x3d9   :  { %v7084_v17 = vpop.permute.xlu0 %3866  ;;  %8628 = vst [vmem:[#allocation120_spill] sm:$0xff] %v7086_v3 }
 0x3da   :  { %8627 = vst [vmem:[#allocation119_spill] sm:$0xff] %v7084_v17 }
 0x40b   :  { %v7088_v18 = vpop.xlane.xlu0 %3911 }
 0x40c   :  { %8629 = vst [vmem:[#allocation121_spill] sm:$0xff] %v7088_v18 }
 0x40f   :  { %v7090_v53 = vpop.xlane.xlu0 %3917  ;;  %v7092_v56 = vpop.xlane.xlu1 %3914 }
 0x410   :  { %8630 = vst [vmem:[#allocation122_spill] sm:$0xff] %v7090_v53  ;;  %8631 = vst [vmem:[#allocation123_spill] sm:$0xff] %v7092_v56 }
 0x413   :  { %v7094_v44 = vpop.xlane.xlu0 %3920  ;;  %v7096_v1 = vpop.xlane.xlu1 %3923 }
 0x414   :  { %8632 = vst [vmem:[#allocation124_spill] sm:$0xff] %v7094_v44  ;;  %8633 = vst [vmem:[#allocation125_spill] sm:$0xff] %v7096_v1 }
 0x417   :  { %v7098_v43 = vpop.xlane.xlu1 %3929  ;;  %v7100_v48 = vpop.xlane.xlu0 %3926 }
 0x418   :  { %8634 = vst [vmem:[#allocation126_spill] sm:$0xff] %v7098_v43  ;;  %8635 = vst [vmem:[#allocation127_spill] sm:$0xff] %v7100_v48 }
 0x41b   :  { %v3984_v24 = vpop.permute.xlu1 %3983  ;;  %v7107_v33 = vpop.xlane.xlu0 %3932 }
 0x41c   :  { %vm4006_vm1 = vcmp.eq.s32.totalorder %v3984_v24, 1  ;;  %8637 = vst [vmem:[#allocation71_spill] sm:$0xff] %v7107_v33 }
 0x41d   :  { %v4014_v17 = vsel %vm4006_vm1, %v6491_v58, -1e+30  ;;  %v7104_v3 = vsel %vm4006_vm1, %v8636_v5, -1e+30 }
 0x41e   :  { %v4022_v41 = vsel %vm8346_vm2, %v4014_v17, -inf }
 0x41f   :  { %v4023_v50 = vrot.slane %v4022_v41, 4  ;;  %v3990_v19 = vpop.permute.xlu1 %3989 }
 0x420   :  { %vm4008_vm8 = vcmp.eq.s32.totalorder %v3990_v19, 1 }
 0x421   :  { %v4024_v61 = vmax.f32 %v4022_v41, %v4023_v50  ;;  %v4016_v55 = vsel %vm4008_vm8, %v6525_v45, -1e+30  ;;  %v7111_v26 = vsel %vm4008_vm8, %v8638_v7, -1e+30 }
 0x422   :  { %v4036_v36 = vsel %vm8346_vm2, %v4016_v55, -inf  ;;  %v4548_v51 = vsel %vm8346_vm2, %v7111_v26, -inf }
 0x423   :  { %v7113_v14 = vpop.permute.xlu0 %4262  ;;  %v3993_v24 = vpop.permute.xlu1 %3992  ;;  %v4025_v58 = vrot.slane %v4024_v61, 2  ;;  %v4037_v50 = vrot.slane %v4036_v36, 4 }
 0x424   :  { %vm4009_vm10 = vcmp.eq.s32.totalorder %v3993_v24, 1 }
 0x425   :  { %v4017_v17 = vsel %vm4009_vm10, %v6535_v42, -1e+30  ;;  %v7118_v0 = vsel %vm4009_vm10, %v8639_v8, -1e+30  ;;  %v4026_v13 = vmax.f32 %v4024_v61, %v4025_v58  ;;  %v4038_v29 = vmax.f32 %v4036_v36, %v4037_v50 }
 0x426   :  { %v4043_v19 = vsel %vm8346_vm2, %v4017_v17, -inf }
 0x427   :  { %v3996_v41 = vpop.permute.xlu1 %3995  ;;  %v4044_v30 = vrot.slane %v4043_v19, 4  ;;  %v4027_v61 = vrot.slane %v4026_v13, 1 }
 0x428   :  { %vm4010_vm12 = vcmp.eq.s32.totalorder %v3996_v41, 1  ;;  %v3987_v45 = vpop.permute.xlu0 %3986 }
 0x429   :  { %v4018_v15 = vsel %vm4010_vm12, %v6564_v21, -1e+30  ;;  %v7123_v24 = vsel %vm4010_vm12, %v8640_v28, -1e+30  ;;  %vm4007_vm11 = vcmp.eq.s32.totalorder %v3987_v45, 1  ;;  %v4045_v58 = vmax.f32 %v4043_v19, %v4044_v30 }
 0x42a   :  { %v4015_v42 = vsel %vm4007_vm11, %v6499_v37, -1e+30  ;;  %v7127_v33 = vsel %vm4007_vm11, %v8641_v32, -1e+30  ;;  %v4050_v48 = vsel %vm8346_vm2, %v4018_v15, -inf  ;;  %v4039_v45 = vrot.slane %v4038_v29, 2 }
 0x42b   :  { %v4248_v55 = vpop.permute.xlu1 %4247  ;;  %v4029_v41 = vsel %vm8346_vm2, %v4015_v42, -inf  ;;  %v4051_v4 = vrot.slane %v4050_v48, 4  ;;  %v4028_v25 = vmax.f32 %v4026_v13, %v4027_v61  ;;  %v4046_v15 = vrot.slane %v4045_v58, 2 }
 0x42c   :  { %v3999_v17 = vpop.permute.xlu0 %3998  ;;  %v4030_v44 = vrot.slane %v4029_v41, 4  ;;  %vm4270_vm9 = vcmp.eq.s32.totalorder %v4248_v55, 1 }
 0x42d   :  { %vm4011_vm7 = vcmp.eq.s32.totalorder %v3999_v17, 1  ;;  %v4078_v30 = vsel %vm8346_vm2, %v4028_v25, 0.0  ;;  %v4052_v17 = vmax.f32 %v4050_v48, %v4051_v4  ;;  %v4047_v53 = vmax.f32 %v4045_v58, %v4046_v15 }
 0x42e   :  { %v4019_v21 = vsel %vm4011_vm7, %v6571_v2, -1e+30  ;;  %v4031_v36 = vmax.f32 %v4029_v41, %v4030_v44  ;;  %v7134_v12 = vsel %vm4011_vm7, %v8642_v62, -1e+30  ;;  %4079 = vadd.xlane.f32.xlu0 %v4078_v30  ;;  %v4040_v2 = vmax.f32 %v4038_v29, %v4039_v45 }
 0x42f   :  { %v4251_v56 = vpop.permute.xlu1 %4250  ;;  %v4057_v37 = vsel %vm8346_vm2, %v4019_v21, -inf  ;;  %v4053_v18 = vrot.slane %v4052_v17, 2  ;;  %v4048_v27 = vrot.slane %v4047_v53, 1 }
 0x430   :  { %v4058_v50 = vrot.slane %v4057_v37, 4  ;;  %v4032_v43 = vrot.slane %v4031_v36, 2  ;;  %v4041_v1 = vrot.slane %v4040_v2, 1  ;;  %vm4271_vm1 = vcmp.eq.s32.totalorder %v4251_v56, 1 }
 0x431   :  { %v4054_v48 = vmax.f32 %v4052_v17, %v4053_v18  ;;  %v8645_v17 = vld [vmem:[#allocation61_spill] sm:$0xff] }
 0x432   :  { %v4059_v42 = vmax.f32 %v4057_v37, %v4058_v50  ;;  %v4033_v41 = vmax.f32 %v4031_v36, %v4032_v43  ;;  %v4042_v47 = vmax.f32 %v4040_v2, %v4041_v1  ;;  %v4049_v37 = vmax.f32 %v4047_v53, %v4048_v27  ;;  %v8643_v36 = vld [vmem:[#allocation59_spill] sm:$0xff] }
 0x433   :  { %v4254_v19 = vpop.permute.xlu1 %4253  ;;  %v8655_v35 = vsel %vm6503_vm15, %v8645_v17, -1e+30 }
 0x434   :  { %v4060_v9 = vrot.slane %v4059_v42, 2  ;;  %v4034_v28 = vrot.slane %v4033_v41, 1  ;;  %v4084_v61 = vsel %vm8346_vm2, %v4042_v47, 0.0  ;;  %v4087_v4 = vsel %vm8346_vm2, %v4049_v37, 0.0 }
 0x435   :  { %4085 = vadd.xlane.f32.xlu0 %v4084_v61  ;;  %v4278_v47 = vsel %vm4270_vm9, %v8643_v36, -1e+30  ;;  %vm4272_vm8 = vcmp.eq.s32.totalorder %v4254_v19, 1 }
 0x436   :  { %v4061_v21 = vmax.f32 %v4059_v42, %v4060_v9  ;;  %v4035_v25 = vmax.f32 %v4033_v41, %v4034_v28  ;;  %v4055_v9 = vrot.slane %v4054_v48, 1  ;;  %v4286_v18 = vsel %vm8346_vm2, %v4278_v47, -inf  ;;  %v8644_v28 = vld [vmem:[#allocation60_spill] sm:$0xff] }
 0x437   :  { %v4257_v44 = vpop.permute.xlu1 %4256  ;;  %v4279_v15 = vsel %vm4271_vm1, %v8644_v28, -1e+30  ;;  %v4287_v55 = vrot.slane %v4286_v18, 4  ;;  %v4280_v2 = vsel %vm4272_vm8, %v8645_v17, -1e+30  ;;  %vm4275_vm8 = vcmp.eq.s32.totalorder %v7113_v14, 1 }
 0x438   :  { %v4062_v13 = vrot.slane %v4061_v21, 1  ;;  %v4081_v58 = vsel %vm8346_vm2, %v4035_v25, 0.0  ;;  %v4056_v45 = vmax.f32 %v4054_v48, %v4055_v9  ;;  %v4293_v30 = vsel %vm8346_vm2, %v4279_v15, -inf }
 0x439   :  { %4082 = vadd.xlane.f32.xlu1 %v4081_v58  ;;  %4088 = vadd.xlane.f32.xlu0 %v4087_v4  ;;  %vm4273_vm12 = vcmp.eq.s32.totalorder %v4257_v44, 1  ;;  %v4294_v37 = vrot.slane %v4293_v30, 4  ;;  %v4300_v25 = vsel %vm8346_vm2, %v4280_v2, -inf  ;;  %v8648_v44 = vld [vmem:[#allocation78_spill] sm:$0xff]  ;;  %v4562_v17 = vsel %vm8346_vm2, %v7123_v24, -inf }
 0x43a   :  { %v4063_v29 = vmax.f32 %v4061_v21, %v4062_v13  ;;  %v4090_v27 = vsel %vm8346_vm2, %v4056_v45, 0.0  ;;  %v8646_v21 = vld [vmem:[#allocation77_spill] sm:$0xff]  ;;  %v4288_v13 = vmax.f32 %v4286_v18, %v4287_v55  ;;  %v4301_v45 = vrot.slane %v4300_v25, 4 }
 0x43b   :  { %v4260_v50 = vpop.permute.xlu1 %4259 }
 0x43c   :  { %v4093_v43 = vsel %vm8346_vm2, %v4063_v29, 0.0  ;;  %v8647_v29 = vld [vmem:[#allocation62_spill] sm:$0xff]  ;;  %vm4274_vm7 = vcmp.eq.s32.totalorder %v4260_v50, 1 }
 0x43d   :  { %4094 = vadd.xlane.f32.xlu0 %v4093_v43  ;;  %4091 = vadd.xlane.f32.xlu1 %v4090_v27  ;;  %v4281_v48 = vsel %vm4273_vm12, %v8647_v29, -1e+30  ;;  %v4295_v27 = vmax.f32 %v4293_v30, %v4294_v37  ;;  %v8656_v26 = vsel %vm6519_vm0, %v8647_v29, -1e+30 }
 0x43e   :  { %v4307_v18 = vsel %vm8346_vm2, %v4281_v48, -inf  ;;  %v4183_v46 = vsel %vm8346_vm2, %v8656_v26, -inf }
 0x43f   :  { %v4266_v1 = vpop.permute.xlu1 %4265 }
 0x440   :  { %vm4276_vm9 = vcmp.eq.s32.totalorder %v4266_v1, 1 }
 0x443   :  { %v4269_v53 = vpop.permute.xlu1 %4268 }
 0x444   :  { %vm4277_vm1 = vcmp.eq.s32.totalorder %v4269_v53, 1 }
 0x448   :  { %v4002_v42 = vpop.permute.xlu1 %4001 }
 0x449   :  { %vm4012_vm10 = vcmp.eq.s32.totalorder %v4002_v42, 1  ;;  %v8649_v42 = vld [vmem:[#allocation63_spill] sm:$0xff] }
 0x44a   :  { %v4020_v41 = vsel %vm4012_vm10, %v8598_v38, -1e+30  ;;  %v7149_v56 = vsel %vm4012_vm10, %v8646_v21, -1e+30  ;;  %v4289_v38 = vrot.slane %v4288_v13, 2  ;;  %v4296_v21 = vrot.slane %v4295_v27, 2 }
 0x44b   :  { %v4064_v61 = vsel %vm8346_vm2, %v4020_v41, -inf  ;;  %v4282_v2 = vsel %vm4274_vm7, %v8649_v42, -1e+30  ;;  %v8657_v63 = vsel %vm6540_vm4, %v8649_v42, -1e+30 }
 0x44c   :  { %v4065_v19 = vrot.slane %v4064_v61, 4  ;;  %v4005_v4 = vpop.permute.xlu1 %4004  ;;  %v4314_v50 = vsel %vm8346_vm2, %v4282_v2, -inf  ;;  %v4186_v29 = vsel %vm8346_vm2, %v8657_v63, -inf }
 0x44d   :  { %vm4013_vm11 = vcmp.eq.s32.totalorder %v4005_v4, 1  ;;  %v4315_v23 = vrot.slane %v4314_v50, 4 }
 0x44e   :  { %v4066_v58 = vmax.f32 %v4064_v61, %v4065_v19  ;;  %v4021_v9 = vsel %vm4013_vm11, %v8600_v11, -1e+30  ;;  %v7156_v43 = vsel %vm4013_vm11, %v8648_v44, -1e+30  ;;  %v4302_v61 = vmax.f32 %v4300_v25, %v4301_v45 }
 0x44f   :  { %v4071_v47 = vsel %vm8346_vm2, %v4021_v9, -inf  ;;  %v4308_v19 = vrot.slane %v4307_v18, 4  ;;  %v4290_v11 = vmax.f32 %v4288_v13, %v4289_v38  ;;  %v4284_v9 = vsel %vm4276_vm9, %v8650_v20, -1e+30  ;;  %v8651_v13 = vld [vmem:[#allocation68_spill] sm:$0xff] }
 0x450   :  { %v4067_v15 = vrot.slane %v4066_v58, 2  ;;  %v4072_v55 = vrot.slane %v4071_v47, 4  ;;  %v4303_v48 = vrot.slane %v4302_v61, 2  ;;  %v4297_v45 = vmax.f32 %v4295_v27, %v4296_v21 }
 0x451   :  { %v4309_v60 = vmax.f32 %v4307_v18, %v4308_v19  ;;  %v4291_v57 = vrot.slane %v4290_v11, 1  ;;  %v4328_v1 = vsel %vm8346_vm2, %v4284_v9, -inf  ;;  %v4285_v38 = vsel %vm4277_vm1, %v8651_v13, -1e+30 }
 0x452   :  { %v4073_v41 = vmax.f32 %v4071_v47, %v4072_v55  ;;  %v4068_v4 = vmax.f32 %v4066_v58, %v4067_v15  ;;  %v4304_v2 = vmax.f32 %v4302_v61, %v4303_v48  ;;  %v4298_v53 = vrot.slane %v4297_v45, 1 }
 0x453   :  { %v4310_v15 = vrot.slane %v4309_v60, 2  ;;  %v4292_v55 = vmax.f32 %v4290_v11, %v4291_v57 }
 0x454   :  { %v4074_v32 = vrot.slane %v4073_v41, 2  ;;  %v4069_v34 = vrot.slane %v4068_v4, 1  ;;  %v4305_v21 = vrot.slane %v4304_v2, 1 }
 0x455   :  { %v4311_v27 = vmax.f32 %v4309_v60, %v4310_v15 }
 0x456   :  { %v4070_v30 = vmax.f32 %v4068_v4, %v4069_v34  ;;  %v4075_v37 = vmax.f32 %v4073_v41, %v4074_v32  ;;  %v4316_v34 = vmax.f32 %v4314_v50, %v4315_v23  ;;  %v4329_v32 = vrot.slane %v4328_v1, 4 }
 0x457   :  { %v4335_v41 = vsel %vm8346_vm2, %v4285_v38, -inf  ;;  %v4342_v4 = vsel %vm8346_vm2, %v4292_v55, 0.0  ;;  %v4312_v57 = vrot.slane %v4311_v27, 1 }
 0x458   :  { %v4096_v58 = vsel %vm8346_vm2, %v4070_v30, 0.0  ;;  %v4076_v25 = vrot.slane %v4075_v37, 1  ;;  %v4317_v19 = vrot.slane %v4316_v34, 2  ;;  %v4330_v9 = vmax.f32 %v4328_v1, %v4329_v32 }
 0x459   :  { %4097 = vadd.xlane.f32.xlu1 %v4096_v58  ;;  %v4336_v30 = vrot.slane %v4335_v41, 4  ;;  %v4299_v58 = vmax.f32 %v4297_v45, %v4298_v53  ;;  %v4313_v38 = vmax.f32 %v4311_v27, %v4312_v57  ;;  %v8652_v27 = vld [vmem:[#allocation64_spill] sm:$0xff] }
 0x45a   :  { %v4077_v47 = vmax.f32 %v4075_v37, %v4076_v25  ;;  %v4306_v37 = vmax.f32 %v4304_v2, %v4305_v21  ;;  %v4331_v61 = vrot.slane %v4330_v9, 2  ;;  %v4318_v50 = vmax.f32 %v4316_v34, %v4317_v19 }
 0x45b   :  { %v4337_v23 = vmax.f32 %v4335_v41, %v4336_v30  ;;  %v4345_v11 = vsel %vm8346_vm2, %v4299_v58, 0.0  ;;  %v4351_v60 = vsel %vm8346_vm2, %v4313_v38, 0.0  ;;  %v4283_v19 = vsel %vm4275_vm8, %v8652_v27, -1e+30 }
 0x45c   :  { %v4099_v18 = vsel %vm8346_vm2, %v4077_v47, 0.0  ;;  %v4348_v48 = vsel %vm8346_vm2, %v4306_v37, 0.0  ;;  %v4319_v47 = vrot.slane %v4318_v50, 1  ;;  %v4332_v55 = vmax.f32 %v4330_v9, %v4331_v61 }
 0x45d   :  { %4100 = vadd.xlane.f32.xlu0 %v4099_v18  ;;  %v4338_v25 = vrot.slane %v4337_v23, 2  ;;  %v4321_v30 = vsel %vm8346_vm2, %v4283_v19, -inf  ;;  %v4541_v61 = vsel %vm8346_vm2, %v7127_v33, -inf  ;;  %v4569_v38 = vsel %vm8346_vm2, %v7134_v12, -inf }
 0x45e   :  { %v4320_v1 = vmax.f32 %v4318_v50, %v4319_v47  ;;  %v4333_v45 = vrot.slane %v4332_v55, 1  ;;  %v4322_v37 = vrot.slane %v4321_v30, 4  ;;  %v4555_v50 = vsel %vm8346_vm2, %v7118_v0, -inf }
 0x45f   :  { %v4339_v15 = vmax.f32 %v4337_v23, %v4338_v25  ;;  %v4534_v19 = vsel %vm8346_vm2, %v7104_v3, -inf }
 0x460   :  { %v4354_v2 = vsel %vm8346_vm2, %v4320_v1, 0.0  ;;  %v4334_v32 = vmax.f32 %v4332_v55, %v4333_v45  ;;  %v4323_v57 = vmax.f32 %v4321_v30, %v4322_v37  ;;  %v4570_v1 = vrot.slane %v4569_v38, 4 }
 0x461   :  { %4343 = vadd.xlane.f32.xlu0 %v4342_v4  ;;  %v4340_v18 = vrot.slane %v4339_v15, 1  ;;  %v4583_v45 = vsel %vm8346_vm2, %v7156_v43, -inf  ;;  %v8653_v43 = vsel %vm6485_vm14, %v8644_v28, -1e+30  ;;  %v8654_v30 = vsel %vm6474_vm13, %v8643_v36, -1e+30 }
 0x462   :  { %v4360_v34 = vsel %vm8346_vm2, %v4334_v32, 0.0  ;;  %v4324_v23 = vrot.slane %v4323_v57, 2  ;;  %v4584_v32 = vrot.slane %v4583_v45, 4  ;;  %v4535_v3 = vrot.slane %v4534_v19, 4 }
 0x463   :  { %v4341_v53 = vmax.f32 %v4339_v15, %v4340_v18  ;;  %v4180_v36 = vsel %vm8346_vm2, %v8655_v35, -inf }
 0x464   :  { %v4325_v14 = vmax.f32 %v4323_v57, %v4324_v23 }
 0x465   :  { %4346 = vadd.xlane.f32.xlu0 %v4345_v11  ;;  %v4363_v41 = vsel %vm8346_vm2, %v4341_v53, 0.0  ;;  %v4542_v11 = vrot.slane %v4541_v61, 4 }
 0x466   :  { %v4326_v47 = vrot.slane %v4325_v14, 1 }
 0x467   :  { %v4543_v25 = vmax.f32 %v4541_v61, %v4542_v11 }
 0x468   :  { %v4327_v15 = vmax.f32 %v4325_v14, %v4326_v47  ;;  %v4549_v47 = vrot.slane %v4548_v51, 4 }
 0x469   :  { %4349 = vadd.xlane.f32.xlu0 %v4348_v48  ;;  %v4556_v48 = vrot.slane %v4555_v50, 4 }
 0x46b   :  { %v4557_v55 = vmax.f32 %v4555_v50, %v4556_v48 }
 0x46d   :  { %4352 = vadd.xlane.f32.xlu0 %v4351_v60  ;;  %v4544_v60 = vrot.slane %v4543_v25, 2  ;;  %v4558_v33 = vrot.slane %v4557_v55, 2 }
 0x46f   :  { %v4545_v0 = vmax.f32 %v4543_v25, %v4544_v60 }
 0x471   :  { %4355 = vadd.xlane.f32.xlu0 %v4354_v2  ;;  %v4571_v2 = vmax.f32 %v4569_v38, %v4570_v1  ;;  %v4546_v12 = vrot.slane %v4545_v0, 1  ;;  %v4536_v38 = vmax.f32 %v4534_v19, %v4535_v3  ;;  %v8659_v19 = vsel %vm6579_vm5, %v8650_v20, -1e+30 }
 0x473   :  { %v4572_v53 = vrot.slane %v4571_v2, 2  ;;  %v4547_v57 = vmax.f32 %v4545_v0, %v4546_v12 }
 0x475   :  { %4361 = vadd.xlane.f32.xlu0 %v4360_v34  ;;  %v4357_v34 = vsel %vm8346_vm2, %v4327_v15, 0.0  ;;  %v4573_v23 = vmax.f32 %v4571_v2, %v4572_v53  ;;  %v4593_v28 = vsel %vm8346_vm2, %v4547_v57, 0.0  ;;  %v4550_v15 = vmax.f32 %v4548_v51, %v4549_v47 }
 0x476   :  { %v4576_v2 = vsel %vm8346_vm2, %v7149_v56, -inf }
 0x477   :  { %v4574_v14 = vrot.slane %v4573_v23, 1  ;;  %v4551_v59 = vrot.slane %v4550_v15, 2  ;;  %v4577_v42 = vrot.slane %v4576_v2, 4 }
 0x479   :  { %4364 = vadd.xlane.f32.xlu0 %v4363_v41  ;;  %v4585_v41 = vmax.f32 %v4583_v45, %v4584_v32  ;;  %v4575_v60 = vmax.f32 %v4573_v23, %v4574_v14  ;;  %v4537_v45 = vrot.slane %v4536_v38, 2 }
 0x47b   :  { %v4586_v37 = vrot.slane %v4585_v41, 2  ;;  %v4605_v24 = vsel %vm8346_vm2, %v4575_v60, 0.0  ;;  %v4538_v12 = vmax.f32 %v4536_v38, %v4537_v45 }
 0x47d   :  { %v4587_v48 = vmax.f32 %v4585_v41, %v4586_v37 }
 0x47f   :  { %v4588_v1 = vrot.slane %v4587_v48, 1 }
 0x481   :  { %v4589_v0 = vmax.f32 %v4587_v48, %v4588_v1 }
 0x4bb   :  { %v4080_v4 = vpop.xlane.xlu0 %4079 }
 0x4bc   :  { %v4118_v21 = vmul.f32 %v6729_v16, %v4080_v4  ;;  %v4559_v4 = vmax.f32 %v4557_v55, %v4558_v33  ;;  %v4563_v33 = vrot.slane %v4562_v17, 4 }
 0x4be   :  { %4134 = vrot.lane.b32.xlu1 %v4118_v21, %s5754_s2  ;;  %v4560_v61 = vrot.slane %v4559_v4, 1  ;;  %v4564_v41 = vmax.f32 %v4562_v17, %v4563_v33  ;;  %v8662_v33 = vld [vmem:[#allocation49_spill] sm:$0xff] }
 0x4c0   :  { %v4561_v50 = vmax.f32 %v4559_v4, %v4560_v61  ;;  %v4611_v4 = vsel %vm8346_vm2, %v4589_v0, 0.0  ;;  %v4565_v54 = vrot.slane %v4564_v41, 2 }
 0x4c2   :  { %v7190_v18 = vpop.xlane.xlu0 %4085  ;;  %v4599_v55 = vsel %vm8346_vm2, %v4561_v50, 0.0  ;;  %v4566_v3 = vmax.f32 %v4564_v41, %v4565_v54 }
 0x4c4   :  { %v4567_v35 = vrot.slane %v4566_v3, 1 }
 0x4c6   :  { %v4083_v9 = vpop.xlane.xlu1 %4082  ;;  %v7193_v21 = vpop.xlane.xlu0 %4088  ;;  %v4568_v52 = vmax.f32 %v4566_v3, %v4567_v35 }
 0x4c7   :  { %v4119_v58 = vmul.f32 %v6736_v22, %v4083_v9  ;;  %v4177_v9 = vsel %vm8346_vm2, %v8653_v43, -inf  ;;  %v4192_v43 = vsel %vm8346_vm2, %v8659_v19, -inf }
 0x4c9   :  { %4136 = vrot.lane.b32.xlu0 %v4119_v58, %s5754_s2  ;;  %v4174_v58 = vsel %vm8346_vm2, %v8654_v30, -inf  ;;  %v4552_v30 = vmax.f32 %v4550_v15, %v4551_v59  ;;  %v8661_v15 = vld [vmem:[#allocation21_spill] sm:$0xff] }
 0x4ca   :  { %v7207_v11 = vpop.xlane.xlu0 %4094  ;;  %v338_v63 = vrot.slane %v8662_v33, %v8661_v15  ;;  %v8665_v59 = vld [vmem:[#allocation53_spill] sm:$0xff]  ;;  %v7292_v54 = vpop.xlane.xlu1 %4091 }
 0x4cb   :  { %v4553_v23 = vrot.slane %v4552_v30, 1  ;;  %v373_v41 = vrot.slane %v8665_v59, %v8661_v15  ;;  %v8675_v59 = vld [vmem:[#allocation18_spill] sm:$0xff] }
 0x4cc   :  { %vm388_vm13 = vcmp.lt.s32.totalorder %v6271_v31, %v338_v63  ;;  %vm8676_vm12 = vcmp.gt.s32.totalorder %v8675_v59, 0 }
 0x4cd   :  { %v4554_v51 = vmax.f32 %v4552_v30, %v4553_v23  ;;  %vm393_vm0 = vcmp.lt.s32.totalorder %v6271_v31, %v373_v41  ;;  %v8677_v41 = vmov 0 }
 0x4cf   :  { %v4596_v50 = vsel %vm8346_vm2, %v4554_v51, 0.0 }
 0x4e2   :  { %4358 = vadd.xlane.f32.xlu1 %v4357_v34  ;;  %v8658_v34 = vsel %vm6555_vm3, %v8652_v27, -1e+30  ;;  %v4539_v27 = vrot.slane %v4538_v12, 1 }
 0x4e3   :  { %v4189_v53 = vsel %vm8346_vm2, %v8658_v34, -inf }
 0x4e4   :  { %v4540_v61 = vmax.f32 %v4538_v12, %v4539_v27 }
 0x4e6   :  { %4178 = vmax.xlane.f32.xlu1 %v4177_v9  ;;  %v4578_v9 = vmax.f32 %v4576_v2, %v4577_v42  ;;  %v4590_v20 = vsel %vm8346_vm2, %v4540_v61, 0.0  ;;  %v8668_v61 = vld [vmem:[#allocation103_spill] sm:$0xff] }
 0x4e8   :  { %4175 = vmax.xlane.f32.xlu0 %v4174_v58  ;;  %v8660_v58 = vsel %vm6592_vm6, %v8651_v13, -1e+30  ;;  %v4579_v57 = vrot.slane %v4578_v9, 2  ;;  %v4602_v13 = vsel %vm8346_vm2, %v4568_v52, 0.0 }
 0x4e9   :  { %v4195_v37 = vsel %vm8346_vm2, %v8660_v58, -inf  ;;  %v8667_v58 = vld [vmem:[#allocation27_spill] sm:$0xff] }
 0x4ea   :  { %4181 = vmax.xlane.f32.xlu1 %v4180_v36  ;;  %v7217_v25 = vpop.xlane.xlu0 %4100  ;;  %v4580_v36 = vmax.f32 %v4578_v9, %v4579_v57  ;;  %v7294_v9 = vpop.xlane.xlu1 %4097 }
 0x4ec   :  { %4594 = vadd.xlane.f32.xlu0 %v4593_v28  ;;  %v4581_v14 = vrot.slane %v4580_v36, 1 }
 0x4ee   :  { %4184 = vmax.xlane.f32.xlu1 %v4183_v46  ;;  %v4344_v32 = vpop.xlane.xlu0 %4343  ;;  %v4582_v48 = vmax.f32 %v4580_v36, %v4581_v14 }
 0x4ef   :  { %v4382_v60 = vmul.f32 %v6729_v16, %v4344_v32  ;;  %v4446_v32 = vsel %vm388_vm13, %v8636_v5, -1e+30  ;;  %v8666_v5 = vld [vmem:[#allocation54_spill] sm:$0xff] }
 0x4f0   :  { %4600 = vadd.xlane.f32.xlu0 %v4599_v55  ;;  %v4608_v26 = vsel %vm8346_vm2, %v4582_v48, 0.0  ;;  %v4454_v34 = vsel %vm8346_vm2, %v4446_v32, -inf  ;;  %v8670_v48 = vld [vmem:[#allocation17_spill] sm:$0xff] }
 0x4f1   :  { %vm8671_vm5 = vcmp.gt.s32.totalorder %v8670_v48, 0 }
 0x4f2   :  { %4187 = vmax.xlane.f32.xlu1 %v4186_v29  ;;  %v4347_v56 = vpop.xlane.xlu0 %4346  ;;  %v8663_v29 = vld [vmem:[#allocation47_spill] sm:$0xff] }
 0x4f3   :  { %v4383_v47 = vmul.f32 %v6736_v22, %v4347_v56  ;;  %v352_v2 = vrot.slane %v8663_v29, %v8661_v15  ;;  %v8674_v29 = vld [vmem:[#allocation43_spill] sm:$0xff] }
 0x4f4   :  { %4606 = vadd.xlane.f32.xlu0 %v4605_v24  ;;  %v8664_v24 = vld [vmem:[#allocation51_spill] sm:$0xff]  ;;  %vm3530_vm10 = vcmp.ne.s32.totalorder %v8674_v29, 0 }
 0x4f5   :  { %v359_v0 = vrot.slane %v8664_v24, %v8661_v15  ;;  %vm390_vm14 = vcmp.lt.s32.totalorder %v6271_v31, %v352_v2  ;;  %vm7329_vm11 = vmand %vm8676_vm12, %vm3530_vm10 }
 0x4f6   :  { %4190 = vmax.xlane.f32.xlu1 %v4189_v53  ;;  %v4350_v40 = vpop.xlane.xlu0 %4349  ;;  %v4448_v53 = vsel %vm390_vm14, %v8638_v7, -1e+30  ;;  %v4451_v7 = vsel %vm393_vm0, %v8642_v62, -1e+30  ;;  %v8678_v41 = vsel %vm7329_vm11, 4294967295, %v8677_v41 }
 0x4f7   :  { %v4384_v1 = vmul.f32 %v6734_v39, %v4350_v40  ;;  %vm391_vm15 = vcmp.lt.s32.totalorder %v6271_v31, %v359_v0  ;;  %v4460_v42 = vsel %vm8346_vm2, %v4448_v53, -inf  ;;  %v4469_v19 = vsel %vm8346_vm2, %v4451_v7, -inf }
 0x4f8   :  { %4612 = vadd.xlane.f32.xlu0 %v4611_v4  ;;  %v4449_v12 = vsel %vm391_vm15, %v8639_v8, -1e+30  ;;  %v387_v4 = vrot.slane %v8666_v5, %v8661_v15 }
 0x4f9   :  { %v4463_v56 = vsel %vm8346_vm2, %v4449_v12, -inf }
 0x4fa   :  { %4193 = vmax.xlane.f32.xlu1 %v4192_v43  ;;  %v4353_v28 = vpop.xlane.xlu0 %4352  ;;  %vm395_vm4 = vcmp.lt.s32.totalorder %v6271_v31, %v387_v4 }
 0x4fb   :  { %v4385_v45 = vmul.f32 %v6746_v10, %v4353_v28  ;;  %v4453_v43 = vsel %vm395_vm4, %v8648_v44, -1e+30  ;;  %v8669_v28 = vld [vmem:[#allocation39_spill] sm:$0xff] }
 0x4fc   :  { %v4475_v8 = vsel %vm8346_vm2, %v4453_v43, -inf  ;;  %vm3527_vm3 = vcmp.ne.s32.totalorder %v8669_v28, 0  ;;  %v8680_v43 = vld [vmem:[#allocation58_spill] sm:$0xff] }
 0x4fd   :  { %vm7310_vm6 = vmand %vm8671_vm5, %vm3527_vm3  ;;  %vm3532_vm7 = vcmp.ne.s32.totalorder %v8680_v43, 0 }
 0x4fe   :  { %4196 = vmax.xlane.f32.xlu1 %v4195_v37  ;;  %v4356_v38 = vpop.xlane.xlu0 %4355 }
 0x4ff   :  { %v4386_v46 = vmul.f32 %v6743_v6, %v4356_v38  ;;  %v8672_v38 = vmov 0 }
 0x500   :  { %v8673_v38 = vsel %vm7310_vm6, 4294967295, %v8672_v38 }
 0x502   :  { %4591 = vadd.xlane.f32.xlu1 %v4590_v20  ;;  %v4362_v17 = vpop.xlane.xlu0 %4361 }
 0x503   :  { %v4388_v55 = vmul.f32 %v6753_v49, %v4362_v17 }
 0x506   :  { %4597 = vadd.xlane.f32.xlu1 %v4596_v50  ;;  %v4365_v37 = vpop.xlane.xlu0 %4364 }
 0x507   :  { %v4389_v23 = vmul.f32 %v8668_v61, %v4365_v37 }
 0x50a   :  { %4603 = vadd.xlane.f32.xlu1 %v4602_v13 }
 0x50e   :  { %4400 = vrot.lane.b32.xlu0 %v4383_v47, %s5756_s22  ;;  %4609 = vadd.xlane.f32.xlu1 %v4608_v26 }
 0x512   :  { %4406 = vrot.lane.b32.xlu0 %v4386_v46, %s5756_s22 }
 0x516   :  { %4410 = vrot.lane.b32.xlu0 %v4388_v55, %s5756_s22 }
 0x51f   :  { %4398 = vrot.lane.b32.xlu1 %v4382_v60, %s5756_s22 }
 0x523   :  { %4402 = vrot.lane.b32.xlu1 %v4384_v1, %s5756_s22 }
 0x527   :  { %4404 = vrot.lane.b32.xlu1 %v4385_v45, %s5756_s22 }
 0x530   :  { %v7296_v27 = vpop.permute.xlu1 %4134 }
 0x535   :  { %4455 = vmax.xlane.f32.xlu0 %v4454_v34 }
 0x539   :  { %4461 = vmax.xlane.f32.xlu0 %v4460_v42 }
 0x53b   :  { %v7314_v47 = vpop.permute.xlu0 %4136 }
 0x53d   :  { %4464 = vmax.xlane.f32.xlu0 %v4463_v56  ;;  %v8679_v56 = vld [vmem:[#allocation46_spill] sm:$0xff] }
 0x53e   :  { %v345_v7 = vrot.slane %v8679_v56, %v8661_v15 }
 0x540   :  { %vm389_vm9 = vcmp.lt.s32.totalorder %v6271_v31, %v345_v7 }
 0x541   :  { %4470 = vmax.xlane.f32.xlu0 %v4469_v19 }
 0x545   :  { %4476 = vmax.xlane.f32.xlu0 %v4475_v8 }
 0x56f   :  { %v4359_v30 = vpop.xlane.xlu1 %4358 }
 0x570   :  { %v4387_v62 = vmul.f32 %v8667_v58, %v4359_v30 }
 0x572   :  { %4408 = vrot.lane.b32.xlu1 %v4387_v62, %s5756_s22  ;;  %v8681_v62 = vld [vmem:[#allocation48_spill] sm:$0xff] }
 0x573   :  { %v4179_v57 = vpop.xlane.xlu1 %4178  ;;  %v366_v37 = vrot.slane %v8681_v62, %v8661_v15  ;;  %v8692_v62 = vld [vmem:[#allocation16_spill] sm:$0xff] }
 0x574   :  { %v4204_v44 = vrot.slane %v4179_v57, 4  ;;  %vm8693_vm0 = vcmp.gt.s32.totalorder %v8692_v62, 0 }
 0x575   :  { %v4176_v60 = vpop.xlane.xlu0 %4175  ;;  %vm392_vm13 = vcmp.lt.s32.totalorder %v6271_v31, %v366_v37  ;;  %v8696_v37 = vld [vmem:[#allocation55_spill] sm:$0xff] }
 0x576   :  { %v4205_v3 = vadd.f32 %v4204_v44, %v4179_v57  ;;  %4412 = vrot.lane.b32.xlu1 %v4389_v23, %s5756_s22  ;;  %v8682_v23 = vld [vmem:[#allocation19_spill] sm:$0xff]  ;;  %v8684_v44 = vmov 0  ;;  %vm3528_vm3 = vcmp.ne.s32.totalorder %v8696_v37, 0 }
 0x577   :  { %v7302_v40 = vpop.xlane.xlu1 %4181  ;;  %vm8683_vm1 = vcmp.gt.s32.totalorder %v8682_v23, 0 }
 0x578   :  { %v4206_v20 = vrot.slane %v4205_v3, 2  ;;  %vm7351_vm8 = vmand %vm8683_vm1, %vm3532_vm7 }
 0x579   :  { %v7322_v24 = vpop.xlane.xlu0 %4594  ;;  %v8685_v44 = vsel %vm7351_vm8, 4294967295, %v8684_v44 }
 0x57a   :  { %v4207_v51 = vadd.f32 %v4206_v20, %v4205_v3  ;;  %8686 = vst [vmem:[#allocation73_spill] sm:$0xff] %v8685_v44  ;;  %v4198_v3 = vrot.slane %v4176_v60, 4  ;;  %v8687_v20 = vld [vmem:[#allocation72_spill] sm:$0xff] }
 0x57b   :  { %v7304_v35 = vpop.xlane.xlu1 %4184 }
 0x57c   :  { %v4208_v36 = vrot.slane %v4207_v51, 1 }
 0x57d   :  { %v7340_v19 = vpop.xlane.xlu0 %4600 }
 0x57e   :  { %v4209_v50 = vadd.f32 %v4208_v36, %v4207_v51  ;;  %v4447_v51 = vsel %vm389_vm9, %v8687_v20, -1e+30 }
 0x57f   :  { %v4188_v52 = vpop.xlane.xlu1 %4187 }
 0x580   :  { %v4222_v14 = vrot.slane %v4188_v52, 4  ;;  %v4367_v13 = vmul.f32 %v6736_v22, %v4209_v50 }
 0x581   :  { %v7358_v28 = vpop.xlane.xlu0 %4606 }
 0x582   :  { %v4223_v26 = vadd.f32 %v4222_v14, %v4188_v52  ;;  %v4375_v46 = vsel %vm7310_vm6, %v4367_v13, 0.0  ;;  %v8688_v52 = vld [vmem:[#allocation50_spill] sm:$0xff]  ;;  %v4120_v13 = vmul.f32 %v6734_v39, %v7190_v18 }
 0x583   :  { %4768 = vrot.lane.b32.xlu0 %v4375_v46, %s5760_s25  ;;  %v7319_v17 = vpop.xlane.xlu1 %4190  ;;  %v380_v14 = vrot.slane %v8688_v52, %v8661_v15  ;;  %v4210_v46 = vrot.slane %v7302_v40, 4 }
 0x584   :  { %v4224_v55 = vrot.slane %v4223_v26, 2  ;;  %v4228_v43 = vrot.slane %v7319_v17, 4 }
 0x585   :  { %vm394_vm14 = vcmp.lt.s32.totalorder %v6271_v31, %v380_v14  ;;  %v4211_v18 = vadd.f32 %v4210_v46, %v7302_v40  ;;  %v8691_v40 = vld [vmem:[#allocation35_spill] sm:$0xff]  ;;  %v8697_v14 = vld [vmem:[#allocation121_spill] sm:$0xff]  ;;  %v8700_v46 = vmov 0 }
 0x586   :  { %v4225_v1 = vadd.f32 %v4224_v55, %v4223_v26  ;;  %v4199_v26 = vadd.f32 %v4198_v3, %v4176_v60  ;;  %v4457_v55 = vsel %vm8346_vm2, %v4447_v51, -inf  ;;  %v7378_v60 = vpop.xlane.xlu0 %4612  ;;  %vm3526_vm15 = vcmp.ne.s32.totalorder %v8691_v40, 0 }
 0x587   :  { %v4194_v45 = vpop.xlane.xlu1 %4193  ;;  %vm7395_vm4 = vmand %vm8693_vm0, %vm3526_vm15 }
 0x588   :  { %v4226_v33 = vrot.slane %v4225_v1, 1  ;;  %v4234_v63 = vrot.slane %v4194_v45, 4  ;;  %v4200_v29 = vrot.slane %v4199_v26, 2 }
 0x58a   :  { %v4235_v2 = vadd.f32 %v4234_v63, %v4194_v45  ;;  %v4227_v32 = vadd.f32 %v4226_v33, %v4225_v1  ;;  %v8689_v1 = vld [vmem:[#allocation75_spill] sm:$0xff]  ;;  %v4122_v63 = vmul.f32 %v6743_v6, %v7292_v54 }
 0x58b   :  { %v7324_v0 = vpop.xlane.xlu1 %4196  ;;  %v4450_v45 = vsel %vm392_vm13, %v8689_v1, -1e+30 }
 0x58c   :  { %v4236_v34 = vrot.slane %v4235_v2, 2  ;;  %v4370_v53 = vmul.f32 %v6743_v6, %v4227_v32  ;;  %v8690_v32 = vld [vmem:[#allocation77_spill] sm:$0xff]  ;;  %v4240_v51 = vrot.slane %v7324_v0, 4 }
 0x58e   :  { %v4237_v42 = vadd.f32 %v4236_v34, %v4235_v2  ;;  %v4378_v12 = vsel %vm7329_vm11, %v4370_v53, 0.0  ;;  %v4466_v2 = vsel %vm8346_vm2, %v4450_v45, -inf  ;;  %v4452_v34 = vsel %vm394_vm14, %v8690_v32, -1e+30  ;;  %v8702_v32 = vld [vmem:[#allocation122_spill] sm:$0xff] }
 0x58f   :  { %4774 = vrot.lane.b32.xlu0 %v4378_v12, %s5760_s25  ;;  %v7336_v5 = vpop.xlane.xlu1 %4591  ;;  %v4216_v53 = vrot.slane %v7304_v35, 4  ;;  %v4201_v12 = vadd.f32 %v4200_v29, %v4199_v26  ;;  %v4472_v56 = vsel %vm8346_vm2, %v4452_v34, -inf  ;;  %v8698_v26 = vld [vmem:[#allocation12_spill] sm:$0xff]  ;;  %v4241_v29 = vadd.f32 %v4240_v51, %v7324_v0 }
 0x590   :  { %v4238_v4 = vrot.slane %v4237_v42, 1  ;;  %vm8699_vm5 = vcmp.gt.s32.totalorder %v8698_v26, 0  ;;  %v3946_v34 = vrot.slane %v8702_v32, 4 }
 0x591   :  { %v4217_v7 = vadd.f32 %v4216_v53, %v7304_v35  ;;  %v4229_v35 = vadd.f32 %v4228_v43, %v7319_v17  ;;  %vm7408_vm10 = vmand %vm8699_vm5, %vm3528_vm3  ;;  %v8703_v43 = vld [vmem:[#allocation125_spill] sm:$0xff] }
 0x592   :  { %v4239_v8 = vadd.f32 %v4238_v4, %v4237_v42  ;;  %v4124_v42 = vmul.f32 %v6753_v49, %v7294_v9  ;;  %v4212_v4 = vrot.slane %v4211_v18, 2  ;;  %v8694_v9 = vmov 0 }
 0x593   :  { %v7343_v30 = vpop.xlane.xlu1 %4597  ;;  %v8695_v9 = vsel %vm7395_vm4, 4294967295, %v8694_v9  ;;  %v4218_v20 = vrot.slane %v4217_v7, 2  ;;  %v8701_v46 = vsel %vm7408_vm10, 4294967295, %v8700_v46  ;;  %v3958_v37 = vrot.slane %v8703_v43, 4 }
 0x594   :  { %v4372_v57 = vmul.f32 %v6753_v49, %v4239_v8  ;;  %v7390_v8 = vpop.permute.xlu0 %4400  ;;  %v4213_v3 = vadd.f32 %v4212_v4, %v4211_v18 }
 0x595   :  { %v4219_v17 = vadd.f32 %v4218_v20, %v4217_v7  ;;  %v3947_v7 = vadd.f32 %v3946_v34, %v8702_v32  ;;  %v8707_v34 = vld [vmem:[#allocation13_spill] sm:$0xff] }
 0x596   :  { %v4380_v36 = vsel %vm7351_vm8, %v4372_v57, 0.0  ;;  %v4202_v57 = vrot.slane %v4201_v12, 1  ;;  %vm8708_vm9 = vcmp.gt.s32.totalorder %v8707_v34, 0 }
 0x597   :  { %4778 = vrot.lane.b32.xlu0 %v4380_v36, %s5760_s25  ;;  %v7361_v50 = vpop.xlane.xlu1 %4603  ;;  %v4220_v4 = vrot.slane %v4219_v17, 1 }
 0x598   :  { %v4407_v1 = vpop.permute.xlu0 %4406  ;;  %v4203_v45 = vadd.f32 %v4202_v57, %v4201_v12 }
 0x599   :  { %v4426_v12 = vsel %vm7329_vm11, %v4407_v1, 0.0  ;;  %v8705_v1 = vld [vmem:[#allocation126_spill] sm:$0xff] }
 0x59a   :  { %4458 = vmax.xlane.f32.xlu1 %v4457_v55  ;;  %v4214_v55 = vrot.slane %v4213_v3, 1  ;;  %v4366_v53 = vmul.f32 %v6729_v16, %v4203_v45  ;;  %v3970_v45 = vrot.slane %v8705_v1, 4 }
 0x59b   :  { %4138 = vrot.lane.b32.xlu0 %v4120_v13, %s5754_s2  ;;  %v7372_v33 = vpop.xlane.xlu1 %4609  ;;  %v3934_v13 = vrot.slane %v8697_v14, 4 }
 0x59c   :  { %v4411_v40 = vpop.permute.xlu0 %4410  ;;  %v4374_v57 = vsel %vm7395_vm4, %v4366_v53, 0.0  ;;  %v8709_v53 = vmov 0 }
 0x59e   :  { %4467 = vmax.xlane.f32.xlu1 %v4466_v2  ;;  %v3935_v2 = vadd.f32 %v3934_v13, %v8697_v14  ;;  %v3948_v13 = vrot.slane %v3947_v7, 2 }
 0x59f   :  { %4142 = vrot.lane.b32.xlu0 %v4122_v63, %s5754_s2  ;;  %v4399_v54 = vpop.permute.xlu1 %4398  ;;  %v4230_v63 = vrot.slane %v4229_v35, 2 }
 0x5a0   :  { %v4422_v36 = vsel %vm7395_vm4, %v4399_v54, 0.0  ;;  %v3936_v0 = vrot.slane %v3935_v2, 2 }
 0x5a1   :  { %v4231_v54 = vadd.f32 %v4230_v63, %v4229_v35  ;;  %v4428_v35 = vsel %vm7351_vm8, %v4411_v40, 0.0  ;;  %v4630_v63 = vmul.f32 %v6729_v16, %v7336_v5  ;;  %vm8746_vm8 = vcmp.gt.s32.totalorder %v8698_v26, 0 }
 0x5a2   :  { %4473 = vmax.xlane.f32.xlu1 %v4472_v56  ;;  %v4242_v56 = vrot.slane %v4241_v29, 2  ;;  %v3937_v14 = vadd.f32 %v3936_v0, %v3935_v2  ;;  %v8706_v2 = vld [vmem:[#allocation44_spill] sm:$0xff] }
 0x5a3   :  { %4146 = vrot.lane.b32.xlu0 %v4124_v42, %s5754_s2  ;;  %v4403_v52 = vpop.permute.xlu1 %4402  ;;  %v4215_v42 = vadd.f32 %v4214_v55, %v4213_v3  ;;  %v4232_v3 = vrot.slane %v4231_v54, 1  ;;  %v3959_v55 = vadd.f32 %v3958_v37, %v8703_v43  ;;  %vm3531_vm7 = vcmp.ne.s32.totalorder %v8706_v2, 0  ;;  %v8711_v43 = vld [vmem:[#allocation14_spill] sm:$0xff]  ;;  %v8716_v37 = vld [vmem:[#allocation45_spill] sm:$0xff] }
 0x5a4   :  { %v4424_v18 = vsel %vm7408_vm10, %v4403_v52, 0.0  ;;  %v4243_v51 = vadd.f32 %v4242_v56, %v4241_v29  ;;  %v8704_v52 = vld [vmem:[#allocation38_spill] sm:$0xff]  ;;  %v3938_v5 = vrot.slane %v3937_v14, 1  ;;  %v4632_v56 = vmul.f32 %v6734_v39, %v7343_v30 }
 0x5a5   :  { %v4368_v20 = vmul.f32 %v6734_v39, %v4215_v42  ;;  %vm3529_vm12 = vcmp.ne.s32.totalorder %v8704_v52, 0  ;;  %v4233_v32 = vadd.f32 %v4232_v3, %v4231_v54  ;;  %v3949_v42 = vadd.f32 %v3948_v13, %v3947_v7  ;;  %v8717_v52 = vld [vmem:[#allocation79_spill] sm:$0xff]  ;;  %v8727_v2 = vld [vmem:[#allocation82_spill] sm:$0xff] }
 0x5a6   :  { %v4244_v29 = vrot.slane %v4243_v51, 1  ;;  %vm7444_vm1 = vmand %vm8708_vm9, %vm3529_vm12  ;;  %v3971_v54 = vadd.f32 %v3970_v45, %v8705_v1  ;;  %vm8712_vm13 = vcmp.gt.s32.totalorder %v8711_v43, 0  ;;  %v8713_v7 = vmov 0  ;;  %v8718_v13 = vld [vmem:[#allocation15_spill] sm:$0xff] }
 0x5a7   :  { %4846 = vrot.lane.b32.xlu0 %v4422_v36, %s5760_s25  ;;  %v4221_v36 = vadd.f32 %v4220_v4, %v4219_v17  ;;  %v8710_v53 = vsel %vm7444_vm1, 4294967295, %v8709_v53  ;;  %v3960_v4 = vrot.slane %v3959_v55, 2  ;;  %v4371_v40 = vmul.f32 %v8667_v58, %v4233_v32  ;;  %vm7458_vm14 = vmand %vm8712_vm13, %vm3531_vm7 }
 0x5a8   :  { %v4245_v0 = vadd.f32 %v4244_v29, %v4243_v51  ;;  %v8714_v7 = vsel %vm7458_vm14, 4294967295, %v8713_v7  ;;  %vm3533_vm15 = vcmp.ne.s32.totalorder %v8716_v37, 0  ;;  %v3950_v30 = vrot.slane %v3949_v42, 1 }
 0x5a9   :  { %v4369_v17 = vmul.f32 %v6746_v10, %v4221_v36  ;;  %8715 = vst [vmem:[#allocation74_spill] sm:$0xff] %v8714_v7  ;;  %v3961_v3 = vadd.f32 %v3960_v4, %v3959_v55  ;;  %v4379_v51 = vsel %vm7458_vm14, %v4371_v40, 0.0  ;;  %vm3230_vm0 = vcmp.ne.s32.totalorder %v8717_v52, 0 }
 0x5aa   :  { %v4373_v36 = vmul.f32 %v8668_v61, %v4245_v0  ;;  %vm8719_vm3 = vcmp.gt.s32.totalorder %v8718_v13, 0  ;;  %v8720_v1 = vmov 0  ;;  %v3951_v45 = vadd.f32 %v3950_v30, %v3949_v42 }
 0x5ab   :  { %4850 = vrot.lane.b32.xlu0 %v4424_v18, %s5760_s25  ;;  %v4376_v18 = vsel %vm7408_vm10, %v4368_v20, 0.0  ;;  %v3939_v20 = vadd.f32 %v3938_v5, %v3937_v14  ;;  %vm7473_vm5 = vmand %vm8719_vm3, %vm3533_vm15  ;;  %vm8723_vm12 = vcmp.gt.s32.totalorder %v8692_v62, 0  ;;  %v8724_v32 = vmov 0 }
 0x5ac   :  { %v8721_v1 = vsel %vm7473_vm5, 4294967295, %v8720_v1  ;;  %vm7486_vm7 = vmand %vm8723_vm12, %vm3230_vm0  ;;  %vm3232_vm9 = vcmp.ne.s32.totalorder %v8727_v2, 0  ;;  %v4121_v5 = vmul.f32 %v6746_v10, %v7193_v21  ;;  %vm8728_vm13 = vcmp.gt.s32.totalorder %v8698_v26, 0 }
 0x5ad   :  { %8722 = vst [vmem:[#allocation76_spill] sm:$0xff] %v8721_v1  ;;  %v4102_v55 = vmul.f32 %v6729_v16, %v3939_v20  ;;  %v8725_v32 = vsel %vm7486_vm7, 4294967295, %v8724_v32  ;;  %vm7500_vm15 = vmand %vm8728_vm13, %vm3232_vm9  ;;  %v8729_v37 = vmov 0  ;;  %v4123_v20 = vmul.f32 %v8667_v58, %v7207_v11  ;;  %v8735_v11 = vld [vmem:[#allocation86_spill] sm:$0xff] }
 0x5ae   :  { %8726 = vst [vmem:[#allocation59_spill] sm:$0xff] %v8725_v32  ;;  %v8730_v37 = vsel %vm7500_vm15, 4294967295, %v8729_v37  ;;  %vm8732_vm3 = vcmp.gt.s32.totalorder %v8675_v59, 0  ;;  %vm3236_vm9 = vcmp.ne.s32.totalorder %v8735_v11, 0  ;;  %vm8736_vm13 = vcmp.gt.s32.totalorder %v8682_v23, 0  ;;  %v8780_v1 = vld [vmem:[#allocation70_spill] sm:$0xff] }
 0x5af   :  { %4854 = vrot.lane.b32.xlu0 %v4426_v12, %s5760_s25  ;;  %v4377_v12 = vsel %vm7444_vm1, %v4369_v17, 0.0  ;;  %v4110_v42 = vsel %vm7486_vm7, %v4102_v55, 0.0  ;;  %v4125_v55 = vmul.f32 %v8668_v61, %v7217_v25  ;;  %v4423_v25 = vsel %vm7310_vm6, %v7390_v8, 0.0  ;;  %v8819_v32 = vld [vmem:[#allocation101_spill] sm:$0xff] }
 0x5b3   :  { %4766 = vrot.lane.b32.xlu1 %v4374_v57, %s5760_s25  ;;  %4858 = vrot.lane.b32.xlu0 %v4428_v35, %s5760_s25  ;;  %v4634_v57 = vmul.f32 %v6743_v6, %v7361_v50  ;;  %v3972_v35 = vrot.slane %v3971_v54, 2  ;;  %v4636_v50 = vmul.f32 %v6753_v49, %v7372_v33 }
 0x5b5   :  { %v3973_v29 = vadd.f32 %v3972_v35, %v3971_v54 }
 0x5b7   :  { %4770 = vrot.lane.b32.xlu1 %v4376_v18, %s5760_s25  ;;  %4646 = vrot.lane.b32.xlu0 %v4630_v63, %s5757_s23  ;;  %v3962_v63 = vrot.slane %v3961_v3, 1  ;;  %v4381_v18 = vsel %vm7473_vm5, %v4373_v36, 0.0  ;;  %v3974_v54 = vrot.slane %v3973_v29, 1 }
 0x5b9   :  { %v3963_v0 = vadd.f32 %v3962_v63, %v3961_v3  ;;  %v3975_v52 = vadd.f32 %v3974_v54, %v3973_v29  ;;  %v8745_v54 = vld [vmem:[#allocation65_spill] sm:$0xff] }
 0x5ba   :  { %vm3808_vm2 = vcmp.ne.s32.totalorder %v8745_v54, 0 }
 0x5bb   :  { %4772 = vrot.lane.b32.xlu1 %v4377_v12, %s5760_s25  ;;  %4650 = vrot.lane.b32.xlu0 %v4632_v56, %s5757_s23  ;;  %v4104_v56 = vmul.f32 %v6734_v39, %v3951_v45  ;;  %v4106_v36 = vmul.f32 %v6743_v6, %v3963_v0 }
 0x5bd   :  { %v4112_v3 = vsel %vm7500_vm15, %v4104_v56, 0.0  ;;  %v8742_v56 = vmov 0 }
 0x5bf   :  { %4776 = vrot.lane.b32.xlu1 %v4379_v51, %s5760_s25  ;;  %4654 = vrot.lane.b32.xlu0 %v4634_v57, %s5757_s23  ;;  %v8731_v57 = vld [vmem:[#allocation84_spill] sm:$0xff] }
 0x5c0   :  { %vm3234_vm0 = vcmp.ne.s32.totalorder %v8731_v57, 0 }
 0x5c1   :  { %vm7514_vm12 = vmand %vm8732_vm3, %vm3234_vm0 }
 0x5c2   :  { %v4456_v14 = vpop.xlane.xlu0 %4455  ;;  %v4114_v29 = vsel %vm7514_vm12, %v4106_v36, 0.0  ;;  %vm7528_vm0 = vmand %vm8736_vm13, %vm3236_vm9  ;;  %vm8741_vm9 = vcmp.gt.s32.totalorder %v8692_v62, 0  ;;  %v8747_v62 = vmov 0 }
 0x5c3   :  { %v4478_v17 = vrot.slane %v4456_v14, 4  ;;  %4780 = vrot.lane.b32.xlu1 %v4381_v18, %s5760_s25  ;;  %4658 = vrot.lane.b32.xlu0 %v4636_v50, %s5757_s23  ;;  %v4108_v18 = vmul.f32 %v6753_v49, %v3975_v52 }
 0x5c5   :  { %v4479_v33 = vadd.f32 %v4478_v17, %v4456_v14  ;;  %v8737_v17 = vmov 0 }
 0x5c6   :  { %v4462_v4 = vpop.xlane.xlu0 %4461  ;;  %v8738_v17 = vsel %vm7528_vm0, 4294967295, %v8737_v17 }
 0x5c7   :  { %v4480_v12 = vrot.slane %v4479_v33, 2  ;;  %v4490_v40 = vrot.slane %v4462_v4, 4  ;;  %4140 = vrot.lane.b32.xlu1 %v4121_v5, %s5754_s2  ;;  %4686 = vrot.lane.b32.xlu0 %v4110_v42, %s5760_s25  ;;  %8739 = vst [vmem:[#allocation60_spill] sm:$0xff] %v8738_v17  ;;  %v4116_v5 = vsel %vm7528_vm0, %v4108_v18, 0.0 }
 0x5c9   :  { %v4481_v21 = vadd.f32 %v4480_v12, %v4479_v33  ;;  %v4491_v30 = vadd.f32 %v4490_v40, %v4462_v4  ;;  %v8740_v33 = vld [vmem:[#allocation69_spill] sm:$0xff]  ;;  %v4405_v4 = vpop.permute.xlu1 %4404 }
 0x5ca   :  { %vm3806_vm3 = vcmp.ne.s32.totalorder %v8740_v33, 0  ;;  %v4425_v8 = vsel %vm7444_vm1, %v4405_v4, 0.0  ;;  %v8753_v33 = vld [vmem:[#allocation71_spill] sm:$0xff] }
 0x5cb   :  { %v4482_v35 = vrot.slane %v4481_v21, 1  ;;  %v4492_v51 = vrot.slane %v4491_v30, 2  ;;  %4144 = vrot.lane.b32.xlu1 %v4123_v20, %s5754_s2  ;;  %4690 = vrot.lane.b32.xlu0 %v4112_v3, %s5760_s25  ;;  %vm7543_vm13 = vmand %vm8741_vm9, %vm3806_vm3  ;;  %v8751_v3 = vld [vmem:[#allocation124_spill] sm:$0xff] }
 0x5cc   :  { %v8743_v56 = vsel %vm7543_vm13, 4294967295, %v8742_v56  ;;  %vm7557_vm3 = vmand %vm8746_vm8, %vm3808_vm2  ;;  %vm8755_vm8 = vcmp.gt.s32.totalorder %v8670_v48, 0 }
 0x5cd   :  { %v4493_v50 = vadd.f32 %v4492_v51, %v4491_v30  ;;  %v4483_v45 = vadd.f32 %v4482_v35, %v4481_v21  ;;  %8744 = vst [vmem:[#allocation61_spill] sm:$0xff] %v8743_v56  ;;  %v8748_v62 = vsel %vm7557_vm3, 4294967295, %v8747_v62  ;;  %v8750_v21 = vld [vmem:[#allocation123_spill] sm:$0xff]  ;;  %v3952_v35 = vrot.slane %v8751_v3, 4 }
 0x5ce   :  { %8749 = vst [vmem:[#allocation62_spill] sm:$0xff] %v8748_v62  ;;  %v3940_v30 = vrot.slane %v8750_v21, 4 }
 0x5cf   :  { %v4494_v63 = vrot.slane %v4493_v50, 1  ;;  %4148 = vrot.lane.b32.xlu1 %v4125_v55, %s5754_s2  ;;  %4694 = vrot.lane.b32.xlu0 %v4114_v29, %s5760_s25  ;;  %v4614_v42 = vmul.f32 %v6729_v16, %v4483_v45  ;;  %v3953_v52 = vadd.f32 %v3952_v35, %v8751_v3  ;;  %v4631_v45 = vmul.f32 %v6736_v22, %v7322_v24 }
 0x5d0   :  { %v3941_v20 = vadd.f32 %v3940_v30, %v8750_v21  ;;  %v4635_v24 = vmul.f32 %v8667_v58, %v7358_v28  ;;  %v8756_v28 = vmov 0 }
 0x5d1   :  { %v4495_v2 = vadd.f32 %v4494_v63, %v4493_v50  ;;  %v4622_v12 = vsel %vm7543_vm13, %v4614_v42, 0.0  ;;  %v8752_v50 = vld [vmem:[#allocation127_spill] sm:$0xff]  ;;  %v3954_v29 = vrot.slane %v3953_v52, 2 }
 0x5d2   :  { %v3942_v36 = vrot.slane %v3941_v20, 2  ;;  %v3964_v11 = vrot.slane %v8752_v50, 4 }
 0x5d3   :  { %4848 = vrot.lane.b32.xlu1 %v4423_v25, %s5760_s25  ;;  %4698 = vrot.lane.b32.xlu0 %v4116_v5, %s5760_s25  ;;  %v4616_v40 = vmul.f32 %v6734_v39, %v4495_v2  ;;  %v3976_v25 = vrot.slane %v8753_v33, 4  ;;  %v4633_v2 = vmul.f32 %v6746_v10, %v7340_v19  ;;  %v3955_v42 = vadd.f32 %v3954_v29, %v3953_v52 }
 0x5d4   :  { %v3943_v63 = vadd.f32 %v3942_v36, %v3941_v20  ;;  %v3965_v18 = vadd.f32 %v3964_v11, %v8752_v50  ;;  %v4637_v19 = vmul.f32 %v8668_v61, %v7378_v60 }
 0x5d5   :  { %v4624_v0 = vsel %vm7557_vm3, %v4616_v40, 0.0  ;;  %v3977_v54 = vadd.f32 %v3976_v25, %v8753_v33  ;;  %v8765_v25 = vmov 0 }
 0x5d6   :  { %v3944_v5 = vrot.slane %v3943_v63, 1  ;;  %v3966_v4 = vrot.slane %v3965_v18, 2 }
 0x5d7   :  { %4726 = vrot.lane.b32.xlu0 %v4622_v12, %s5760_s25  ;;  %4852 = vrot.lane.b32.xlu1 %v4425_v8, %s5760_s25  ;;  %v4465_v8 = vpop.xlane.xlu0 %4464  ;;  %v3956_v12 = vrot.slane %v3955_v42, 1 }
 0x5d8   :  { %v3967_v40 = vadd.f32 %v3966_v4, %v3965_v18  ;;  %v3945_v21 = vadd.f32 %v3944_v5, %v3943_v63 }
 0x5da   :  { %v3968_v20 = vrot.slane %v3967_v40, 1  ;;  %v4103_v35 = vmul.f32 %v6736_v22, %v3945_v21 }
 0x5db   :  { %4730 = vrot.lane.b32.xlu0 %v4624_v0, %s5760_s25  ;;  %v3978_v0 = vrot.slane %v3977_v54, 2  ;;  %v4471_v30 = vpop.xlane.xlu0 %4470 }
 0x5dc   :  { %v3969_v11 = vadd.f32 %v3968_v20, %v3967_v40 }
 0x5dd   :  { %v3979_v3 = vadd.f32 %v3978_v0, %v3977_v54  ;;  %v8770_v54 = vmov 0 }
 0x5de   :  { %v4107_v18 = vmul.f32 %v8667_v58, %v3969_v11 }
 0x5df   :  { %v3980_v36 = vrot.slane %v3979_v3, 1  ;;  %v4477_v52 = vpop.xlane.xlu0 %4476 }
 0x5e1   :  { %v3981_v33 = vadd.f32 %v3980_v36, %v3979_v3 }
 0x5e3   :  { %v4109_v4 = vmul.f32 %v8668_v61, %v3981_v33 }
 0x5e4   :  { %v4409_v57 = vpop.permute.xlu1 %4408 }
 0x5e5   :  { %v4427_v51 = vsel %vm7458_vm14, %v4409_v57, 0.0  ;;  %v8754_v57 = vld [vmem:[#allocation80_spill] sm:$0xff] }
 0x5e6   :  { %4856 = vrot.lane.b32.xlu1 %v4427_v51, %s5760_s25  ;;  %vm3231_vm2 = vcmp.ne.s32.totalorder %v8754_v57, 0  ;;  %v3957_v51 = vadd.f32 %v3956_v12, %v3955_v42 }
 0x5e7   :  { %vm7594_vm9 = vmand %vm8755_vm8, %vm3231_vm2  ;;  %vm8764_vm8 = vcmp.gt.s32.totalorder %v8711_v43, 0 }
 0x5e8   :  { %v4413_v26 = vpop.permute.xlu1 %4412  ;;  %v8757_v28 = vsel %vm7594_vm9, 4294967295, %v8756_v28  ;;  %v4111_v60 = vsel %vm7594_vm9, %v4103_v35, 0.0  ;;  %v4105_v50 = vmul.f32 %v6746_v10, %v3957_v51  ;;  %v4508_v35 = vrot.slane %v4471_v30, 4 }
 0x5e9   :  { %v4429_v55 = vsel %vm7473_vm5, %v4413_v26, 0.0  ;;  %8758 = vst [vmem:[#allocation78_spill] sm:$0xff] %v8757_v28  ;;  %v8759_v26 = vld [vmem:[#allocation81_spill] sm:$0xff]  ;;  %vm8760_vm5 = vcmp.gt.s32.totalorder %v8707_v34, 0 }
 0x5ea   :  { %4860 = vrot.lane.b32.xlu1 %v4429_v55, %s5760_s25  ;;  %vm3233_vm13 = vcmp.ne.s32.totalorder %v8759_v26, 0  ;;  %v8761_v55 = vmov 0  ;;  %v4509_v36 = vadd.f32 %v4508_v35, %v4471_v30 }
 0x5eb   :  { %vm7605_vm14 = vmand %vm8760_vm5, %vm3233_vm13  ;;  %vm8769_vm13 = vcmp.gt.s32.totalorder %v8718_v13, 0 }
 0x5ec   :  { %v8762_v55 = vsel %vm7605_vm14, 4294967295, %v8761_v55  ;;  %v4113_v29 = vsel %vm7605_vm14, %v4105_v50, 0.0  ;;  %v4520_v50 = vrot.slane %v4477_v52, 4 }
 0x5ee   :  { %4648 = vrot.lane.b32.xlu1 %v4631_v45, %s5757_s23  ;;  %v8763_v45 = vld [vmem:[#allocation83_spill] sm:$0xff] }
 0x5ef   :  { %vm3235_vm2 = vcmp.ne.s32.totalorder %v8763_v45, 0 }
 0x5f0   :  { %vm7618_vm1 = vmand %vm8764_vm8, %vm3235_vm2  ;;  %vm3807_vm2 = vcmp.ne.s32.totalorder %v8780_v1, 0  ;;  %vm8783_vm8 = vcmp.gt.s32.totalorder %v8670_v48, 0 }
 0x5f1   :  { %v8766_v25 = vsel %vm7618_vm1, 4294967295, %v8765_v25  ;;  %v4115_v42 = vsel %vm7618_vm1, %v4107_v18, 0.0  ;;  %v4510_v18 = vrot.slane %v4509_v36, 2 }
 0x5f2   :  { %4652 = vrot.lane.b32.xlu1 %v4633_v2, %s5757_s23  ;;  %v8767_v2 = vld [vmem:[#allocation85_spill] sm:$0xff] }
 0x5f3   :  { %vm3237_vm5 = vcmp.ne.s32.totalorder %v8767_v2, 0  ;;  %v4521_v2 = vadd.f32 %v4520_v50, %v4477_v52 }
 0x5f4   :  { %vm7631_vm11 = vmand %vm8769_vm13, %vm3237_vm5 }
 0x5f5   :  { %v7610_v63 = vpop.permute.xlu0 %4768  ;;  %v8771_v54 = vsel %vm7631_vm11, 4294967295, %v8770_v54  ;;  %v4117_v12 = vsel %vm7631_vm11, %v4109_v4, 0.0  ;;  %vm7672_vm5 = vmand %vm8783_vm8, %vm3807_vm2  ;;  %vm8791_vm2 = vcmp.gt.s32.totalorder %v8707_v34, 0 }
 0x5f6   :  { %4656 = vrot.lane.b32.xlu1 %v4635_v24, %s5757_s23 }
 0x5fa   :  { %4660 = vrot.lane.b32.xlu1 %v4637_v19, %s5757_s23  ;;  %v4496_v19 = vrot.slane %v4465_v8, 4 }
 0x5fc   :  { %v4497_v3 = vadd.f32 %v4496_v19, %v4465_v8  ;;  %v4511_v19 = vadd.f32 %v4510_v18, %v4509_v36 }
 0x5fe   :  { %4688 = vrot.lane.b32.xlu1 %v4111_v60, %s5760_s25  ;;  %v4498_v26 = vrot.slane %v4497_v3, 2  ;;  %v4512_v50 = vrot.slane %v4511_v19, 1 }
 0x601   :  { %v7623_v5 = vpop.permute.xlu0 %4774 }
 0x602   :  { %4692 = vrot.lane.b32.xlu1 %v4113_v29, %s5760_s25  ;;  %8768 = vst [vmem:[#allocation63_spill] sm:$0xff] %v7623_v5  ;;  %v4499_v29 = vadd.f32 %v4498_v26, %v4497_v3 }
 0x604   :  { %v4500_v8 = vrot.slane %v4499_v29, 1 }
 0x606   :  { %4696 = vrot.lane.b32.xlu1 %v4115_v42, %s5760_s25  ;;  %v4501_v52 = vadd.f32 %v4500_v8, %v4499_v29 }
 0x608   :  { %v4617_v29 = vmul.f32 %v6746_v10, %v4501_v52  ;;  %v8796_v52 = vmov 0 }
 0x609   :  { %v7635_v24 = vpop.permute.xlu0 %4778 }
 0x60a   :  { %8772 = vst [vmem:[#allocation66_spill] sm:$0xff] %v7635_v24  ;;  %4700 = vrot.lane.b32.xlu1 %v4117_v12, %s5760_s25 }
 0x60d   :  { %v7640_v40 = vpop.permute.xlu0 %4138 }
 0x611   :  { %v7642_v0 = vpop.permute.xlu0 %4142 }
 0x615   :  { %v7644_v21 = vpop.permute.xlu0 %4146 }
 0x619   :  { %v7646_v57 = vpop.permute.xlu0 %4846 }
 0x61a   :  { %8773 = vst [vmem:[#allocation68_spill] sm:$0xff] %v7646_v57 }
 0x61d   :  { %v7648_v20 = vpop.permute.xlu0 %4850 }
 0x61e   :  { %8774 = vst [vmem:[#allocation64_spill] sm:$0xff] %v7648_v20 }
 0x621   :  { %v7650_v51 = vpop.permute.xlu0 %4854 }
 0x622   :  { %8775 = vst [vmem:[#allocation49_spill] sm:$0xff] %v7650_v51  ;;  %v4522_v51 = vrot.slane %v4521_v2, 2 }
 0x625   :  { %v7652_v60 = vpop.permute.xlu0 %4858 }
 0x626   :  { %8776 = vst [vmem:[#allocation47_spill] sm:$0xff] %v7652_v60  ;;  %v8779_v60 = vld [vmem:[#allocation89_spill] sm:$0xff] }
 0x627   :  { %v4459_v11 = vpop.xlane.xlu1 %4458  ;;  %v3034_v20 = vrot.slane %v8779_v60, 4 }
 0x628   :  { %v4484_v45 = vrot.slane %v4459_v11, 4 }
 0x629   :  { %v7654_v33 = vpop.permute.xlu0 %4646 }
 0x62a   :  { %8777 = vst [vmem:[#allocation51_spill] sm:$0xff] %v7654_v33  ;;  %v4485_v42 = vadd.f32 %v4484_v45, %v4459_v11  ;;  %v4523_v45 = vadd.f32 %v4522_v51, %v4521_v2  ;;  %v4513_v51 = vadd.f32 %v4512_v50, %v4511_v19  ;;  %v8790_v50 = vld [vmem:[#allocation97_spill] sm:$0xff] }
 0x62b   :  { %v4468_v4 = vpop.xlane.xlu1 %4467 }
 0x62c   :  { %v4486_v12 = vrot.slane %v4485_v42, 2  ;;  %v4502_v31 = vrot.slane %v4468_v4, 4  ;;  %v4524_v2 = vrot.slane %v4523_v45, 1 }
 0x62d   :  { %v7656_v15 = vpop.permute.xlu0 %4650 }
 0x62e   :  { %8778 = vst [vmem:[#allocation53_spill] sm:$0xff] %v7656_v15  ;;  %v4487_v30 = vadd.f32 %v4486_v12, %v4485_v42  ;;  %v4503_v35 = vadd.f32 %v4502_v31, %v4468_v4  ;;  %v3035_v15 = vadd.f32 %v3034_v20, %v8779_v60  ;;  %v8781_v42 = vld [vmem:[#allocation109_spill] sm:$0xff]  ;;  %v8782_v12 = vld [vmem:[#allocation96_spill] sm:$0xff]  ;;  %v8787_v20 = vld [vmem:[#allocation67_spill] sm:$0xff] }
 0x62f   :  { %v4474_v57 = vpop.xlane.xlu1 %4473  ;;  %v3666_v31 = vrot.slane %v8781_v42, 4  ;;  %v3342_v24 = vrot.slane %v8782_v12, 4  ;;  %vm3809_vm10 = vcmp.ne.s32.totalorder %v8787_v20, 0 }
 0x630   :  { %v4488_v56 = vrot.slane %v4487_v30, 1  ;;  %v4504_v3 = vrot.slane %v4503_v35, 2  ;;  %v4514_v26 = vrot.slane %v4474_v57, 4  ;;  %v3036_v48 = vrot.slane %v3035_v15, 2  ;;  %vm7694_vm8 = vmand %vm8791_vm2, %vm3809_vm10 }
 0x631   :  { %v7660_v11 = vpop.permute.xlu0 %4654  ;;  %v3343_v19 = vadd.f32 %v3342_v24, %v8782_v12  ;;  %v8799_v24 = vld [vmem:[#allocation24_spill] sm:$0xff]  ;;  %vm8803_vm10 = vcmp.gt.s32.totalorder %v8682_v23, 0 }
 0x632   :  { %v4489_v33 = vadd.f32 %v4488_v56, %v4487_v30  ;;  %v4505_v36 = vadd.f32 %v4504_v3, %v4503_v35  ;;  %v4515_v18 = vadd.f32 %v4514_v26, %v4474_v57  ;;  %v8784_v56 = vmov 0  ;;  %v8786_v57 = vld [vmem:[#allocation25_spill] sm:$0xff]  ;;  %v8789_v30 = vld [vmem:[#allocation95_spill] sm:$0xff] }
 0x633   :  { %v7664_v4 = vpop.permute.xlu1 %4766  ;;  %v8785_v56 = vsel %vm7672_vm5, 4294967295, %v8784_v56  ;;  %vm3810_vm13 = vcmp.ne.s32.totalorder %v8786_v57, 0  ;;  %v3348_v35 = vrot.slane %v8789_v30, 4  ;;  %v3667_v3 = vadd.f32 %v3666_v31, %v8781_v42 }
 0x634   :  { %v4506_v7 = vrot.slane %v4505_v36, 1  ;;  %v4516_v44 = vrot.slane %v4515_v18, 2  ;;  %v4615_v5 = vmul.f32 %v6736_v22, %v4489_v33  ;;  %vm3812_vm11 = vcmp.ne.s32.totalorder %v8799_v24, 0 }
 0x635   :  { %v7678_v60 = vpop.permute.xlu0 %4658  ;;  %v4525_v42 = vadd.f32 %v4524_v2, %v4523_v45  ;;  %v3037_v57 = vadd.f32 %v3036_v48, %v3035_v15  ;;  %v3349_v20 = vadd.f32 %v3348_v35, %v8789_v30  ;;  %v8804_v15 = vmov 0  ;;  %v8807_v2 = vld [vmem:[#allocation100_spill] sm:$0xff] }
 0x636   :  { %8788 = vst [vmem:[#allocation54_spill] sm:$0xff] %v7678_v60  ;;  %v4507_v8 = vadd.f32 %v4506_v7, %v4505_v36  ;;  %v4517_v33 = vadd.f32 %v4516_v44, %v4515_v18  ;;  %v4623_v1 = vsel %vm7672_vm5, %v4615_v5, 0.0  ;;  %v3354_v60 = vrot.slane %v8790_v50, 4  ;;  %v8800_v36 = vld [vmem:[#allocation23_spill] sm:$0xff]  ;;  %v8812_v30 = vld [vmem:[#allocation28_spill] sm:$0xff] }
 0x637   :  { %4728 = vrot.lane.b32.xlu1 %v4623_v1, %s5760_s25  ;;  %v7686_v26 = vpop.permute.xlu1 %4770  ;;  %v8792_v44 = vmov 0  ;;  %vm8795_vm5 = vcmp.gt.s32.totalorder %v8675_v59, 0  ;;  %vm3811_vm4 = vcmp.ne.s32.totalorder %v8800_v36, 0  ;;  %v4625_v18 = vsel %vm7694_vm8, %v4617_v29, 0.0 }
 0x638   :  { %v8793_v44 = vsel %vm7694_vm8, 4294967295, %v8792_v44  ;;  %v4518_v7 = vrot.slane %v4517_v33, 1  ;;  %v4618_v5 = vmul.f32 %v6743_v6, %v4507_v8  ;;  %vm7703_vm6 = vmand %vm8795_vm5, %vm3810_vm13  ;;  %v4619_v59 = vmul.f32 %v8667_v58, %v4513_v51 }
 0x639   :  { %8794 = vst [vmem:[#allocation27_spill] sm:$0xff] %v8793_v44  ;;  %v8797_v52 = vsel %vm7703_vm6, 4294967295, %v8796_v52  ;;  %v7709_v34 = vpop.permute.xlu0 %4686  ;;  %v3668_v8 = vrot.slane %v3667_v3, 2  ;;  %v8802_v44 = vld [vmem:[#allocation98_spill] sm:$0xff]  ;;  %v3355_v45 = vadd.f32 %v3354_v60, %v8790_v50  ;;  %vm7727_vm5 = vmand %vm8803_vm10, %vm3812_vm11  ;;  %vm8808_vm13 = vcmp.gt.s32.totalorder %v8711_v43, 0 }
 0x63a   :  { %8798 = vst [vmem:[#allocation103_spill] sm:$0xff] %v8797_v52  ;;  %8801 = vst [vmem:[#allocation39_spill] sm:$0xff] %v7709_v34  ;;  %v4519_v31 = vadd.f32 %v4518_v7, %v4517_v33  ;;  %v4626_v12 = vsel %vm7703_vm6, %v4618_v5, 0.0  ;;  %v3344_v34 = vrot.slane %v3343_v19, 2  ;;  %v3360_v29 = vrot.slane %v8802_v44, 4 }
 0x63b   :  { %4732 = vrot.lane.b32.xlu1 %v4625_v18, %s5760_s25  ;;  %4734 = vrot.lane.b32.xlu0 %v4626_v12, %s5760_s25  ;;  %v7719_v1 = vpop.permute.xlu1 %4772  ;;  %v8805_v15 = vsel %vm7727_vm5, 4294967295, %v8804_v15  ;;  %v3366_v33 = vrot.slane %v8807_v2, 4  ;;  %vm7737_vm2 = vmand %vm8808_vm13, %vm3811_vm4  ;;  %v8809_v48 = vmov 0  ;;  %vm3813_vm8 = vcmp.ne.s32.totalorder %v8812_v30, 0  ;;  %v8813_v12 = vld [vmem:[#allocation99_spill] sm:$0xff] }
 0x63c   :  { %8806 = vst [vmem:[#allocation17_spill] sm:$0xff] %v8805_v15  ;;  %v4620_v51 = vmul.f32 %v6753_v49, %v4519_v31  ;;  %v8810_v48 = vsel %vm7737_vm2, 4294967295, %v8809_v48  ;;  %v4627_v23 = vsel %vm7737_vm2, %v4619_v59, 0.0  ;;  %v4621_v50 = vmul.f32 %v8668_v61, %v4525_v42 }
 0x63d   :  { %8811 = vst [vmem:[#allocation43_spill] sm:$0xff] %v8810_v48  ;;  %v7741_v60 = vpop.permute.xlu0 %4690  ;;  %v3350_v7 = vrot.slane %v3349_v20, 2  ;;  %v3669_v5 = vadd.f32 %v3668_v8, %v3667_v3  ;;  %v3038_v24 = vrot.slane %v3037_v57, 1  ;;  %v3345_v36 = vadd.f32 %v3344_v34, %v3343_v19 }
 0x63e   :  { %v4628_v35 = vsel %vm7727_vm5, %v4620_v51, 0.0  ;;  %v3361_v18 = vadd.f32 %v3360_v29, %v8802_v44  ;;  %v3356_v31 = vrot.slane %v3355_v45, 2  ;;  %v3372_v59 = vrot.slane %v8813_v12, 4  ;;  %v8814_v51 = vld [vmem:[#allocation102_spill] sm:$0xff] }
 0x63f   :  { %4736 = vrot.lane.b32.xlu1 %v4627_v23, %s5760_s25  ;;  %4738 = vrot.lane.b32.xlu0 %v4628_v35, %s5760_s25  ;;  %v7751_v43 = vpop.permute.xlu1 %4776  ;;  %v3367_v48 = vadd.f32 %v3366_v33, %v8807_v2  ;;  %v3378_v15 = vrot.slane %v8814_v51, 4  ;;  %vm8815_vm11 = vcmp.gt.s32.totalorder %v8718_v13, 0  ;;  %v4158_v19 = vsel %vm7486_vm7, %v7296_v27, 0.0 }
 0x640   :  { %vm7761_vm4 = vmand %vm8815_vm11, %vm3813_vm8  ;;  %v3351_v34 = vadd.f32 %v3350_v7, %v3349_v20  ;;  %v3039_v8 = vadd.f32 %v3038_v24, %v3037_v57  ;;  %v3670_v29 = vrot.slane %v3669_v5, 1  ;;  %v3362_v2 = vrot.slane %v3361_v18, 2 }
 0x641   :  { %v7765_v42 = vpop.permute.xlu0 %4694  ;;  %v4629_v44 = vsel %vm7761_vm4, %v4621_v50, 0.0  ;;  %v3357_v33 = vadd.f32 %v3356_v31, %v3355_v45  ;;  %v3373_v30 = vadd.f32 %v3372_v59, %v8813_v12  ;;  %v3346_v23 = vrot.slane %v3345_v36, 1 }
 0x642   :  { %8818 = vst [vmem:[#allocation18_spill] sm:$0xff] %v7765_v42  ;;  %v3368_v35 = vrot.slane %v3367_v48, 2  ;;  %v3384_v27 = vrot.slane %v8819_v32, 4  ;;  %v3379_v42 = vadd.f32 %v3378_v15, %v8814_v51  ;;  %v4159_v57 = vsel %vm7594_vm9, %v7314_v47, 0.0 }
 0x643   :  { %4740 = vrot.lane.b32.xlu1 %v4629_v44, %s5760_s25  ;;  %4806 = vrot.lane.b32.xlu0 %v4158_v19, %s5760_s25  ;;  %v7774_v13 = vpop.permute.xlu1 %4780  ;;  %v4160_v20 = vsel %vm7500_vm15, %v7640_v40, 0.0  ;;  %v3352_v7 = vrot.slane %v3351_v34, 1  ;;  %v3248_v45 = vmul.f32 %v6734_v39, %v3039_v8  ;;  %v3671_v31 = vadd.f32 %v3670_v29, %v3669_v5 }
 0x644   :  { %v3363_v15 = vadd.f32 %v3362_v2, %v3361_v18  ;;  %v3374_v12 = vrot.slane %v3373_v30, 2  ;;  %v3347_v59 = vadd.f32 %v3346_v23, %v3345_v36  ;;  %v3358_v51 = vrot.slane %v3357_v33, 1 }
 0x645   :  { %v7779_v50 = vpop.permute.xlu0 %4698  ;;  %v3369_v19 = vadd.f32 %v3368_v35, %v3367_v48  ;;  %v3385_v47 = vadd.f32 %v3384_v27, %v8819_v32  ;;  %v3380_v44 = vrot.slane %v3379_v42, 2  ;;  %v4162_v40 = vsel %vm7514_vm12, %v7642_v0, 0.0 }
 0x646   :  { %v3256_v5 = vsel %vm7500_vm15, %v3248_v45, 0.0  ;;  %v3824_v32 = vmul.f32 %v6734_v39, %v3671_v31  ;;  %v3375_v36 = vadd.f32 %v3374_v12, %v3373_v30  ;;  %v3542_v18 = vmul.f32 %v6729_v16, %v3347_v59 }
 0x647   :  { %4808 = vrot.lane.b32.xlu1 %v4159_v57, %s5760_s25  ;;  %4810 = vrot.lane.b32.xlu0 %v4160_v20, %s5760_s25  ;;  %v4141_v24 = vpop.permute.xlu1 %4140  ;;  %v3353_v57 = vadd.f32 %v3352_v7, %v3351_v34  ;;  %v3359_v29 = vadd.f32 %v3358_v51, %v3357_v33  ;;  %v3364_v2 = vrot.slane %v3363_v15, 1  ;;  %v3386_v0 = vrot.slane %v3385_v47, 2 }
 0x648   :  { %v4161_v8 = vsel %vm7605_vm14, %v4141_v24, 0.0  ;;  %v3381_v23 = vadd.f32 %v3380_v44, %v3379_v42  ;;  %v3370_v35 = vrot.slane %v3369_v19, 1  ;;  %v3832_v34 = vsel %vm7557_vm3, %v3824_v32, 0.0 }
 0x649   :  { %v7791_v28 = vpop.permute.xlu0 %4726  ;;  %v4164_v20 = vsel %vm7528_vm0, %v7644_v21, 0.0  ;;  %v7810_v7 = vadd.f32 %v7741_v60, %v3256_v5  ;;  %v3543_v33 = vmul.f32 %v6736_v22, %v3353_v57  ;;  %vm8820_vm8 = vnez %v8695_v9 }
 0x64a   :  { %v3550_v24 = vsel %vm8820_vm8, %v3542_v18, 0.0  ;;  %v3544_v31 = vmul.f32 %v6734_v39, %v3359_v29  ;;  %v3365_v12 = vadd.f32 %v3364_v2, %v3363_v15  ;;  %v3376_v59 = vrot.slane %v3375_v36, 1 }
 0x64b   :  { %4814 = vrot.lane.b32.xlu0 %v4162_v40, %s5760_s25  ;;  %4812 = vrot.lane.b32.xlu1 %v4161_v8, %s5760_s25  ;;  %v4145_v48 = vpop.permute.xlu1 %4144  ;;  %v4790_v60 = vadd.f32 %v7664_v4, %v3550_v24  ;;  %v3387_v51 = vadd.f32 %v3386_v0, %v3385_v47  ;;  %v3371_v44 = vadd.f32 %v3370_v35, %v3369_v19  ;;  %v3382_v40 = vrot.slane %v3381_v23, 1  ;;  %v8826_v0 = vld [vmem:[#allocation63_spill] sm:$0xff]  ;;  %v8831_v24 = vld [vmem:[#allocation66_spill] sm:$0xff] }
 0x64c   :  { %v4163_v30 = vsel %vm7618_vm1, %v4145_v48, 0.0  ;;  %vm8821_vm10 = vnez %v8771_v54  ;;  %vm8822_vm13 = vnez %v8673_v38  ;;  %vm8823_vm11 = vnez %v8701_v46  ;;  %v8852_v38 = vld [vmem:[#allocation106_spill] sm:$0xff] }
 0x64d   :  { %v4731_v27 = vpop.permute.xlu0 %4730  ;;  %v3551_v5 = vsel %vm8822_vm13, %v3543_v33, 0.0  ;;  %v3552_v39 = vsel %vm8823_vm11, %v3544_v31, 0.0  ;;  %v3545_v19 = vmul.f32 %v6746_v10, %v3365_v12  ;;  %v3546_v47 = vmul.f32 %v6743_v6, %v3371_v44 }
 0x64e   :  { %v7814_v45 = vadd.f32 %v4731_v27, %v3832_v34  ;;  %v4791_v4 = vadd.f32 %v7610_v63, %v3551_v5  ;;  %v4792_v15 = vadd.f32 %v7686_v26, %v3552_v39  ;;  %v3383_v48 = vadd.f32 %v3382_v40, %v3381_v23  ;;  %v8834_v40 = vld [vmem:[#allocation51_spill] sm:$0xff]  ;;  %v8837_v39 = vld [vmem:[#allocation53_spill] sm:$0xff] }
 0x64f   :  { %4818 = vrot.lane.b32.xlu0 %v4164_v20, %s5760_s25  ;;  %4816 = vrot.lane.b32.xlu1 %v4163_v30, %s5760_s25  ;;  %v4149_v42 = vpop.permute.xlu1 %4148  ;;  %v3377_v32 = vadd.f32 %v3376_v59, %v3375_v36  ;;  %v3388_v18 = vrot.slane %v3387_v51, 1  ;;  %vm8824_vm15 = vnez %v8678_v41  ;;  %v8827_v20 = vld [vmem:[#allocation73_spill] sm:$0xff]  ;;  %v8832_v59 = vld [vmem:[#allocation76_spill] sm:$0xff]  ;;  %vm8838_vm0 = vnez %v8785_v56 }
 0x650   :  { %v4165_v8 = vsel %vm8821_vm10, %v4149_v42, 0.0  ;;  %v3554_v2 = vsel %vm8824_vm15, %v3546_v47, 0.0  ;;  %vm8825_vm10 = vnez %v8710_v53  ;;  %v3548_v34 = vmul.f32 %v6753_v49, %v3383_v48  ;;  %v8829_v42 = vld [vmem:[#allocation74_spill] sm:$0xff]  ;;  %v8839_v47 = vld [vmem:[#allocation27_spill] sm:$0xff] }
 0x651   :  { %v3553_v63 = vsel %vm8825_vm10, %v3545_v19, 0.0  ;;  %v4794_v26 = vadd.f32 %v8826_v0, %v3554_v2  ;;  %v3547_v36 = vmul.f32 %v8667_v58, %v3377_v32  ;;  %v3389_v23 = vadd.f32 %v3388_v18, %v3387_v51  ;;  %v8841_v18 = vld [vmem:[#allocation54_spill] sm:$0xff] }
 0x652   :  { %v4793_v35 = vadd.f32 %v7719_v1, %v3553_v63  ;;  %vm8828_vm1 = vnez %v8827_v20  ;;  %vm8830_vm14 = vnez %v8829_v42  ;;  %vm8833_vm9 = vnez %v8832_v59  ;;  %v8855_v53 = vld [vmem:[#allocation110_spill] sm:$0xff]  ;;  %v8856_v20 = vld [vmem:[#allocation91_spill] sm:$0xff] }
 0x653   :  { %4950 = vrot.lane.b32.xlu0 %v4790_v60, %s5761_s26  ;;  %4820 = vrot.lane.b32.xlu1 %v4165_v8, %s5760_s25  ;;  %v4849_v57 = vpop.permute.xlu1 %4848  ;;  %v3556_v30 = vsel %vm8828_vm1, %v3548_v34, 0.0  ;;  %v3555_v33 = vsel %vm8830_vm14, %v3547_v36, 0.0  ;;  %v3549_v31 = vmul.f32 %v8668_v61, %v3389_v23  ;;  %v8835_v8 = vld [vmem:[#allocation61_spill] sm:$0xff]  ;;  %v4674_v19 = vsel %vm7703_vm6, %v7660_v11, 0.0  ;;  %v8845_v36 = vld [vmem:[#allocation68_spill] sm:$0xff] }
 0x654   :  { %v4796_v60 = vadd.f32 %v8831_v24, %v3556_v30  ;;  %v4795_v1 = vadd.f32 %v7751_v43, %v3555_v33  ;;  %vm8836_vm7 = vnez %v8835_v8  ;;  %v4676_v63 = vsel %vm7727_vm5, %v8841_v18, 0.0  ;;  %v8846_v33 = vld [vmem:[#allocation41_spill] sm:$0xff] }
 0x655   :  { %v3557_v51 = vsel %vm8833_vm9, %v3549_v31, 0.0  ;;  %v4670_v5 = vsel %vm8836_vm7, %v8834_v40, 0.0  ;;  %vm8840_vm7 = vnez %v8839_v47  ;;  %v3600_v24 = vsel %vm8823_vm11, %v8846_v33, 0.0  ;;  %v8848_v31 = vld [vmem:[#allocation64_spill] sm:$0xff] }
 0x656   :  { %v4797_v44 = vadd.f32 %v7774_v13, %v3557_v51  ;;  %v4872_v9 = vadd.f32 %v8848_v31, %v3600_v24  ;;  %v3046_v18 = vrot.slane %v8856_v20, 4  ;;  %vm8897_vm11 = vnez %v8730_v37 }
 0x657   :  { %4954 = vrot.lane.b32.xlu0 %v4792_v15, %s5761_s26  ;;  %4952 = vrot.lane.b32.xlu1 %v4791_v4, %s5761_s26  ;;  %v4853_v29 = vpop.permute.xlu1 %4852  ;;  %v4672_v4 = vsel %vm7557_vm3, %v8837_v39, 0.0 }
 0x65b   :  { %4958 = vrot.lane.b32.xlu0 %v4794_v26, %s5761_s26  ;;  %4956 = vrot.lane.b32.xlu1 %v4793_v35, %s5761_s26  ;;  %v4857_v27 = vpop.permute.xlu1 %4856  ;;  %v8844_v35 = vld [vmem:[#allocation40_spill] sm:$0xff] }
 0x65c   :  { %v3598_v34 = vsel %vm8820_vm8, %v8844_v35, 0.0  ;;  %vm8890_vm8 = vnez %v8766_v25 }
 0x65d   :  { %v4870_v23 = vadd.f32 %v8845_v36, %v3598_v34  ;;  %v8859_v36 = vld [vmem:[#allocation116_spill] sm:$0xff] }
 0x65f   :  { %4962 = vrot.lane.b32.xlu0 %v4796_v60, %s5761_s26  ;;  %4960 = vrot.lane.b32.xlu1 %v4795_v1, %s5761_s26  ;;  %v4861_v12 = vpop.permute.xlu1 %4860  ;;  %v8847_v60 = vld [vmem:[#allocation56_spill] sm:$0xff] }
 0x660   :  { %v3599_v1 = vsel %vm8822_vm13, %v8847_v60, 0.0  ;;  %vm8893_vm13 = vnez %v8771_v54 }
 0x661   :  { %v4871_v51 = vadd.f32 %v4849_v57, %v3599_v1  ;;  %v3604_v57 = vsel %vm8828_vm1, %v8852_v38, 0.0  ;;  %vm8862_vm1 = vnez %v8738_v17 }
 0x663   :  { %4886 = vrot.lane.b32.xlu0 %v4670_v5, %s5760_s25  ;;  %4964 = vrot.lane.b32.xlu1 %v4797_v44, %s5761_s26  ;;  %v4649_v43 = vpop.permute.xlu1 %4648  ;;  %v8849_v44 = vld [vmem:[#allocation104_spill] sm:$0xff]  ;;  %v8850_v5 = vld [vmem:[#allocation105_spill] sm:$0xff] }
 0x664   :  { %v4671_v15 = vsel %vm8838_vm0, %v4649_v43, 0.0  ;;  %v3602_v40 = vsel %vm8824_vm15, %v8849_v44, 0.0  ;;  %v3601_v46 = vsel %vm8825_vm10, %v8850_v5, 0.0  ;;  %v8851_v43 = vld [vmem:[#allocation49_spill] sm:$0xff]  ;;  %vm8891_vm10 = vnez %v8835_v8 }
 0x665   :  { %v4874_v39 = vadd.f32 %v8851_v43, %v3602_v40 }
 0x667   :  { %4890 = vrot.lane.b32.xlu0 %v4672_v4, %s5760_s25  ;;  %4888 = vrot.lane.b32.xlu1 %v4671_v15, %s5760_s25  ;;  %v4653_v13 = vpop.permute.xlu1 %4652  ;;  %v4873_v4 = vadd.f32 %v4853_v29, %v3601_v46  ;;  %v8853_v15 = vld [vmem:[#allocation108_spill] sm:$0xff]  ;;  %v3605_v29 = vsel %vm8833_vm9, %v8855_v53, 0.0  ;;  %vm8889_vm9 = vnez %v8762_v55 }
 0x668   :  { %v4673_v48 = vsel %vm8840_vm7, %v4653_v13, 0.0  ;;  %v3603_v41 = vsel %vm8830_vm14, %v8853_v15, 0.0  ;;  %v8854_v13 = vld [vmem:[#allocation47_spill] sm:$0xff] }
 0x66b   :  { %4894 = vrot.lane.b32.xlu0 %v4674_v19, %s5760_s25  ;;  %4892 = vrot.lane.b32.xlu1 %v4673_v48, %s5760_s25  ;;  %v4657_v32 = vpop.permute.xlu1 %4656  ;;  %v4876_v19 = vadd.f32 %v8854_v13, %v3604_v57  ;;  %v4875_v48 = vadd.f32 %v4857_v27, %v3603_v41  ;;  %v8858_v27 = vld [vmem:[#allocation93_spill] sm:$0xff] }
 0x66c   :  { %v4675_v26 = vsel %vm7737_vm2, %v4657_v32, 0.0  ;;  %v4877_v32 = vadd.f32 %v4861_v12, %v3605_v29  ;;  %v3058_v35 = vrot.slane %v8858_v27, 4 }
 0x66e   :  { %v3059_v59 = vadd.f32 %v3058_v35, %v8858_v27 }
 0x66f   :  { %4898 = vrot.lane.b32.xlu0 %v4676_v63, %s5760_s25  ;;  %4896 = vrot.lane.b32.xlu1 %v4675_v26, %s5760_s25  ;;  %v4661_v11 = vpop.permute.xlu1 %4660  ;;  %v8857_v63 = vld [vmem:[#allocation114_spill] sm:$0xff] }
 0x670   :  { %v4677_v30 = vsel %vm7761_vm4, %v4661_v11, 0.0  ;;  %v3678_v26 = vrot.slane %v8857_v63, 4  ;;  %v3047_v11 = vadd.f32 %v3046_v18, %v8856_v20  ;;  %v3060_v1 = vrot.slane %v3059_v59, 2 }
 0x672   :  { %v3679_v34 = vadd.f32 %v3678_v26, %v8857_v63  ;;  %v3061_v44 = vadd.f32 %v3060_v1, %v3059_v59  ;;  %v8861_v63 = vld [vmem:[#allocation18_spill] sm:$0xff] }
 0x673   :  { %5006 = vrot.lane.b32.xlu0 %v4870_v23, %s5761_s26  ;;  %4900 = vrot.lane.b32.xlu1 %v4677_v30, %s5760_s25  ;;  %v7928_v42 = vpop.permute.xlu1 %4688  ;;  %v3690_v23 = vrot.slane %v8859_v36, 4  ;;  %v3048_v30 = vrot.slane %v3047_v11, 2 }
 0x674   :  { %v3680_v33 = vrot.slane %v3679_v34, 2 }
 0x675   :  { %v3691_v24 = vadd.f32 %v3690_v23, %v8859_v36  ;;  %v3049_v60 = vadd.f32 %v3048_v30, %v3047_v11 }
 0x676   :  { %v3681_v31 = vadd.f32 %v3680_v33, %v3679_v34 }
 0x677   :  { %5010 = vrot.lane.b32.xlu0 %v4872_v9, %s5761_s26  ;;  %5008 = vrot.lane.b32.xlu1 %v4871_v51, %s5761_s26  ;;  %v7935_v12 = vpop.permute.xlu1 %4692  ;;  %v3692_v9 = vrot.slane %v3691_v24, 2  ;;  %v3050_v40 = vrot.slane %v3049_v60, 1 }
 0x678   :  { %v3682_v46 = vrot.slane %v3681_v31, 1 }
 0x679   :  { %v3693_v5 = vadd.f32 %v3692_v9, %v3691_v24  ;;  %v3051_v43 = vadd.f32 %v3050_v40, %v3049_v60  ;;  %v8864_v60 = vld [vmem:[#allocation88_spill] sm:$0xff] }
 0x67a   :  { %v3683_v38 = vadd.f32 %v3682_v46, %v3681_v31  ;;  %v3022_v1 = vrot.slane %v8864_v60, 4  ;;  %v8865_v31 = vld [vmem:[#allocation87_spill] sm:$0xff] }
 0x67b   :  { %5014 = vrot.lane.b32.xlu0 %v4874_v39, %s5761_s26  ;;  %5012 = vrot.lane.b32.xlu1 %v4873_v4, %s5761_s26  ;;  %v7938_v51 = vpop.permute.xlu1 %4696  ;;  %v3062_v39 = vrot.slane %v3061_v44, 1  ;;  %v3694_v57 = vrot.slane %v3693_v5, 1  ;;  %v3250_v15 = vmul.f32 %v6743_v6, %v3051_v43  ;;  %v3028_v9 = vrot.slane %v8865_v31, 4 }
 0x67d   :  { %v3063_v41 = vadd.f32 %v3062_v39, %v3061_v44  ;;  %v3258_v53 = vsel %vm7514_vm12, %v3250_v15, 0.0  ;;  %v8866_v44 = vld [vmem:[#allocation90_spill] sm:$0xff]  ;;  %v3023_v39 = vadd.f32 %v3022_v1, %v8864_v60 }
 0x67e   :  { %v7954_v26 = vadd.f32 %v8861_v63, %v3258_v53  ;;  %v3040_v40 = vrot.slane %v8866_v44, 4 }
 0x67f   :  { %5018 = vrot.lane.b32.xlu0 %v4876_v19, %s5761_s26  ;;  %5016 = vrot.lane.b32.xlu1 %v4875_v48, %s5761_s26  ;;  %v7940_v4 = vpop.permute.xlu1 %4700  ;;  %v3826_v19 = vmul.f32 %v6743_v6, %v3683_v38  ;;  %v3695_v48 = vadd.f32 %v3694_v57, %v3693_v5  ;;  %v3252_v29 = vmul.f32 %v6753_v49, %v3063_v41  ;;  %v8867_v5 = vld [vmem:[#allocation92_spill] sm:$0xff]  ;;  %v8870_v41 = vld [vmem:[#allocation94_spill] sm:$0xff]  ;;  %v3024_v60 = vrot.slane %v3023_v39, 2  ;;  %v8877_v6 = vld [vmem:[#allocation115_spill] sm:$0xff] }
 0x680   :  { %8860 = vst [vmem:[#allocation46_spill] sm:$0xff] %v7940_v4  ;;  %v3052_v46 = vrot.slane %v8867_v5, 4  ;;  %v3029_v38 = vadd.f32 %v3028_v9, %v8865_v31  ;;  %v3041_v57 = vadd.f32 %v3040_v40, %v8866_v44  ;;  %v3696_v21 = vrot.slane %v8877_v6, 4 }
 0x681   :  { %v3828_v27 = vmul.f32 %v6753_v49, %v3695_v48  ;;  %v3260_v35 = vsel %vm8862_vm1, %v3252_v29, 0.0  ;;  %v8871_v48 = vld [vmem:[#allocation107_spill] sm:$0xff] }
 0x682   :  { %v7968_v30 = vadd.f32 %v7779_v50, %v3260_v35  ;;  %v3053_v15 = vadd.f32 %v3052_v46, %v8867_v5  ;;  %v3654_v53 = vrot.slane %v8871_v48, 4  ;;  %v8872_v29 = vld [vmem:[#allocation111_spill] sm:$0xff]  ;;  %v3030_v1 = vrot.slane %v3029_v38, 2 }
 0x683   :  { %5020 = vrot.lane.b32.xlu1 %v4877_v32, %s5761_s26  ;;  %v3834_v32 = vsel %vm7703_vm6, %v3826_v19, 0.0  ;;  %v3836_v34 = vsel %vm7727_vm5, %v3828_v27, 0.0  ;;  %v3064_v19 = vrot.slane %v8870_v41, 4  ;;  %v8874_v27 = vld [vmem:[#allocation113_spill] sm:$0xff]  ;;  %v3042_v31 = vrot.slane %v3041_v57, 2 }
 0x684   :  { %v3684_v35 = vrot.slane %v8874_v27, 4  ;;  %v3054_v9 = vrot.slane %v3053_v15, 2  ;;  %v3655_v40 = vadd.f32 %v3654_v53, %v8871_v48 }
 0x685   :  { %v3065_v44 = vadd.f32 %v3064_v19, %v8870_v41  ;;  %v3043_v2 = vadd.f32 %v3042_v31, %v3041_v57 }
 0x686   :  { %v3685_v49 = vadd.f32 %v3684_v35, %v8874_v27  ;;  %v3055_v52 = vadd.f32 %v3054_v9, %v3053_v15  ;;  %v3656_v41 = vrot.slane %v3655_v40, 2 }
 0x687   :  { %v3044_v35 = vrot.slane %v3043_v2, 1 }
 0x688   :  { %v3686_v53 = vrot.slane %v3685_v49, 2 }
 0x689   :  { %v3045_v4 = vadd.f32 %v3044_v35, %v3043_v2 }
 0x68a   :  { %v3687_v15 = vadd.f32 %v3686_v53, %v3685_v49 }
 0x6a9   :  { %v7943_v13 = vpop.permute.xlu1 %4728 }
 0x6ad   :  { %v4735_v20 = vpop.permute.xlu0 %4734  ;;  %v7951_v18 = vpop.permute.xlu1 %4732 }
 0x6ae   :  { %v7956_v11 = vadd.f32 %v4735_v20, %v3834_v32  ;;  %v3672_v32 = vrot.slane %v8872_v29, 4  ;;  %v8873_v20 = vld [vmem:[#allocation112_spill] sm:$0xff] }
 0x6af   :  { %v3660_v63 = vrot.slane %v8873_v20, 4 }
 0x6b0   :  { %v3673_v5 = vadd.f32 %v3672_v32, %v8872_v29  ;;  %v3697_v29 = vadd.f32 %v3696_v21, %v8877_v6  ;;  %v8882_v21 = vsub.f32 %v7810_v7, %v7814_v45  ;;  %v8883_v45 = vsub.f32 %v7954_v26, %v7956_v11 }
 0x6b1   :  { %v4739_v36 = vpop.permute.xlu0 %4738  ;;  %v7965_v23 = vpop.permute.xlu1 %4736  ;;  %v3661_v46 = vadd.f32 %v3660_v63, %v8873_v20 }
 0x6b2   :  { %v7970_v59 = vadd.f32 %v4739_v36, %v3836_v34  ;;  %v3674_v19 = vrot.slane %v3673_v5, 2  ;;  %v4928_v6 = vsub.f32 1.0, %v8882_v21  ;;  %v4930_v53 = vsub.f32 1.0, %v8883_v45 }
 0x6b3   :  { %v3662_v48 = vrot.slane %v3661_v46, 2 }
 0x6b5   :  { %v7974_v33 = vpop.permute.xlu0 %4806  ;;  %v7976_v24 = vpop.permute.xlu1 %4740  ;;  %v3663_v57 = vadd.f32 %v3662_v48, %v3661_v46  ;;  %v3688_v46 = vrot.slane %v3687_v15, 1  ;;  %v4936_v48 = vmax.f32 %v4928_v6, 0.0 }
 0x6b6   :  { %8863 = vst [vmem:[#allocation58_spill] sm:$0xff] %v7974_v33  ;;  %v3066_v33 = vrot.slane %v3065_v44, 2 }
 0x6b7   :  { %v3689_v11 = vadd.f32 %v3688_v46, %v3687_v15 }
 0x6b9   :  { %v7982_v43 = vpop.permute.xlu0 %4810  ;;  %v7984_v50 = vpop.permute.xlu1 %4808  ;;  %v3827_v46 = vmul.f32 %v8667_v58, %v3689_v11 }
 0x6ba   :  { %8868 = vst [vmem:[#allocation48_spill] sm:$0xff] %v7982_v43  ;;  %8869 = vst [vmem:[#allocation19_spill] sm:$0xff] %v7984_v50  ;;  %v3031_v43 = vadd.f32 %v3030_v1, %v3029_v38  ;;  %v3675_v38 = vadd.f32 %v3674_v19, %v3673_v5  ;;  %v3664_v5 = vrot.slane %v3663_v57, 1 }
 0x6bc   :  { %v3032_v27 = vrot.slane %v3031_v43, 1  ;;  %v3676_v49 = vrot.slane %v3675_v38, 1 }
 0x6bd   :  { %v7995_v34 = vpop.permute.xlu0 %4814  ;;  %v7997_v36 = vpop.permute.xlu1 %4812  ;;  %v8912_v47 = vld [vmem:[#allocation58_spill] sm:$0xff] }
 0x6be   :  { %8875 = vst [vmem:[#allocation72_spill] sm:$0xff] %v7995_v34  ;;  %8876 = vst [vmem:[#allocation50_spill] sm:$0xff] %v7997_v36  ;;  %v3025_v36 = vadd.f32 %v3024_v60, %v3023_v39  ;;  %v3657_v39 = vadd.f32 %v3656_v41, %v3655_v40  ;;  %v3698_v60 = vrot.slane %v3697_v29, 2  ;;  %v3033_v62 = vadd.f32 %v3032_v27, %v3031_v43 }
 0x6c0   :  { %v3026_v63 = vrot.slane %v3025_v36, 1  ;;  %v3658_v17 = vrot.slane %v3657_v39, 1  ;;  %v3699_v40 = vadd.f32 %v3698_v60, %v3697_v29  ;;  %v3247_v2 = vmul.f32 %v6736_v22, %v3033_v62 }
 0x6c1   :  { %v8005_v50 = vpop.permute.xlu0 %4818  ;;  %v8007_v34 = vpop.permute.xlu1 %4816  ;;  %v3665_v60 = vadd.f32 %v3664_v5, %v3663_v57  ;;  %v8884_v62 = vsub.f32 %v7968_v30, %v7970_v59 }
 0x6c2   :  { %8878 = vst [vmem:[#allocation75_spill] sm:$0xff] %v8005_v50  ;;  %8879 = vst [vmem:[#allocation77_spill] sm:$0xff] %v8007_v34  ;;  %v3056_v50 = vrot.slane %v3055_v52, 1  ;;  %v3067_v34 = vadd.f32 %v3066_v33, %v3065_v44  ;;  %v3659_v29 = vadd.f32 %v3658_v17, %v3657_v39  ;;  %v3700_v21 = vrot.slane %v3699_v40, 1  ;;  %v8885_v17 = vld [vmem:[#allocation59_spill] sm:$0xff]  ;;  %v8887_v39 = vld [vmem:[#allocation78_spill] sm:$0xff] }
 0x6c3   :  { %vm8886_vm14 = vnez %v8885_v17  ;;  %vm8888_vm15 = vnez %v8887_v39  ;;  %v8899_v17 = vld [vmem:[#allocation31_spill] sm:$0xff] }
 0x6c4   :  { %v3068_v33 = vrot.slane %v3067_v34, 1  ;;  %v3255_v57 = vsel %vm8888_vm15, %v3247_v2, 0.0  ;;  %v3822_v15 = vmul.f32 %v6729_v16, %v3659_v29 }
 0x6c5   :  { %v8010_v32 = vpop.permute.xlu0 %4950  ;;  %v8012_v20 = vpop.permute.xlu1 %4820 }
 0x6c6   :  { %8880 = vst [vmem:[#allocation35_spill] sm:$0xff] %v8010_v32  ;;  %8881 = vst [vmem:[#allocation16_spill] sm:$0xff] %v8012_v20  ;;  %v3027_v20 = vadd.f32 %v3026_v63, %v3025_v36  ;;  %v3057_v32 = vadd.f32 %v3056_v50, %v3055_v52  ;;  %v3249_v50 = vmul.f32 %v6746_v10, %v3045_v4 }
 0x6c7   :  { %v3069_v63 = vadd.f32 %v3068_v33, %v3067_v34 }
 0x6c8   :  { %v3246_v52 = vmul.f32 %v6729_v16, %v3027_v20  ;;  %v3251_v36 = vmul.f32 %v8667_v58, %v3057_v32  ;;  %v4932_v20 = vsub.f32 1.0, %v8884_v62  ;;  %v3830_v16 = vsel %vm8891_vm10, %v3822_v15, 0.0  ;;  %v8896_v62 = vld [vmem:[#allocation36_spill] sm:$0xff]  ;;  %v8902_v15 = vld [vmem:[#allocation33_spill] sm:$0xff] }
 0x6c9   :  { %v4955_v1 = vpop.permute.xlu0 %4954  ;;  %v8014_v31 = vpop.permute.xlu1 %4952  ;;  %v3253_v5 = vmul.f32 %v8668_v61, %v3069_v63  ;;  %v8894_v63 = vld [vmem:[#allocation34_spill] sm:$0xff]  ;;  %v3307_v14 = vsel %vm8890_vm8, %v8902_v15, 0.0 }
 0x6ca   :  { %v4976_v9 = vsub.f32 %v7810_v7, %v4955_v1  ;;  %v3677_v1 = vadd.f32 %v3676_v49, %v3675_v38  ;;  %v3254_v34 = vsel %vm8886_vm14, %v3246_v52, 0.0  ;;  %v3257_v38 = vsel %vm8889_vm9, %v3249_v50, 0.0 }
 0x6cb   :  { %v3259_v33 = vsel %vm8890_vm8, %v3251_v36, 0.0  ;;  %v4940_v45 = vmax.f32 %v4932_v20, 0.0  ;;  %v3304_v20 = vsel %vm8897_vm11, %v8896_v62, 0.0  ;;  %v8915_v62 = vld [vmem:[#allocation120_spill] sm:$0xff] }
 0x6cc   :  { %v4984_v44 = vsub.f32 1.0, %v4976_v9  ;;  %v3825_v49 = vmul.f32 %v6746_v10, %v3677_v1  ;;  %v3835_v10 = vsel %vm7737_vm2, %v3827_v46, 0.0 }
 0x6cd   :  { %v4959_v41 = vpop.permute.xlu0 %4958  ;;  %v8020_v19 = vpop.permute.xlu1 %4956  ;;  %v4755_v50 = vadd.f32 %v7965_v23, %v3835_v10  ;;  %v4713_v23 = vadd.f32 %v7935_v12, %v3257_v38 }
 0x6ce   :  { %v4992_v7 = vmax.f32 %v4984_v44, 0.0  ;;  %v4978_v43 = vsub.f32 %v7954_v26, %v4959_v41  ;;  %v4938_v26 = vmax.f32 %v4930_v53, 0.0  ;;  %v3701_v53 = vadd.f32 %v3700_v21, %v3699_v40  ;;  %v8892_v40 = vld [vmem:[#allocation39_spill] sm:$0xff] }
 0x6cf   :  { %v4710_v29 = vadd.f32 %v8892_v40, %v3254_v34  ;;  %v8081_v21 = vadd.f32 %v7938_v51, %v3259_v33  ;;  %v8903_v33 = vld [vmem:[#allocation35_spill] sm:$0xff]  ;;  %v8909_v40 = vld [vmem:[#allocation30_spill] sm:$0xff] }
 0x6d0   :  { %v8030_v27 = vadd.f32 %v4992_v7, %v4936_v48  ;;  %v4986_v35 = vsub.f32 1.0, %v4978_v43  ;;  %v4750_v43 = vadd.f32 %v7791_v28, %v3830_v16  ;;  %v3261_v28 = vsel %vm8893_vm13, %v3253_v5, 0.0 }
 0x6d1   :  { %v4963_v6 = vpop.permute.xlu0 %4962  ;;  %v8032_v9 = vpop.permute.xlu1 %4960  ;;  %v4923_v51 = vsub.f32 %v8081_v21, %v4755_v50  ;;  %v4974_v55 = vsub.f32 %v4710_v29, %v8903_v33  ;;  %v3880_v56 = vsel %vm7557_vm3, %v8909_v40, 0.0  ;;  %v8918_v33 = vld [vmem:[#allocation48_spill] sm:$0xff]  ;;  %v8923_v40 = vld [vmem:[#allocation77_spill] sm:$0xff] }
 0x6d2   :  { %v4994_v4 = vmax.f32 %v4986_v35, 0.0  ;;  %v4980_v32 = vsub.f32 %v7968_v30, %v4963_v6  ;;  %v3823_v30 = vmul.f32 %v6736_v22, %v3665_v60  ;;  %v3833_v22 = vsel %vm8840_vm7, %v3825_v49, 0.0  ;;  %v8895_v60 = vld [vmem:[#allocation29_spill] sm:$0xff] }
 0x6d3   :  { %v4753_v2 = vadd.f32 %v7951_v18, %v3833_v22  ;;  %v3302_v35 = vsel %vm8886_vm14, %v8894_v63, 0.0  ;;  %v3303_v1 = vsel %vm8888_vm15, %v8895_v60, 0.0  ;;  %v4711_v18 = vadd.f32 %v7928_v42, %v3255_v57  ;;  %v8900_v57 = vld [vmem:[#allocation57_spill] sm:$0xff]  ;;  %v8908_v22 = vld [vmem:[#allocation32_spill] sm:$0xff] }
 0x6d4   :  { %v8047_v44 = vadd.f32 %v4994_v4, %v4938_v26  ;;  %v4988_v59 = vsub.f32 1.0, %v4980_v32  ;;  %v3831_v52 = vsel %vm8838_vm0, %v3823_v30, 0.0  ;;  %v3829_v6 = vmul.f32 %v8668_v61, %v3701_v53  ;;  %v8898_v4 = vld [vmem:[#allocation37_spill] sm:$0xff]  ;;  %v8904_v30 = vld [vmem:[#allocation42_spill] sm:$0xff] }
 0x6d5   :  { %v4887_v41 = vpop.permute.xlu0 %4886  ;;  %v8053_v48 = vpop.permute.xlu1 %4964  ;;  %v4751_v58 = vadd.f32 %v7943_v13, %v3831_v52  ;;  %v4918_v26 = vsub.f32 %v4710_v29, %v4750_v43  ;;  %v3306_v32 = vsel %vm7514_vm12, %v8898_v4, 0.0  ;;  %v3305_v42 = vsel %vm8889_vm9, %v8899_v17, 0.0 }
 0x6d6   :  { %v4996_v7 = vmax.f32 %v4988_v59, 0.0  ;;  %v4921_v12 = vsub.f32 %v4713_v23, %v4753_v2  ;;  %v3837_v61 = vsel %vm7761_vm4, %v3829_v6, 0.0  ;;  %v3308_v38 = vsel %vm8862_vm1, %v8900_v57, 0.0  ;;  %v8913_v6 = vld [vmem:[#allocation117_spill] sm:$0xff] }
 0x6d7   :  { %v4919_v34 = vsub.f32 %v4711_v18, %v4751_v58  ;;  %v4757_v39 = vadd.f32 %v7976_v24, %v3837_v61  ;;  %v3309_v49 = vsel %vm8893_vm13, %v8904_v30, 0.0  ;;  %v4975_v46 = vsub.f32 %v4711_v18, %v8014_v31  ;;  %v8905_v24 = vld [vmem:[#allocation26_spill] sm:$0xff]  ;;  %v8919_v30 = vld [vmem:[#allocation19_spill] sm:$0xff] }
 0x6d8   :  { %v8067_v36 = vadd.f32 %v4996_v7, %v4940_v45  ;;  %v3878_v16 = vsel %vm8891_vm10, %v8905_v24, 0.0  ;;  %v8906_v45 = vld [vmem:[#allocation22_spill] sm:$0xff]  ;;  %v4926_v53 = vsub.f32 1.0, %v4918_v26  ;;  %v4977_v52 = vsub.f32 %v4713_v23, %v8020_v19 }
 0x6d9   :  { %v4891_v13 = vpop.permute.xlu0 %4890  ;;  %v4889_v11 = vpop.permute.xlu1 %4888  ;;  %v3879_v25 = vsel %vm8838_vm0, %v8906_v45, 0.0  ;;  %v8907_v7 = vld [vmem:[#allocation46_spill] sm:$0xff]  ;;  %v3881_v54 = vsel %vm8840_vm7, %v8908_v22, 0.0  ;;  %v4927_v10 = vsub.f32 1.0, %v4919_v34  ;;  %v4929_v58 = vsub.f32 1.0, %v4921_v12  ;;  %v8920_v45 = vld [vmem:[#allocation72_spill] sm:$0xff] }
 0x6da   :  { %v4717_v43 = vadd.f32 %v8907_v7, %v3261_v28  ;;  %v8121_v31 = vsub.f32 1.0, %v4923_v51  ;;  %v4910_v2 = vadd.f32 %v4887_v41, %v3878_v16  ;;  %v4982_v50 = vsub.f32 1.0, %v4974_v55  ;;  %v8911_v28 = vld [vmem:[#allocation118_spill] sm:$0xff]  ;;  %v8916_v51 = vld [vmem:[#allocation119_spill] sm:$0xff] }
 0x6db   :  { %v3883_v19 = vsel %vm7737_vm2, %v8911_v28, 0.0  ;;  %v4830_v18 = vadd.f32 %v8912_v47, %v3302_v35  ;;  %v4983_v23 = vsub.f32 1.0, %v4975_v46  ;;  %v3882_v41 = vsel %vm7703_vm6, %v8913_v6, 0.0  ;;  %v8922_v22 = vld [vmem:[#allocation75_spill] sm:$0xff] }
 0x6dc   :  { %v4925_v8 = vsub.f32 %v4717_v43, %v4757_v39  ;;  %v3885_v4 = vsel %vm7761_vm4, %v8915_v62, 0.0  ;;  %v4934_v17 = vmax.f32 %v4926_v53, 0.0  ;;  %v4985_v34 = vsub.f32 1.0, %v4977_v52 }
 0x6dd   :  { %v8104_v59 = vpop.permute.xlu0 %4894  ;;  %v4893_v5 = vpop.permute.xlu1 %4892  ;;  %v4911_v12 = vadd.f32 %v4889_v11, %v3879_v25  ;;  %v3884_v0 = vsel %vm7727_vm5, %v8916_v51, 0.0  ;;  %v4935_v39 = vmax.f32 %v4927_v10, 0.0  ;;  %v4937_v57 = vmax.f32 %v4929_v58, 0.0  ;;  %v8921_v25 = vld [vmem:[#allocation50_spill] sm:$0xff] }
 0x6de   :  { %v4939_v35 = vmax.f32 %v8121_v31, 0.0  ;;  %v5054_v37 = vsub.f32 %v4830_v18, %v4910_v2  ;;  %v8142_v15 = vsub.f32 1.0, %v4925_v8  ;;  %v4832_v55 = vadd.f32 %v8918_v33, %v3304_v20 }
 0x6df   :  { %v4831_v46 = vadd.f32 %v8919_v30, %v3303_v1  ;;  %v4990_v3 = vmax.f32 %v4982_v50, 0.0  ;;  %v8147_v11 = vadd.f32 %v8920_v45, %v3306_v32  ;;  %v4833_v53 = vadd.f32 %v8921_v25, %v3305_v42  ;;  %v8924_v1 = vld [vmem:[#allocation16_spill] sm:$0xff] }
 0x6e0   :  { %v4991_v7 = vmax.f32 %v4983_v23, 0.0  ;;  %v8151_v10 = vadd.f32 %v8922_v22, %v3308_v38  ;;  %v4993_v58 = vmax.f32 %v4985_v34, 0.0  ;;  %v4912_v2 = vadd.f32 %v4891_v13, %v3880_v56 }
 0x6e1   :  { %v8126_v63 = vpop.permute.xlu0 %4898  ;;  %v4897_v60 = vpop.permute.xlu1 %4896  ;;  %v5055_v8 = vsub.f32 %v4831_v46, %v4911_v12  ;;  %v8154_v20 = vadd.f32 %v8923_v40, %v3307_v14  ;;  %v8157_v50 = vadd.f32 %v8924_v1, %v3309_v49  ;;  %v5062_v29 = vsub.f32 1.0, %v5054_v37 }
 0x6e2   :  { %v5078_v32 = vadd.f32 %v4990_v3, %v4934_v17  ;;  %v4979_v42 = vsub.f32 %v8081_v21, %v8032_v9  ;;  %v4981_v47 = vsub.f32 %v4717_v43, %v8053_v48  ;;  %v5079_v6 = vadd.f32 %v4991_v7, %v4935_v39 }
 0x6e3   :  { %v5081_v14 = vadd.f32 %v4993_v58, %v4937_v57  ;;  %v5056_v62 = vsub.f32 %v4832_v55, %v4912_v2  ;;  %v5063_v34 = vsub.f32 1.0, %v5055_v8  ;;  %v4914_v49 = vadd.f32 %v8104_v59, %v3882_v41 }
 0x6e4   :  { %v5070_v12 = vmax.f32 %v5062_v29, 0.0  ;;  %v4987_v37 = vsub.f32 1.0, %v4979_v42  ;;  %v4989_v9 = vsub.f32 1.0, %v4981_v47  ;;  %v4915_v48 = vadd.f32 %v4897_v60, %v3883_v19 }
 0x6e5   :  { %v5007_v24 = vpop.permute.xlu0 %5006  ;;  %v4901_v16 = vpop.permute.xlu1 %4900  ;;  %v5064_v57 = vsub.f32 1.0, %v5056_v62  ;;  %v4916_v41 = vadd.f32 %v8126_v63, %v3884_v0  ;;  %vm8928_vm7 = vcmask 64512   ;;  %vm5241_vm12 = vcmask 57344  }
 0x6e6   :  { %v5030_v52 = vsub.f32 %v4830_v18, %v5007_v24  ;;  %v4913_v18 = vadd.f32 %v4893_v5, %v3881_v54  ;;  %v4917_v3 = vadd.f32 %v4901_v16, %v3885_v4  ;;  %v4995_v25 = vmax.f32 %v4987_v37, 0.0 }
 0x6e7   :  { %v5059_v60 = vsub.f32 %v8154_v20, %v4915_v48  ;;  %v5072_v40 = vmax.f32 %v5064_v57, 0.0  ;;  %v5060_v16 = vsub.f32 %v8151_v10, %v4916_v41 }
 0x6e8   :  { %v5038_v28 = vsub.f32 1.0, %v5030_v52  ;;  %v5057_v21 = vsub.f32 %v4833_v53, %v4913_v18  ;;  %v5061_v1 = vsub.f32 %v8157_v50, %v4917_v3 }
 0x6e9   :  { %v5011_v38 = vpop.permute.xlu0 %5010  ;;  %v5009_v23 = vpop.permute.xlu1 %5008  ;;  %v5068_v62 = vsub.f32 1.0, %v5060_v16 }
 0x6ea   :  { %v5046_v13 = vmax.f32 %v5038_v28, 0.0  ;;  %v5032_v56 = vsub.f32 %v4832_v55, %v5011_v38  ;;  %v5031_v26 = vsub.f32 %v4831_v46, %v5009_v23  ;;  %v5071_v55 = vmax.f32 %v5063_v34, 0.0 }
 0x6eb   :  { %v5058_v46 = vsub.f32 %v8147_v11, %v4914_v49  ;;  %v5065_v19 = vsub.f32 1.0, %v5057_v21  ;;  %v5069_v34 = vsub.f32 1.0, %v5061_v1 }
 0x6ec   :  { %v5086_v51 = vadd.f32 %v5078_v32, %v5046_v13  ;;  %v5040_v17 = vsub.f32 1.0, %v5032_v56  ;;  %v5039_v61 = vsub.f32 1.0, %v5031_v26  ;;  %v5067_v32 = vsub.f32 1.0, %v5059_v60 }
 0x6ed   :  { %v5015_v5 = vpop.permute.xlu0 %5014  ;;  %v5013_v43 = vpop.permute.xlu1 %5012  ;;  %v5066_v0 = vsub.f32 1.0, %v5058_v46  ;;  %v5073_v28 = vmax.f32 %v5065_v19, 0.0  ;;  %v5077_v37 = vmax.f32 %v5069_v34, 0.0 }
 0x6ee   :  { %v5094_v54 = vadd.f32 %v5086_v51, %v5070_v12  ;;  %v5048_v39 = vmax.f32 %v5040_v17, 0.0  ;;  %v5047_v33 = vmax.f32 %v5039_v61, 0.0  ;;  %v5034_v30 = vsub.f32 %v8147_v11, %v5015_v5 }
 0x6ef   :  { %v5033_v59 = vsub.f32 %v4833_v53, %v5013_v43  ;;  %v4997_v53 = vmax.f32 %v4989_v9, 0.0  ;;  %v5074_v26 = vmax.f32 %v5066_v0, 0.0  ;;  %v5762_v5 = vmov 1966171168  }
 0x6f0   :  { %v5087_v24 = vadd.f32 %v5079_v6, %v5047_v33  ;;  %v5042_v45 = vsub.f32 1.0, %v5034_v30  ;;  %5105 = vperm.xlu0 %5620, %v5094_v54   ;;  %v5088_v58 = vadd.f32 %v8030_v27, %v5048_v39  ;;  %v5188_v43 = vunpack.c.l.s4 %v5762_v5  ;;  %v8925_v33 = vld [vmem:[#allocation21_spill] sm:$0xff] }
 0x6f1   :  { %v5041_v7 = vsub.f32 1.0, %v5033_v59  ;;  %v5019_v52 = vpop.permute.xlu0 %5018  ;;  %v5017_v22 = vpop.permute.xlu1 %5016 }
 0x6f2   :  { %v5095_v2 = vadd.f32 %v5087_v24, %v5071_v55  ;;  %v5050_v8 = vmax.f32 %v5042_v45, 0.0  ;;  %v5036_v11 = vsub.f32 %v8151_v10, %v5019_v52  ;;  %v5035_v4 = vsub.f32 %v8154_v20, %v5017_v22 }
 0x6f3   :  { %v5049_v63 = vmax.f32 %v5041_v7, 0.0  ;;  %v5096_v18 = vadd.f32 %v5088_v58, %v5072_v40  ;;  %v4941_v20 = vmax.f32 %v8142_v15, 0.0  ;;  %v5083_v10 = vadd.f32 %v4995_v25, %v4939_v35  ;;  %v8926_v25 = vld [vmem:[#allocation20_spill] sm:$0xff] }
 0x6f4   :  { %v5044_v29 = vsub.f32 1.0, %v5036_v11  ;;  %5114 = vperm.xlu1 %5621, %v5095_v2   ;;  %v5043_v27 = vsub.f32 1.0, %v5035_v4  ;;  %v5090_v38 = vadd.f32 %v8047_v44, %v5050_v8  ;;  %v5076_v15 = vmax.f32 %v5068_v62, 0.0 }
 0x6f5   :  { %v5089_v42 = vadd.f32 %v5081_v14, %v5049_v63  ;;  %v5021_v47 = vpop.permute.xlu1 %5020  ;;  %v5075_v14 = vmax.f32 %v5067_v32, 0.0  ;;  %v5085_v51 = vadd.f32 %v4997_v53, %v4941_v20  ;;  %v5189_v57 = vunpack.c.0.s8 %v5188_v43 }
 0x6f6   :  { %v5052_v23 = vmax.f32 %v5044_v29, 0.0  ;;  %v5037_v6 = vsub.f32 %v8157_v50, %v5021_v47  ;;  %v5051_v56 = vmax.f32 %v5043_v27, 0.0  ;;  %v5098_v44 = vadd.f32 %v5090_v38, %v5074_v26  ;;  %v8927_v29 = vld [vmem:[#allocation52_spill] sm:$0xff] }
 0x6f7   :  { %v5097_v13 = vadd.f32 %v5089_v42, %v5073_v28  ;;  %v5192_v19 = vsub.s32 %v5189_v57, %v8926_v25  ;;  %vm5102_vm6 = vcmp.eq.s32.totalorder %v8926_v25, %v8927_v29 }
 0x6f8   :  { %v5045_v49 = vsub.f32 1.0, %v5037_v6  ;;  %5123 = vperm.xlu1 %5621, %v5096_v18   ;;  %v5091_v12 = vadd.f32 %v5083_v10, %v5051_v56  ;;  %v5092_v17 = vadd.f32 %v8067_v36, %v5052_v23 }
 0x6f9   :  { %5132 = vperm.xlu0 %5620, %v5097_v13  }
 0x6fa   :  { %v5053_v50 = vmax.f32 %v5045_v49, 0.0  ;;  %v5099_v61 = vadd.f32 %v5091_v12, %v5075_v14  ;;  %v5100_v35 = vadd.f32 %v5092_v17, %v5076_v15 }
 0x6fc   :  { %v5093_v31 = vadd.f32 %v5085_v51, %v5053_v50  ;;  %5141 = vperm.xlu1 %5621, %v5098_v44  }
 0x6fd   :  { %5150 = vperm.xlu0 %5620, %v5099_v61  }
 0x6fe   :  { %v5101_v9 = vadd.f32 %v5093_v31, %v5077_v37 }
 0x700   :  { %5159 = vperm.xlu1 %5621, %v5100_v35  }
 0x701   :  { %5168 = vperm.xlu0 %5620, %v5101_v9  }
 0x76f   :  { %v5106_v48 = vpop.permute.xlu0 %5105 }
 0x770   :  { %v5111_v41 = vrot.slane %v5106_v48, %v8925_v33 }
 0x773   :  { %v5115_v21 = vpop.permute.xlu1 %5114 }
 0x774   :  { %v5120_v55 = vrot.slane %v5115_v21, %v8925_v33 }
 0x776   :  { %v5183_v60 = vcombine.low %v5111_v41, %v5120_v55 }
 0x777   :  { %v5124_v54 = vpop.permute.xlu1 %5123 }
 0x778   :  { %v5133_v39 = vpop.permute.xlu0 %5132  ;;  %v5129_v30 = vrot.slane %v5124_v54, %v8925_v33  ;;  %v5193_v11 = vrot.slane %v5183_v60, %v5192_v19 }
 0x779   :  { %v5138_v36 = vrot.slane %v5133_v39, %v8925_v33 }
 0x77b   :  { %v5142_v46 = vpop.permute.xlu1 %5141  ;;  %v5184_v3 = vcombine.low %v5129_v30, %v5138_v36 }
 0x77c   :  { %v5151_v59 = vpop.permute.xlu0 %5150  ;;  %v5147_v24 = vrot.slane %v5142_v46, %v8925_v33 }
 0x77d   :  { %v5156_v45 = vrot.slane %v5151_v59, %v8925_v33  ;;  %v5200_v58 = vrot.slane %v5184_v3, %v5192_v19 }
 0x77f   :  { %v5160_v7 = vpop.permute.xlu1 %5159  ;;  %v5185_v2 = vcombine.low %v5147_v24, %v5156_v45  ;;  %v5215_v40 = vcombine.low %v5193_v11, %v5200_v58 }
 0x780   :  { %v5165_v52 = vrot.slane %v5160_v7, %v8925_v33  ;;  %v5169_v22 = vpop.permute.xlu0 %5168 }
 0x781   :  { %v5174_v8 = vrot.slane %v5169_v22, %v8925_v33  ;;  %v5207_v63 = vrot.slane %v5185_v2, %v5192_v19  ;;  %v5223_v16 = vrot.slane %v5215_v40, %v5192_v19 }
 0x783   :  { %v5186_v53 = vcombine.low %v5165_v52, %v5174_v8 }
 0x785   :  { %v5214_v4 = vrot.slane %v5186_v53, %v5192_v19 }
 0x787   :  { %v5216_v0 = vcombine.low %v5207_v63, %v5214_v4 }
 0x789   :  { %v5230_v1 = vrot.slane %v5216_v0, %v5192_v19 }
 0x78b   :  { %v5231_v28 = vcombine.low %v5223_v16, %v5230_v1 }
 0x78d   :  { %v5233_v32 = vsel %vm5102_vm6, %v5231_v28, 0.0 }
 0x78e   :  { %v5234_v42 = vsel %vm8928_vm7, %v5233_v32, 0.0 }
 0x78f   :  { %v5235_v27 = vrot.slane %v5234_v42, 4 }
 0x791   :  { %v5236_v47 = vadd.f32 %v5235_v27, %v5234_v42 }
 0x793   :  { %v5237_v18 = vrot.slane %v5236_v47, 2 }
 0x795   :  { %v5238_v38 = vadd.f32 %v5237_v18, %v5236_v47 }
 0x797   :  { %v5239_v23 = vrot.slane %v5238_v38, 1 }
 0x799   :  { %v5240_v6 = vadd.f32 %v5239_v23, %v5238_v38 }
 0x79b   :  { %5242 = vst.msk [vmem:[#allocation8] sm:$0x1] %vm5241_vm12, %v5240_v6 }
 0x79c   :  { %5723 = shalt.err (!%p5720_p0)
}
 0x79d   :  { %s5724_s6 = scalar_lea.hbm %s8205_s3, 16 }
 0x79e   :  { %p5725_p1 = scmp.ne.s32.totalorder %s8205_s3, %s5724_s6  ;;  %p5728_p2 = scmp.lt.u32.totalorder %s5724_s6, %s8205_s3 }
 0x7a0   :  { %p5730_p3 = pnand %p5728_p2, %p5725_p1 }
 0x7a2   :  { %5733 = shalt.err (!%p5730_p3)
}
 0x7a3   :  { %5252 = dma.vmem_to_hbm [thread:$0]  %s5250_s28, 16, %s8205_s3, [#allocation4]  }
 0x7a4   :  { %5738 = dma.done.wait [#allocation4], 16  }
 0x7a5   :  { %5739 = vsyncadd [#allocation4], 4294967280 }
 0x7a6   :  { %5256 = vsyncpa [#allocation3], 1 }
 0x7a7   :  { %5257 = vsyncpa [#allocation6], 1 }
 0x7a8   :  { %5258 = vsyncpa [#allocation4], 1 }

</bundles_post_ra>
